<compile_context>
chip_gen: v6e
topology: v6e:2x2x1
jax: 0.10.0
libtpu: 0.0.40
codegen_flags: <defaults>
</compile_context>

<pallas_src>
import jax
import jax.numpy as jnp
from jax.experimental import pallas as pl
from jax.experimental.pallas import tpu as pltpu


def _round_up(n, m):
    return (n + m - 1) // m * m


def _mlp_kernel(x_ref, w1_ref, b1_ref, w2_ref, b2_ref, w3_ref, b3_ref, o_ref):
    # x arrives f32; cast to the weights' compute dtype (bf16) on the VPU --
    # the cast hides under the MXU matmuls.
    x = x_ref[...].astype(w1_ref.dtype)
    # Layer 1: (TB, 784) @ (784, 384) + b1, ReLU (f32 accumulation on the MXU).
    h1 = jnp.dot(x, w1_ref[...], preferred_element_type=jnp.float32)
    h1 = jnp.maximum(h1 + b1_ref[...], 0.0)
    # Layer 2: (TB, 384) @ (384, 128) + b2, ReLU.
    h2 = jnp.dot(h1.astype(w2_ref.dtype), w2_ref[...],
                 preferred_element_type=jnp.float32)
    h2 = jnp.maximum(h2 + b2_ref[...], 0.0)
    # Output layer: (TB, 128) @ (128, 128) + b3 (no activation).
    out = jnp.dot(h2.astype(w3_ref.dtype), w3_ref[...],
                  preferred_element_type=jnp.float32)
    o_ref[...] = (out + b3_ref[...]).astype(o_ref.dtype)


def prepare_params(params, use_bf16=True):
    """Pad output feature dims to 128-lane multiples and cast weights ONCE.

    Weights are stored (in_features, out_features) -- the transpose of
    nn.Linear.weight -- so the kernel computes x @ W + b directly.  Only the
    N dims are padded (300->384, 100->128, 10->128); layer-1 K stays at 784
    so no MACs are wasted on padded K.  Zero padding keeps the math exact.
    """
    cd = jnp.bfloat16 if use_bf16 else jnp.float32
    w1, b1 = params["W1"], params["b1"]
    w2, b2 = params["W2"], params["b2"]
    w3, b3 = params["W3"], params["b3"]
    h1_p = _round_up(w1.shape[1], 128)   # 300 -> 384
    h2_p = _round_up(w2.shape[1], 128)   # 100 -> 128
    c_p = _round_up(w3.shape[1], 128)    # 10  -> 128

    def pad_w(w, rows, cols):
        return jnp.pad(w, ((0, rows - w.shape[0]),
                           (0, cols - w.shape[1]))).astype(cd)

    def pad_b(b, cols):
        return (jnp.pad(b, (0, cols - b.shape[0]))
                .astype(jnp.float32).reshape(1, cols))

    return {
        "W1": pad_w(w1, w1.shape[0], h1_p), "b1": pad_b(b1, h1_p),
        "W2": pad_w(w2, h1_p, h2_p),        "b2": pad_b(b2, h2_p),
        "W3": pad_w(w3, h2_p, c_p),         "b3": pad_b(b3, c_p),
        "num_classes": int(w3.shape[1]),
    }


def _pick_tile_b(batch, desired):
    """Batch tile: big enough to amortize the ~0.35us/step grid overhead and
    MXU drain, always >=16 sublanes (dense bf16 layouts), and for large
    batches capped at ceil(B/2) rounded to 128 so the grid keeps >=2 steps
    and both v7x TensorCores get work."""
    if batch <= 256:
        return max(16, _round_up(batch, 16))
    half = _round_up(pl.cdiv(batch, 2), 128)
    return max(128, min(desired, half))


def _build_call(x_shape, prepared, tile_b, multibuffer_x):
    B, d_in = x_shape
    w1, b1 = prepared["W1"], prepared["b1"]
    w2, b2 = prepared["W2"], prepared["b2"]
    w3, b3 = prepared["W3"], prepared["b3"]
    c_p = w3.shape[1]
    grid = (pl.cdiv(B, tile_b),)
    const = lambda i: (0, 0)  # weights/biases: same block every step -> VMEM resident

    if multibuffer_x:
        x_spec = pl.BlockSpec((tile_b, d_in), lambda i: (i, 0),
                              pipeline_mode=pl.Buffered(3))
    else:
        x_spec = pl.BlockSpec((tile_b, d_in), lambda i: (i, 0))

    return pl.pallas_call(
        _mlp_kernel,
        out_shape=jax.ShapeDtypeStruct((B, c_p), w1.dtype),
        grid_spec=pltpu.PrefetchScalarGridSpec(
            num_scalar_prefetch=0,
            grid=grid,
            in_specs=[
                x_spec,                          # x tile (only streamed input)
                pl.BlockSpec(w1.shape, const),   # W1
                pl.BlockSpec(b1.shape, const),   # b1
                pl.BlockSpec(w2.shape, const),   # W2
                pl.BlockSpec(b2.shape, const),   # b2
                pl.BlockSpec(w3.shape, const),   # W3
                pl.BlockSpec(b3.shape, const),   # b3
            ],
            out_specs=pl.BlockSpec((tile_b, c_p), lambda i: (i, 0)),
        ),
        compiler_params=pltpu.CompilerParams(
            dimension_semantics=("parallel",),
        ),
    )


def arm_mlp_forward(x, prepared, *, tile_b=512):
    """x: (B, input_dim) float32 (pre-flattened, as in score()'s view).
    Returns (B, num_classes) logits in the compute dtype (bf16 by default)."""
    B, _ = x.shape
    c = prepared["num_classes"]
    tb = _pick_tile_b(B, tile_b)
    args = (x, prepared["W1"], prepared["b1"], prepared["W2"], prepared["b2"],
            prepared["W3"], prepared["b3"])

    if hasattr(pl, "Buffered"):
        try:
            out = _build_call(x.shape, prepared, tb, True)(*args)
        except Exception:
            out = _build_call(x.shape, prepared, tb, False)(*args)
    else:
        out = _build_call(x.shape, prepared, tb, False)(*args)

    # Slice the padded class columns back off (rows are never padded).
    return out[:, :c]


def init_params(key, input_dim=784, layer_dims=(300, 100), num_classes=10):
    """Deterministic synthetic parameter init (shapes follow ARMMLP.__init__)."""
    dims = (input_dim,) + tuple(layer_dims) + (num_classes,)
    params = {}
    keys = jax.random.split(key, len(dims) - 1)
    for i, (d_in, d_out) in enumerate(zip(dims[:-1], dims[1:]), start=1):
        wkey, bkey = jax.random.split(keys[i - 1])
        scale = 1.0 / jnp.sqrt(jnp.float32(d_in))
        params[f"W{i}"] = jax.random.normal(wkey, (d_in, d_out), jnp.float32) * scale
        params[f"b{i}"] = jax.random.normal(bkey, (d_out,), jnp.float32) * 0.01
    return params


def reference_forward(x, params, use_bf16=True):
    """Pure-JAX reference with the same precision policy as the kernel."""
    cd = jnp.bfloat16 if use_bf16 else jnp.float32

    def dense(a, w, b):
        return jnp.dot(a.astype(cd), w.astype(cd),
                       preferred_element_type=jnp.float32) + b

    h1 = jnp.maximum(dense(x, params["W1"], params["b1"]), 0.0)
    h2 = jnp.maximum(dense(h1, params["W2"], params["b2"]), 0.0)
    return dense(h2, params["W3"], params["b3"])


if __name__ == "__main__":
    key = jax.random.PRNGKey(0)
    pkey, xkey = jax.random.split(key)

    input_dim, layer_dims, num_classes = 784, (300, 100), 10
    params = init_params(pkey, input_dim, layer_dims, num_classes)
    prepared = prepare_params(params, use_bf16=True)   # pad+cast weights once

    # Small batch, > 256 so the >=2-step grid path and a partial (masked)
    # last block are both exercised; the module does x.view(-1, 784), so the
    # flattened layout is passed directly.
    B = 300
    x = jax.random.normal(xkey, (B, input_dim), jnp.float32)

    out = arm_mlp_forward(x, prepared, tile_b=512)
    out = jax.block_until_ready(out)

    ref = reference_forward(x, params, use_bf16=True)
    assert out.shape == (B, num_classes)
    assert jnp.allclose(out.astype(jnp.float32), ref, atol=2e-2, rtol=2e-2), \
        "mismatch vs reference"

    print("KERNEL_OK")
</pallas_src>

<mosaic_0001>
module attributes {stable_mosaic.version = 11 : i64} {
  func.func @_mlp_kernel(%arg0: i32, %arg1: memref<256x784xf32, #tpu.memory_space<vmem>>, %arg2: memref<784x384xbf16, #tpu.memory_space<vmem>>, %arg3: memref<1x384xf32, #tpu.memory_space<vmem>>, %arg4: memref<384x128xbf16, #tpu.memory_space<vmem>>, %arg5: memref<1x128xf32, #tpu.memory_space<vmem>>, %arg6: memref<128x128xbf16, #tpu.memory_space<vmem>>, %arg7: memref<1x128xf32, #tpu.memory_space<vmem>>, %arg8: memref<256x128xbf16, #tpu.memory_space<vmem>>) attributes {dimension_semantics = [#tpu.dimension_semantics<parallel>], iteration_bounds = array<i64: 2>, scalar_prefetch = 0 : i64, scratch_operands = 0 : i64, tpu.core_type = #tpu.core_type<tc>, window_params = [{transform_indices = @transform_0, window_bounds = array<i64: 256, 784>}, {pipeline_mode = #tpu.pipeline_mode<synchronous>, transform_indices = @transform_1, window_bounds = array<i64: 784, 384>}, {pipeline_mode = #tpu.pipeline_mode<synchronous>, transform_indices = @transform_2, window_bounds = array<i64: 1, 384>}, {pipeline_mode = #tpu.pipeline_mode<synchronous>, transform_indices = @transform_3, window_bounds = array<i64: 384, 128>}, {pipeline_mode = #tpu.pipeline_mode<synchronous>, transform_indices = @transform_4, window_bounds = array<i64: 1, 128>}, {pipeline_mode = #tpu.pipeline_mode<synchronous>, transform_indices = @transform_5, window_bounds = array<i64: 128, 128>}, {pipeline_mode = #tpu.pipeline_mode<synchronous>, transform_indices = @transform_6, window_bounds = array<i64: 1, 128>}, {transform_indices = @transform_7, window_bounds = array<i64: 256, 128>}]} {
    %c0 = arith.constant 0 : index
    %c0_0 = arith.constant 0 : index
    %0 = vector.load %arg1[%c0, %c0_0] : memref<256x784xf32, #tpu.memory_space<vmem>>, vector<256x784xf32>
    %1 = arith.truncf %0 : vector<256x784xf32> to vector<256x784xbf16>
    %c0_1 = arith.constant 0 : index
    %c0_2 = arith.constant 0 : index
    %2 = vector.load %arg2[%c0_1, %c0_2] : memref<784x384xbf16, #tpu.memory_space<vmem>>, vector<784x384xbf16>
    %cst = arith.constant dense<0.000000e+00> : vector<256x384xf32>
    %3 = tpu.matmul %1, %2, %cst {dimension_numbers = #tpu.dot_dimension_numbers<[1], [0], [0], [1], [0, 0, 1, 1], [], []>} : vector<256x784xbf16>, vector<784x384xbf16>, vector<256x384xf32> -> vector<256x384xf32>
    %c0_3 = arith.constant 0 : index
    %c0_4 = arith.constant 0 : index
    %4 = vector.load %arg3[%c0_3, %c0_4] : memref<1x384xf32, #tpu.memory_space<vmem>>, vector<1x384xf32>
    %5 = vector.broadcast %4 : vector<1x384xf32> to vector<256x384xf32>
    %6 = arith.addf %3, %5 : vector<256x384xf32>
    %cst_5 = arith.constant 0.000000e+00 : f32
    %7 = vector.broadcast %cst_5 : f32 to vector<256x384xf32>
    %8 = arith.maximumf %6, %7 : vector<256x384xf32>
    %9 = arith.truncf %8 : vector<256x384xf32> to vector<256x384xbf16>
    %c0_6 = arith.constant 0 : index
    %c0_7 = arith.constant 0 : index
    %10 = vector.load %arg4[%c0_6, %c0_7] : memref<384x128xbf16, #tpu.memory_space<vmem>>, vector<384x128xbf16>
    %cst_8 = arith.constant dense<0.000000e+00> : vector<256x128xf32>
    %11 = tpu.matmul %9, %10, %cst_8 {dimension_numbers = #tpu.dot_dimension_numbers<[1], [0], [0], [1], [0, 0, 1, 1], [], []>} : vector<256x384xbf16>, vector<384x128xbf16>, vector<256x128xf32> -> vector<256x128xf32>
    %c0_9 = arith.constant 0 : index
    %c0_10 = arith.constant 0 : index
    %12 = vector.load %arg5[%c0_9, %c0_10] : memref<1x128xf32, #tpu.memory_space<vmem>>, vector<1x128xf32>
    %13 = vector.broadcast %12 : vector<1x128xf32> to vector<256x128xf32>
    %14 = arith.addf %11, %13 : vector<256x128xf32>
    %cst_11 = arith.constant 0.000000e+00 : f32
    %15 = vector.broadcast %cst_11 : f32 to vector<256x128xf32>
    %16 = arith.maximumf %14, %15 : vector<256x128xf32>
    %17 = arith.truncf %16 : vector<256x128xf32> to vector<256x128xbf16>
    %c0_12 = arith.constant 0 : index
    %c0_13 = arith.constant 0 : index
    %18 = vector.load %arg6[%c0_12, %c0_13] : memref<128x128xbf16, #tpu.memory_space<vmem>>, vector<128x128xbf16>
    %cst_14 = arith.constant dense<0.000000e+00> : vector<256x128xf32>
    %19 = tpu.matmul %17, %18, %cst_14 {dimension_numbers = #tpu.dot_dimension_numbers<[1], [0], [0], [1], [0, 0, 1, 1], [], []>} : vector<256x128xbf16>, vector<128x128xbf16>, vector<256x128xf32> -> vector<256x128xf32>
    %c0_15 = arith.constant 0 : index
    %c0_16 = arith.constant 0 : index
    %20 = vector.load %arg7[%c0_15, %c0_16] : memref<1x128xf32, #tpu.memory_space<vmem>>, vector<1x128xf32>
    %21 = vector.broadcast %20 : vector<1x128xf32> to vector<256x128xf32>
    %22 = arith.addf %19, %21 : vector<256x128xf32>
    %23 = arith.truncf %22 : vector<256x128xf32> to vector<256x128xbf16>
    %c0_17 = arith.constant 0 : index
    %c0_18 = arith.constant 0 : index
    %24 = vector.load %arg8[%c0_17, %c0_18] : memref<256x128xbf16, #tpu.memory_space<vmem>>, vector<256x128xbf16>
    tpu.vector_store %arg8[%c0_17, %c0_18], %23 {strides = array<i32>} : memref<256x128xbf16, #tpu.memory_space<vmem>>, vector<256x128xbf16>,
    return
  }
  func.func @transform_0(%arg0: i32) -> (i32, i32) {
    %c0_i32 = arith.constant 0 : i32
    %c0_i32_0 = arith.constant 0 : i32
    return %arg0, %c0_i32 : i32, i32
  }
  func.func @transform_1(%arg0: i32) -> (i32, i32) {
    %c0_i32 = arith.constant 0 : i32
    %c0_i32_0 = arith.constant 0 : i32
    %c0_i32_1 = arith.constant 0 : i32
    return %c0_i32, %c0_i32_0 : i32, i32
  }
  func.func @transform_2(%arg0: i32) -> (i32, i32) {
    %c0_i32 = arith.constant 0 : i32
    %c0_i32_0 = arith.constant 0 : i32
    %c0_i32_1 = arith.constant 0 : i32
    return %c0_i32, %c0_i32_0 : i32, i32
  }
  func.func @transform_3(%arg0: i32) -> (i32, i32) {
    %c0_i32 = arith.constant 0 : i32
    %c0_i32_0 = arith.constant 0 : i32
    %c0_i32_1 = arith.constant 0 : i32
    return %c0_i32, %c0_i32_0 : i32, i32
  }
  func.func @transform_4(%arg0: i32) -> (i32, i32) {
    %c0_i32 = arith.constant 0 : i32
    %c0_i32_0 = arith.constant 0 : i32
    %c0_i32_1 = arith.constant 0 : i32
    return %c0_i32, %c0_i32_0 : i32, i32
  }
  func.func @transform_5(%arg0: i32) -> (i32, i32) {
    %c0_i32 = arith.constant 0 : i32
    %c0_i32_0 = arith.constant 0 : i32
    %c0_i32_1 = arith.constant 0 : i32
    return %c0_i32, %c0_i32_0 : i32, i32
  }
  func.func @transform_6(%arg0: i32) -> (i32, i32) {
    %c0_i32 = arith.constant 0 : i32
    %c0_i32_0 = arith.constant 0 : i32
    %c0_i32_1 = arith.constant 0 : i32
    return %c0_i32, %c0_i32_0 : i32, i32
  }
  func.func @transform_7(%arg0: i32) -> (i32, i32) {
    %c0_i32 = arith.constant 0 : i32
    %c0_i32_0 = arith.constant 0 : i32
    return %arg0, %c0_i32 : i32, i32
  }
}

</mosaic_0001>

<bundles_post_ra>
// kernel: tpu_custom_call.1
= control target key start
LH: loop header
LB: loop body
LE: loop exit
PB: predicated region body
PF: predicated region fallthrough
CT: control target
= control target key end

     0   :  { %12 = vsyncpa [#allocation3], 0  ;;  %s8339_s0 = inlined_call_operand.hbm [shape: f32[300,784], index: 0, kind: input, shape index: {}]   ;;  %s8340_s1 = inlined_call_operand.hbm [shape: bf16[784,384], index: 1, kind: input, shape index: {}]   ;;  %s8341_s2 = inlined_call_operand.hbm [shape: f32[1,384], index: 2, kind: input, shape index: {}]   ;;  %s8342_s3 = inlined_call_operand.hbm [shape: bf16[384,128], index: 3, kind: input, shape index: {}]   ;;  %s8343_s4 = inlined_call_operand.hbm [shape: f32[1,128], index: 4, kind: input, shape index: {}]   ;;  %s8344_s5 = inlined_call_operand.hbm [shape: bf16[128,128], index: 5, kind: input, shape index: {}]   ;;  %s8345_s6 = inlined_call_operand.hbm [shape: f32[1,128], index: 6, kind: input, shape index: {}]   ;;  %s8346_s7 = inlined_call_operand.hbm [shape: bf16[300,128], index: 7, kind: output, shape index: {}]  }
   0x1   :  { %14 = vsyncpa [#allocation3 + $0x1], 0 }
   0x2   :  { %15 = vsyncpa [#allocation6], 0 }
   0x3   :  { %16 = vsyncpa [#allocation9], 0 }
   0x4   :  { %17 = vsyncpa [#allocation12], 0 }
   0x5   :  { %18 = vsyncpa [#allocation4], 0 }
   0x6   :  { %20 = vsyncpa [#allocation4 + $0x1], 0  ;;  %s6190_s24 = smov 0   ;;  %s6192_s25 = smov 0  }
   0x7   :  { %s6194_s26 = smov 0   ;;  %s6196_s27 = smov 0  }
   0x8 LB: > { %s6211_s28 = sadd.s32 4294967295, %s6131_s27   ;;  %s4451_s29 = sadd.s32 4294967294, %s6131_s27   ;;  %s6131_s27 = sphi %s6196_s27, %s8689_s27   ;;  %s6127_s26 = sphi %s6194_s26, %s8693_s26   ;;  %s6123_s25 = sphi %s6192_s25, %s8692_s25   ;;  %s6119_s24 = sphi %s6190_s24, %s8691_s24  }
   0x9   : > { %s6215_s30 = sadd.s32 1, %s6131_s27   ;;  %s33_s8 = sadd.s32 1, %s6127_s26 }
   0xa   : > { %8429 = sst [smem:[#allocation20_spill]] %s6215_s30  ;;  %s30_s9 = ssub.s32 %s6131_s27, %s6215_s30 }
   0xb   : > { %p40_p0 = scmp.ne.s32.totalorder %s6127_s26, %s6123_s25  ;;  %p31_p1 = scmp.eq.s32.totalorder %s30_s9, 0 }
   0xc   : > { %p41_p2 = scmp.eq.s32.totalorder %s6131_s27, 0  ;;  %p46_p3 = scmp.ne.s32.totalorder %s6123_s25, %s6119_s24 }
   0xd   : > { %p8347_p4 = scmp.eq.s32.totalorder %s6211_s28, 0  ;;  %p196_p7 = scmp.eq.s32.totalorder %s6211_s28, 1 }
   0xe   : > { %s6227_s10 = scalar_select %p31_p1, %s6127_s26, %s33_s8  }
   0xf   : > { %p6229_p5 = por %p41_p2, %p40_p0  ;;  %p6235_p6 = por %p8347_p4, %p46_p3 }
  0x10   : > { %8430 = sst [smem:[#allocation21_spill]] %s6227_s10  ;;  %p202_p8 = scmp.eq.s32.totalorder %s4451_s29, 1 }
  0x11   : > { %s8432_s12 = scalar_select %p6235_p6, 1, 0 }
  0x12   : > { %p4452_p9 = scmp.ge.s32.totalorder %s6131_s27, 1  ;;  %p209_p10 = scmp.lt.s32.totalorder %s6131_s27, 3 }
  0x13   : > { %p6242_p11 = por %p196_p7, %p40_p0  ;;  %p6246_p12 = por %p202_p8, %p46_p3 }
  0x14   : > { %p6250_p13 = pnand %p4452_p9, %p209_p10  ;;  %s6133_s16 = smov [#allocation5]  }
  0x15   : > { %s8433_s13 = scalar_select %p6242_p11, 1, 0 }
  0x16   : > { %s8434_s14 = scalar_select %p6246_p12, 1, 0 }
  0x17   : > { %s8435_s15 = scalar_select %p6250_p13, 1, 0 }
  0x18   : > { %p5561_p1 = pneg %p6250_p13  ;;  %s221_s17 = sshll.u32 %s6133_s16, 4  ;;  %s222_s17 = int_to_ptr.vmem [resolvable:$true] %s221_s17 }
  0x19   : > { %s6134_s19 = smov [#allocation8]   ;;  %s5884_s22 = scalar_lea.vmem %s222_s17, 18816 }
  0x1a   : > { %p6258_p2 = pnand %p5561_p1, %p8347_p4  ;;  %s245_s20 = sshll.u32 %s6134_s19, 4  ;;  %s246_s20 = int_to_ptr.vmem [resolvable:$true] %s245_s20 }
  0x1b   : > { %p5885_p3 = scmp.ne.s32.totalorder %s222_s17, %s5884_s22  ;;  %p5892_p9 = scmp.lt.s32.totalorder %s222_s17, %s222_s17 }
  0x1c   : > { %p6264_p0 = pneg %p6258_p2  ;;  %p5893_p10 = scmp.lt.s32.totalorder %s5884_s22, %s5884_s22 }
  0x1e   : > { %p5887_p7 = pnand %p5885_p3, %p6264_p0  ;;  %p5894_p1 = por %p5893_p10, %p5892_p9 }
  0x20   : > { %p5888_p8 = pneg %p5887_p7 }
  0x22   : > { %p5895_p4 = pnand %p5894_p1, %p5888_p8 }
  0x24   : > { %5898 = shalt.err (!%p5895_p4)
}
  0x25   : > { %s6135_s23 = smov 192   ;;  %s6136_s29 = smov 12  }
  0x26   : > { %5564 = dma.hbm_to_vmem [thread:$0]  (!%p6258_p2), %s8340_s1, 18816, %s222_s17, [#allocation6], %s6135_s23, %s6135_s23, %s6136_s29  }
  0x27   : > { %s5910_s16 = scalar_lea.vmem %s246_s20, 3072  ;;  %p5918_p7 = scmp.lt.s32.totalorder %s246_s20, %s246_s20 }
  0x28   : > { %p5911_p12 = scmp.ne.s32.totalorder %s246_s20, %s5910_s16  ;;  %p5919_p6 = scmp.lt.s32.totalorder %s5910_s16, %s5910_s16 }
  0x2a   : > { %p5913_p11 = pnand %p5911_p12, %p6264_p0  ;;  %p5920_p13 = por %p5919_p6, %p5918_p7 }
  0x2c   : > { %p5914_p3 = pneg %p5913_p11 }
  0x2e   : > { %p5921_p9 = pnand %p5920_p13, %p5914_p3 }
  0x30   : > { %5924 = shalt.err (!%p5921_p9)
}
  0x31   : > { %s6137_s19 = smov 64   ;;  %s6138_s22 = smov 4  }
  0x32   : > { %5570 = dma.hbm_to_vmem [thread:$0]  (!%p6258_p2), %s8342_s3, 3072, %s246_s20, [#allocation9], %s6137_s19, %s6137_s19, %s6138_s22  }
  0x33   : > { %s6139_s17 = smov [#allocation11]   ;;  %s6140_s29 = smov [#allocation7]  }
  0x34   : > { %s269_s23 = sshll.u32 %s6139_s17, 4  ;;  %s235_s8 = sshll.u32 %s6140_s29, 4  ;;  %s270_s23 = int_to_ptr.vmem [resolvable:$true] %s269_s23  ;;  %s236_s8 = int_to_ptr.vmem [resolvable:$true] %s235_s8 }
  0x35   : > { %s5936_s9 = scalar_lea.vmem %s270_s23, 1024  ;;  %p5944_p12 = scmp.lt.s32.totalorder %s270_s23, %s270_s23 }
  0x36   : > { %p5937_p4 = scmp.ne.s32.totalorder %s270_s23, %s5936_s9  ;;  %p5945_p13 = scmp.lt.s32.totalorder %s5936_s9, %s5936_s9 }
  0x38   : > { %p5939_p6 = pnand %p5937_p4, %p6264_p0  ;;  %p5946_p8 = por %p5945_p13, %p5944_p12 }
  0x3a   : > { %p5940_p11 = pneg %p5939_p6 }
  0x3c   : > { %p5947_p10 = pnand %p5946_p8, %p5940_p11 }
  0x3e   : > { %5950 = shalt.err (!%p5947_p10)
}
  0x3f   : > { %5576 = dma.hbm_to_vmem [thread:$0]  (!%p6258_p2), %s8344_s5, 1024, %s270_s23, [#allocation12], %s6137_s19, %s6137_s19, %s6138_s22  }
  0x40   : > { %s5962_s10 = scalar_lea.vmem %s236_s8, 48  ;;  %s5969_s20 = scalar_lea.vmem %s236_s8, 64 }
  0x41   : > { %p5963_p1 = scmp.ne.s32.totalorder %s236_s8, %s5962_s10  ;;  %p5970_p9 = scmp.lt.s32.totalorder %s236_s8, %s236_s8 }
  0x42   : > { %p5971_p4 = scmp.lt.s32.totalorder %s5969_s20, %s5962_s10 }
  0x43   : > { %p5965_p3 = pnand %p5963_p1, %p6264_p0 }
  0x44   : > { %p5972_p6 = por %p5971_p4, %p5970_p9 }
  0x45   : > { %p5966_p7 = pneg %p5965_p3 }
  0x47   : > { %p5973_p12 = pnand %p5972_p6, %p5966_p7 }
  0x49   : > { %5976 = shalt.err (!%p5973_p12)
}
  0x4a   : > { %5567 = dma.hbm_to_vmem [thread:$0]  (!%p6258_p2), %s8341_s2, 48, %s236_s8, [#allocation6]  }
  0x4b   : > { %s6141_s19 = smov [#allocation10]   ;;  %s6142_s23 = smov [#allocation13]  }
  0x4c   : > { %s259_s22 = sshll.u32 %s6141_s19, 4  ;;  %s283_s9 = sshll.u32 %s6142_s23, 4  ;;  %s260_s22 = int_to_ptr.vmem [resolvable:$true] %s259_s22  ;;  %s284_s9 = int_to_ptr.vmem [resolvable:$true] %s283_s9 }
  0x4d   : > { %s5988_s16 = scalar_lea.vmem %s260_s22, 16  ;;  %s5995_s30 = scalar_lea.vmem %s260_s22, 32 }
  0x4e   : > { %p5989_p11 = scmp.ne.s32.totalorder %s260_s22, %s5988_s16  ;;  %p5996_p10 = scmp.lt.s32.totalorder %s260_s22, %s260_s22 }
  0x4f   : > { %p5997_p1 = scmp.lt.s32.totalorder %s5995_s30, %s5988_s16 }
  0x50   : > { %p5991_p13 = pnand %p5989_p11, %p6264_p0 }
  0x51   : > { %p5998_p3 = por %p5997_p1, %p5996_p10 }
  0x52   : > { %p5992_p8 = pneg %p5991_p13 }
  0x54   : > { %p5999_p7 = pnand %p5998_p3, %p5992_p8 }
  0x56   : > { %6002 = shalt.err (!%p5999_p7)
}
  0x57   : > { %5573 = dma.hbm_to_vmem [thread:$0]  (!%p6258_p2), %s8343_s4, 16, %s260_s22, [#allocation9]  }
  0x58   : > { %s6014_s20 = scalar_lea.vmem %s284_s9, 16  ;;  %s6021_s17 = scalar_lea.vmem %s284_s9, 32 }
  0x59   : > { %p6015_p9 = scmp.ne.s32.totalorder %s284_s9, %s6014_s20  ;;  %p6022_p12 = scmp.lt.s32.totalorder %s284_s9, %s284_s9 }
  0x5a   : > { %p6023_p11 = scmp.lt.s32.totalorder %s6021_s17, %s6014_s20 }
  0x5b   : > { %p6017_p4 = pnand %p6015_p9, %p6264_p0 }
  0x5c   : > { %p6024_p13 = por %p6023_p11, %p6022_p12 }
  0x5d   : > { %p6018_p6 = pneg %p6017_p4 }
  0x5f   : > { %p6025_p10 = pnand %p6024_p13, %p6018_p6 }
  0x61   : > { %6028 = shalt.err (!%p6025_p10)
}
  0x62   : > { %5579 = dma.hbm_to_vmem [thread:$0]  (!%p6258_p2), %s8345_s6, 16, %s284_s9, [#allocation12]  }
  0x63   : > { %p4459_p8 = scmp.ge.s32.totalorder %s6131_s27, 2 }
  0x65   : > { %290 = sbr.rel (%p4459_p8) target bundleno = 140 (0x8c), region = 40 }
  0x6a   : > { %293 = sbr.rel (!%p6229_p5) target bundleno = 140 (0x8c), region = 44  ;;  %s294_s21 = sand.u32 (%p6229_p5), 1, %s6127_s26  }
  0x6b   : > { %s4460_s22 = sshll.u32 (%p6229_p5), %s6131_s27, 5  ;;  %s5532_s23 = smul.u32 (%p6229_p5), 1792, %s294_s21 }
  0x6c   : > { %s300_s16 = ssub.s32 (%p6229_p5), 38, %s4460_s22  ;;  %s6320_s30 = scalar_lea.sflag (%p6229_p5), [#allocation3], %s294_s21 }
  0x6d   : > { %p301_p0 = scmp.lt.s32.totalorder (%p6229_p5), %s300_s16, 32  ;;  %s298_s10 = scalar_lea.vmem (%p6229_p5), [#allocation2], %s5532_s23 }
  0x6f   : > { %s8695_s16 = smov (!%p301_p0, %s300_s16), 32 }
  0x70   : > { %s6317_s18 = smul.u32 896, %s8695_s16 }
  0x72   : > { %s306_s9 = ssub.s32 28672, %s6317_s18 }
  0x73   : > { %307 = vsyncadd %s6320_s30, %s306_s9  ;;  %p4463_p5 = scmp.ne.s32.totalorder %s6317_s18, 0  ;;  %s5533_s11 = smul.u32 28672, %s6131_s27 }
  0x74   : > { %s313_s8 = sshll.u32 %s298_s10, 4  ;;  %s6033_s23 = scalar_lea.hbm %s8339_s0, 34048  ;;  %s6330_s8 = int_to_ptr.vmem [resolvable:$true] %s313_s8 }
  0x75   : > { %s6328_s29 = scalar_lea.hbm %s8339_s0, %s5533_s11 }
  0x76   : > { %s6029_s19 = scalar_lea.hbm %s6328_s29, %s6317_s18  ;;  %p6034_p7 = scmp.lt.s32.totalorder %s6328_s29, %s8339_s0 }
  0x77   : > { %p6030_p2 = scmp.ne.s32.totalorder %s6328_s29, %s6029_s19  ;;  %p6035_p9 = scmp.lt.s32.totalorder %s6033_s23, %s6029_s19 }
  0x79   : > { %p6031_p1 = pnand %p6030_p2, %p4463_p5  ;;  %p6036_p4 = por %p6035_p9, %p6034_p7 }
  0x7b   : > { %p6032_p3 = pneg %p6031_p1 }
  0x7d   : > { %p6037_p6 = pnand %p6036_p4, %p6032_p3 }
  0x7f   : > { %6040 = shalt.err (!%p6037_p6)
}
  0x80   : > { %s6041_s10 = scalar_lea.vmem %s6330_s8, %s6317_s18  ;;  %s6143_s11 = smov [#allocation2]  }
  0x81   : > { %p6042_p12 = scmp.ne.s32.totalorder %s6330_s8, %s6041_s10  ;;  %s6045_s20 = sshll.u32 %s6143_s11, 4  ;;  %s6046_s20 = int_to_ptr.vmem [resolvable:$false] %s6045_s20 }
  0x82   : > { %s6047_s17 = scalar_lea.vmem %s6046_s20, 57344  ;;  %p6048_p10 = scmp.lt.s32.totalorder %s6330_s8, %s6046_s20 }
  0x83   : > { %p6043_p11 = pnand %p6042_p12, %p4463_p5  ;;  %p6049_p0 = scmp.lt.s32.totalorder %s6047_s17, %s6041_s10 }
  0x85   : > { %p6044_p13 = pneg %p6043_p11  ;;  %p6050_p2 = por %p6049_p0, %p6048_p10 }
  0x87   : > { %p6051_p1 = pnand %p6050_p2, %p6044_p13 }
  0x89   : > { %6054 = shalt.err (!%p6051_p1)
}
  0x8a   : > { %s6144_s19 = smov 896   ;;  %s6145_s21 = smov 56  }
  0x8b   : > { %319 = dma.hbm_to_vmem [thread:$0]  (%p4463_p5), %s6328_s29, %s6317_s18, %s6330_s8, %s6320_s30, %s6144_s19, %s6144_s19, %s6145_s21  }
  0x8c PF: > { %p8438_p3 = scmp.ne.s32.totalorder %s8435_s15, 0 }
  0x8e   : > { %325 = sbr.rel (%p8438_p3) target bundleno = 1344 (0x540), region = 48 }
  0x93   : > { %s6359_s22 = sand.u32 1, %s6123_s25   ;;  %p8439_p7 = scmp.ne.s32.totalorder %s8432_s12, 0 }
  0x94   : > { %s5534_s23 = smul.u32 1792, %s6359_s22  ;;  %s328_s16 = scalar_lea.sflag [#allocation3], %s6359_s22 }
  0x96   : > { %s6363_s9 = scalar_lea.vmem [#allocation2], %s5534_s23 }
  0x97   : > { %6098 = dma.done.wait (%p8439_p7), %s328_s16, 28672  }
  0x98   : > { %6100 = vsyncadd (%p8439_p7), %s328_s16, 4294938624  ;;  %p8440_p5 = scmp.eq.s32.totalorder %s6211_s28, 0 }
  0x9a   : > { %6102 = dma.done.wait (%p8440_p5), [#allocation6], 18864   ;;  %p8441_p9 = pmov %p8440_p5 }
  0x9b   : > { %p8442_p4 = pmov %p8440_p5 }
  0x9c   : > { %6104 = vsyncadd (%p8441_p9), [#allocation6], 4294948432 }
  0x9d   : > { %6106 = dma.done.wait (%p8442_p4), [#allocation9], 3088   ;;  %p8443_p6 = pmov %p8442_p4 }
  0x9e   : > { %p8444_p12 = pmov %p8442_p4 }
  0x9f   : > { %6108 = vsyncadd (%p8443_p6), [#allocation9], 4294964208 }
  0xa0   : > { %6110 = dma.done.wait (%p8444_p12), [#allocation12], 1040   ;;  %p8445_p11 = pmov %p8442_p4 }
  0xa1   : > { %v5644_v0 = vld [vmem:[#allocation5 + $0xac] ss:$12 sps:$4 sm:$0xff]   ;;  %v5648_v2 = vld [vmem:[#allocation5 + $0xa8] ss:$12 sps:$4 sm:$0xff]   ;;  %v5654_v6 = vld [vmem:[#allocation5 + $0x90] ss:$12 sps:$4 sm:$0xff]  }
  0xa2   : > { %6112 = vsyncadd (%p8445_p11), [#allocation12], 4294966256  ;;  %v5646_v1 = vld [vmem:[#allocation5 + $0x22c] ss:$12 sps:$4 sm:$0xff]   ;;  %1780 = vmatprep.subr.bf16.mxu0 %v5644_v0  ;;  %v5649_v3 = vld [vmem:[#allocation5 + $0x228] ss:$12 sps:$4 sm:$0xff]  }
  0xa3   : > { %1973 = vmatprep.subr.bf16.mxu1 %v5646_v1  ;;  %v5650_v4 = vld [vmem:[#allocation5 + $0x94] ss:$12 sps:$4 sm:$0xff]   ;;  %1781 = vmatpush1.bf16.msra.mxu0 %v5648_v2  ;;  %v5655_v7 = vld [vmem:[#allocation5 + $0x210] ss:$12 sps:$4 sm:$0xff]   ;;  %v5660_v10 = vld [vmem:[#allocation5 + $0x78] ss:$12 sps:$4 sm:$0xff]  }
  0xa4   : > { %1974 = vmatpush1.bf16.msra.mxu1 %v5649_v3  ;;  %v5652_v5 = vld [vmem:[#allocation5 + $0x214] ss:$12 sps:$4 sm:$0xff]   ;;  %1782 = vmatprep.subr.bf16.mxu0 %v5650_v4  ;;  %v5656_v8 = vld [vmem:[#allocation5 + $0x7c] ss:$12 sps:$4 sm:$0xff]   ;;  %v5661_v11 = vld [vmem:[#allocation5 + $0x1f8] ss:$12 sps:$4 sm:$0xff]  }
  0xa5   : > { %1975 = vmatprep.subr.bf16.mxu1 %v5652_v5  ;;  %v5658_v9 = vld [vmem:[#allocation5 + $0x1fc] ss:$12 sps:$4 sm:$0xff]   ;;  %v5662_v12 = vld [vmem:[#allocation5 + $0x64] ss:$12 sps:$4 sm:$0xff]   ;;  %v5666_v14 = vld [vmem:[#allocation5 + $0x60] ss:$12 sps:$4 sm:$0xff]  }
  0xa6   : > { %v5664_v13 = vld [vmem:[#allocation5 + $0x1e4] ss:$12 sps:$4 sm:$0xff]   ;;  %v5667_v15 = vld [vmem:[#allocation5 + $0x1e0] ss:$12 sps:$4 sm:$0xff]   ;;  %v5672_v18 = vld [vmem:[#allocation5 + $0x48] ss:$12 sps:$4 sm:$0xff]  }
  0xa7   : > { %1783 = vmatpush1.bf16.msra.mxu0 %v5654_v6  ;;  %v5668_v16 = vld [vmem:[#allocation5 + $0x4c] ss:$12 sps:$4 sm:$0xff]   ;;  %v5673_v19 = vld [vmem:[#allocation5 + $0x1c8] ss:$12 sps:$4 sm:$0xff]   ;;  %v5678_v22 = vld [vmem:[#allocation5 + $0x30] ss:$12 sps:$4 sm:$0xff]  }
  0xa8   : > { %1976 = vmatpush1.bf16.msra.mxu1 %v5655_v7  ;;  %1784 = vmatprep.subr.bf16.mxu0 %v5656_v8  ;;  %v5670_v17 = vld [vmem:[#allocation5 + $0x1cc] ss:$12 sps:$4 sm:$0xff]   ;;  %v5674_v20 = vld [vmem:[#allocation5 + $0x34] ss:$12 sps:$4 sm:$0xff]   ;;  %v5679_v23 = vld [vmem:[#allocation5 + $0x1b0] ss:$12 sps:$4 sm:$0xff]  }
  0xa9   : > { %1977 = vmatprep.subr.bf16.mxu1 %v5658_v9  ;;  %v5676_v21 = vld [vmem:[#allocation5 + $0x1b4] ss:$12 sps:$4 sm:$0xff]   ;;  %v5680_v24 = vld [vmem:[#allocation5 + $0x1c] ss:$12 sps:$4 sm:$0xff]   ;;  %v5684_v26 = vld [vmem:[#allocation5 + $0x18] ss:$12 sps:$4 sm:$0xff]  }
  0xaa   : > { %v5682_v25 = vld [vmem:[#allocation5 + $0x19c] ss:$12 sps:$4 sm:$0xff]   ;;  %v5685_v27 = vld [vmem:[#allocation5 + $0x198] ss:$12 sps:$4 sm:$0xff]   ;;  %v5690_v30 = vld [vmem:[#allocation5] ss:$12 sps:$4 sm:$0xff]  }
  0xab   : > { %1785 = vmatpush1.bf16.msra.mxu0 %v5660_v10  ;;  %v5686_v28 = vld [vmem:[#allocation5 + $0x4] ss:$12 sps:$4 sm:$0xff]   ;;  %v5691_v31 = vld [vmem:[#allocation5 + $0x180] ss:$12 sps:$4 sm:$0xff]   ;;  %v5696_v34 = vld [vmem:[#allocation5 + $0x168] ss:$12 sps:$4 sm:$0xff]  }
  0xac   : > { %1978 = vmatpush1.bf16.msra.mxu1 %v5661_v11  ;;  %1786 = vmatprep.subr.bf16.mxu0 %v5662_v12  ;;  %v5688_v29 = vld [vmem:[#allocation5 + $0x184] ss:$12 sps:$4 sm:$0xff]   ;;  %v5692_v32 = vld [vmem:[#allocation5 + $0x16c] ss:$12 sps:$4 sm:$0xff]   ;;  %v5697_v35 = vld [vmem:[#allocation5 + $0x2e8] ss:$12 sps:$4 sm:$0xff]  }
  0xad   : > { %1979 = vmatprep.subr.bf16.mxu1 %v5664_v13  ;;  %v5694_v33 = vld [vmem:[#allocation5 + $0x2ec] ss:$12 sps:$4 sm:$0xff]   ;;  %v5698_v36 = vld [vmem:[#allocation5 + $0x154] ss:$12 sps:$4 sm:$0xff]   ;;  %v5702_v38 = vld [vmem:[#allocation5 + $0x150] ss:$12 sps:$4 sm:$0xff]  }
  0xae   : > { %v5700_v37 = vld [vmem:[#allocation5 + $0x2d4] ss:$12 sps:$4 sm:$0xff]   ;;  %v5703_v39 = vld [vmem:[#allocation5 + $0x2d0] ss:$12 sps:$4 sm:$0xff]   ;;  %v5708_v42 = vld [vmem:[#allocation5 + $0x138] ss:$12 sps:$4 sm:$0xff]  }
  0xaf   : > { %1787 = vmatpush1.bf16.msra.mxu0 %v5666_v14  ;;  %v5704_v40 = vld [vmem:[#allocation5 + $0x13c] ss:$12 sps:$4 sm:$0xff]   ;;  %v5709_v43 = vld [vmem:[#allocation5 + $0x2b8] ss:$12 sps:$4 sm:$0xff]   ;;  %v408_v49 = vld [vmem:[%s6363_s9 + $0x50] sm:$0xff]  ;;  %vm1731_vm0 = vcmask 130048  }
  0xb0   : > { %1980 = vmatpush1.bf16.msra.mxu1 %v5667_v15  ;;  %1788 = vmatprep.subr.bf16.mxu0 %v5668_v16  ;;  %v5706_v41 = vld [vmem:[#allocation5 + $0x2bc] ss:$12 sps:$4 sm:$0xff]   ;;  %v5710_v44 = vld [vmem:[#allocation5 + $0x124] ss:$12 sps:$4 sm:$0xff]   ;;  %v5714_v50 = vld [vmem:[#allocation5 + $0x120] ss:$12 sps:$4 sm:$0xff]  }
  0xb1   : > { %1981 = vmatprep.subr.bf16.mxu1 %v5670_v17  ;;  %v5712_v45 = vld [vmem:[#allocation5 + $0x2a4] ss:$12 sps:$4 sm:$0xff]   ;;  %v399_v46 = vld [vmem:[%s6363_s9 + $0x8] sm:$0xff]  ;;  %v401_v48 = vld [vmem:[%s6363_s9 + $0x18] sm:$0xff]  ;;  %s4474_s12 = sshll.u32 %s6359_s22, 7  ;;  %s4302_s18 = scalar_lea.sflag [#allocation4], %s6359_s22 }
  0xb2   : > { %v406_v47 = vld [vmem:[%s6363_s9 + $0x40] sm:$0xff]  ;;  %v5716_v52 = vld [vmem:[#allocation5 + $0x10c] ss:$12 sps:$4 sm:$0xff]   ;;  %v6387_v54 = vpack.c.bf16 %v408_v49, %v401_v48  ;;  %v5720_v56 = vld [vmem:[#allocation5 + $0x108] ss:$12 sps:$4 sm:$0xff]   ;;  %s8231_s15 = scalar_lea.vmem [#allocation14], %s4474_s12 }
  0xb3   : > { %1789 = vmatpush1.bf16.msra.mxu0 %v5672_v18  ;;  %v5715_v51 = vld [vmem:[#allocation5 + $0x2a0] ss:$12 sps:$4 sm:$0xff]   ;;  %v6385_v53 = vpack.c.bf16 %v406_v47, %v399_v46  ;;  %v5721_v57 = vld [vmem:[#allocation5 + $0x288] ss:$12 sps:$4 sm:$0xff]   ;;  %v5726_v60 = vld [vmem:[#allocation5 + $0xf0] ss:$12 sps:$4 sm:$0xff]  }
  0xb4   : > { %1982 = vmatpush1.bf16.msra.mxu1 %v5673_v19  ;;  %1790 = vmatprep.subr.bf16.mxu0 %v5674_v20  ;;  %v5718_v55 = vld [vmem:[#allocation5 + $0x28c] ss:$12 sps:$4 sm:$0xff]   ;;  %v5722_v58 = vld [vmem:[#allocation5 + $0xf4] ss:$12 sps:$4 sm:$0xff]   ;;  %v5727_v61 = vld [vmem:[#allocation5 + $0x270] ss:$12 sps:$4 sm:$0xff]  }
  0xb5   : > { %1983 = vmatprep.subr.bf16.mxu1 %v5676_v21  ;;  %1812 = vmatprep.mubr.bf16.mxu0 %v6385_v53  ;;  %v5724_v59 = vld [vmem:[#allocation5 + $0x274] ss:$12 sps:$4 sm:$0xff]   ;;  %v5728_v62 = vld [vmem:[#allocation5 + $0xdc] ss:$12 sps:$4 sm:$0xff]   ;;  %v5732_v0 = vld [vmem:[#allocation5 + $0xd8] ss:$12 sps:$4 sm:$0xff]  }
  0xb6   : > { %2005 = vmatprep.mubr.bf16.mxu1 %v6387_v54  ;;  %v5730_v63 = vld [vmem:[#allocation5 + $0x25c] ss:$12 sps:$4 sm:$0xff]   ;;  %v5733_v1 = vld [vmem:[#allocation5 + $0x258] ss:$12 sps:$4 sm:$0xff]   ;;  %v5738_v4 = vld [vmem:[#allocation5 + $0xc0] ss:$12 sps:$4 sm:$0xff]  }
  0xb7   : > { %1791 = vmatpush1.bf16.msra.mxu0 %v5678_v22  ;;  %v5734_v2 = vld [vmem:[#allocation5 + $0xc4] ss:$12 sps:$4 sm:$0xff]   ;;  %v5739_v5 = vld [vmem:[#allocation5 + $0x240] ss:$12 sps:$4 sm:$0xff]   ;;  %v405_v7 = vld [vmem:[%s6363_s9 + $0x38] sm:$0xff]  ;;  %p8687_p13 = scmp.ne.s32.totalorder %s8433_s13, 0 }
  0xb8   : > { %1984 = vmatpush1.bf16.msra.mxu1 %v5679_v23  ;;  %1792 = vmatprep.subr.bf16.mxu0 %v5680_v24  ;;  %v5736_v3 = vld [vmem:[#allocation5 + $0x244] ss:$12 sps:$4 sm:$0xff]   ;;  %v407_v9 = vld [vmem:[%s6363_s9 + $0x48] sm:$0xff]  ;;  %v413_v11 = vld [vmem:[%s6363_s9 + $0x78] sm:$0xff]  ;;  %s4721_s30 = sshll.u32 (%p8687_p13), %s6211_s28, 5 }
  0xb9   : > { %1985 = vmatprep.subr.bf16.mxu1 %v5682_v25  ;;  %v398_v6 = vld [vmem:[%s6363_s9] sm:$0xff]  ;;  %v400_v8 = vld [vmem:[%s6363_s9 + $0x10] sm:$0xff]  ;;  %v5742_v10 = vld [vmem:[#allocation5 + $0x3ac] ss:$12 sps:$4 sm:$0xff]   ;;  %s4310_s8 = ssub.s32 (%p8687_p13), 38, %s4721_s30 }
  0xba   : > { %v420_v12 = vld [vmem:[%s6363_s9 + $0xb0] sm:$0xff]  ;;  %v415_v13 = vld [vmem:[%s6363_s9 + $0x88] sm:$0xff]  ;;  %v422_v14 = vld [vmem:[%s6363_s9 + $0xc0] sm:$0xff]  ;;  %v6399_v15 = vpack.c.bf16 %v405_v7, %v398_v6  ;;  %v6401_v16 = vpack.c.bf16 %v407_v9, %v400_v8  ;;  %p4311_p10 = scmp.lt.s32.totalorder (%p8687_p13), %s4310_s8, 32 }
  0xbb   : > { %1793 = vmatpush1.bf16.msra.mxu0 %v5684_v26  ;;  %v5740_v17 = vld [vmem:[#allocation5 + $0x3a8] ss:$12 sps:$4 sm:$0xff]   ;;  %v6403_v18 = vpack.c.bf16 %v420_v12, %v413_v11  ;;  %v6405_v19 = vpack.c.bf16 %v422_v14, %v415_v13  ;;  %v414_v22 = vld [vmem:[%s6363_s9 + $0x80] sm:$0xff]  ;;  %v421_v24 = vld [vmem:[%s6363_s9 + $0xb8] sm:$0xff] }
  0xbc   : > { %1986 = vmatpush1.bf16.msra.mxu1 %v5685_v27  ;;  %1794 = vmatprep.subr.bf16.mxu0 %v5686_v28  ;;  %v412_v20 = vld [vmem:[%s6363_s9 + $0x70] sm:$0xff]  ;;  %v419_v21 = vld [vmem:[%s6363_s9 + $0xa8] sm:$0xff]  ;;  %v434_v27 = vld [vmem:[%s6363_s9 + $0x120] sm:$0xff] }
  0xbd   : > { %1987 = vmatprep.subr.bf16.mxu1 %v5688_v29  ;;  %v5745_v23 = vld [vmem:[#allocation5 + $0x394] ss:$12 sps:$4 sm:$0xff]   ;;  %v5743_v25 = vld [vmem:[#allocation5 + $0x390] ss:$12 sps:$4 sm:$0xff]   ;;  %v427_v26 = vld [vmem:[%s6363_s9 + $0xe8] sm:$0xff] }
  0xbe   : > { %v429_v28 = vld [vmem:[%s6363_s9 + $0xf8] sm:$0xff]  ;;  %v436_v29 = vld [vmem:[%s6363_s9 + $0x130] sm:$0xff]  ;;  %v454_v6 = vld [vmem:[%s6363_s9 + $0x1c0] sm:$0xff] }
  0xbf   : > { %1795 = vmatpush1.bf16.msra.mxu0 %v5690_v30  ;;  %v5748_v30 = vld [vmem:[#allocation5 + $0x37c] ss:$12 sps:$4 sm:$0xff]   ;;  %v5754_v46 = vld [vmem:[#allocation5 + $0x34c] ss:$12 sps:$4 sm:$0xff]   ;;  %v5763_v8 = vld [vmem:[#allocation5 + $0x304] ss:$12 sps:$4 sm:$0xff]  }
  0xc0   : > { %1988 = vmatpush1.bf16.msra.mxu1 %v5691_v31  ;;  %1796 = vmatprep.subr.bf16.mxu0 %v5692_v32  ;;  %v6419_v31 = vpack.c.bf16 %v419_v21, %v412_v20  ;;  %v6421_v32 = vpack.c.bf16 %v421_v24, %v414_v22  ;;  %v461_v7 = vld [vmem:[%s6363_s9 + $0x1f8] sm:$0xff]  ;;  %v456_v9 = vld [vmem:[%s6363_s9 + $0x1d0] sm:$0xff]  ;;  %v471_v13 = vld [vmem:[%s6363_s9 + $0x248] sm:$0xff] }
  0xc1   : > { %1989 = vmatprep.subr.bf16.mxu1 %v5694_v33  ;;  %v6423_v33 = vpack.c.bf16 %v434_v27, %v427_v26  ;;  %v469_v11 = vld [vmem:[%s6363_s9 + $0x238] sm:$0xff]  ;;  %v476_v12 = vld [vmem:[%s6363_s9 + $0x270] sm:$0xff]  ;;  %v478_v14 = vld [vmem:[%s6363_s9 + $0x280] sm:$0xff]  ;;  %v6479_v21 = vpack.c.bf16 %v461_v7, %v454_v6 }
  0xc2   : > { %v5766_v20 = vld [vmem:[#allocation5 + $0x46c] ss:$12 sps:$4 sm:$0xff]   ;;  %v6485_v24 = vpack.c.bf16 %v478_v14, %v471_v13  ;;  %v468_v26 = vld [vmem:[%s6363_s9 + $0x230] sm:$0xff]  ;;  %v518_v14 = vld [vmem:[%s6363_s9 + $0x3c0] sm:$0xff] }
  0xc3   : > { %1797 = vmatpush2.bf16.msra.mxu0 %v5696_v34  ;;  %v6425_v34 = vpack.c.bf16 %v436_v29, %v429_v28  ;;  %v475_v27 = vld [vmem:[%s6363_s9 + $0x268] sm:$0xff]  ;;  %v5769_v28 = vld [vmem:[#allocation5 + $0x454] ss:$12 sps:$4 sm:$0xff]  }
  0xc4   : > { %1990 = vmatpush2.bf16.msra.mxu1 %v5697_v35  ;;  %1798 = vmatprep.subr.bf16.mxu0 %v5698_v36  ;;  %v5746_v35 = vld [vmem:[#allocation5 + $0x378] ss:$12 sps:$4 sm:$0xff]   ;;  %v5776_v7 = vld [vmem:[#allocation5 + $0x408] ss:$12 sps:$4 sm:$0xff]  }
  0xc5   : > { %1991 = vmatprep.subr.bf16.mxu1 %v5700_v37  ;;  %v426_v36 = vld [vmem:[%s6363_s9 + $0xe0] sm:$0xff]  ;;  %v433_v37 = vld [vmem:[%s6363_s9 + $0x118] sm:$0xff]  ;;  %v511_v13 = vld [vmem:[%s6363_s9 + $0x388] sm:$0xff] }
  0xc6   : > { %v6439_v47 = vpack.c.bf16 %v433_v37, %v426_v36  ;;  %v470_v29 = vld [vmem:[%s6363_s9 + $0x240] sm:$0xff]  ;;  %v485_v37 = vld [vmem:[%s6363_s9 + $0x2b8] sm:$0xff] }
  0xc7   : > { %1799 = vmatpush2.bf16.msra.mxu0 %v5702_v38  ;;  %v5751_v38 = vld [vmem:[#allocation5 + $0x364] ss:$12 sps:$4 sm:$0xff]  }
  0xc8   : > { %1992 = vmatpush2.bf16.msra.mxu1 %v5703_v39  ;;  %1800 = vmatprep.subr.bf16.mxu0 %v5704_v40  ;;  %v428_v39 = vld [vmem:[%s6363_s9 + $0xf0] sm:$0xff]  ;;  %v435_v40 = vld [vmem:[%s6363_s9 + $0x128] sm:$0xff]  ;;  %v490_v36 = vld [vmem:[%s6363_s9 + $0x2e0] sm:$0xff] }
  0xc9   : > { %1993 = vmatprep.subr.bf16.mxu1 %v5706_v41  ;;  %v441_v41 = vld [vmem:[%s6363_s9 + $0x158] sm:$0xff]  ;;  %v6441_v48 = vpack.c.bf16 %v435_v40, %v428_v39 }
  0xca   : > { %v5767_v39 = vld [vmem:[#allocation5 + $0x450] ss:$12 sps:$4 sm:$0xff]  }
  0xcb   : > { %1801 = vmatpush2.bf16.msra.mxu0 %v5708_v42  ;;  %v448_v42 = vld [vmem:[%s6363_s9 + $0x190] sm:$0xff]  ;;  %v5772_v40 = vld [vmem:[#allocation5 + $0x43c] ss:$12 sps:$4 sm:$0xff]  }
  0xcc   : > { %1994 = vmatpush2.bf16.msra.mxu1 %v5709_v43  ;;  %1802 = vmatprep.subr.bf16.mxu0 %v5710_v44  ;;  %v443_v43 = vld [vmem:[%s6363_s9 + $0x168] sm:$0xff]  ;;  %v450_v44 = vld [vmem:[%s6363_s9 + $0x1a0] sm:$0xff]  ;;  %v6443_v49 = vpack.c.bf16 %v448_v42, %v441_v41  ;;  %v6499_v41 = vpack.c.bf16 %v475_v27, %v468_v26 }
  0xcd   : > { %1995 = vmatprep.subr.bf16.mxu1 %v5712_v45  ;;  %v5749_v45 = vld [vmem:[#allocation5 + $0x360] ss:$12 sps:$4 sm:$0xff]   ;;  %v5784_v26 = vld [vmem:[#allocation5 + $0x3dc] ss:$12 sps:$4 sm:$0xff]  }
  0xcf   : > { %1803 = vmatpush2.bf16.msra.mxu0 %v5714_v50  ;;  %v6445_v50 = vpack.c.bf16 %v450_v44, %v443_v43 }
  0xd0   : > { %1996 = vmatpush2.bf16.msra.mxu1 %v5715_v51  ;;  %1804 = vmatprep.subr.bf16.mxu0 %v5716_v52  ;;  %v5752_v51 = vld [vmem:[#allocation5 + $0x348] ss:$12 sps:$4 sm:$0xff]  }
  0xd1   : > { %1997 = vmatprep.subr.bf16.mxu1 %v5718_v55  ;;  %v440_v52 = vld [vmem:[%s6363_s9 + $0x150] sm:$0xff]  ;;  %v447_v55 = vld [vmem:[%s6363_s9 + $0x188] sm:$0xff] }
  0xd3   : > { %1805 = vmatpush2.bf16.msra.mxu0 %v5720_v56  ;;  %v5757_v56 = vld [vmem:[#allocation5 + $0x334] ss:$12 sps:$4 sm:$0xff]  }
  0xd4   : > { %1998 = vmatpush2.bf16.msra.mxu1 %v5721_v57  ;;  %1806 = vmatprep.subr.bf16.mxu0 %v5722_v58  ;;  %v442_v57 = vld [vmem:[%s6363_s9 + $0x160] sm:$0xff]  ;;  %v449_v58 = vld [vmem:[%s6363_s9 + $0x198] sm:$0xff] }
  0xd5   : > { %1999 = vmatprep.subr.bf16.mxu1 %v5724_v59  ;;  %v455_v59 = vld [vmem:[%s6363_s9 + $0x1c8] sm:$0xff] }
  0xd7   : > { %1807 = vmatpush2.bf16.msra.mxu0 %v5726_v60  ;;  %v462_v60 = vld [vmem:[%s6363_s9 + $0x200] sm:$0xff] }
  0xd8   : > { %2000 = vmatpush2.bf16.msra.mxu1 %v5727_v61  ;;  %1808 = vmatprep.subr.bf16.mxu0 %v5728_v62  ;;  %v457_v61 = vld [vmem:[%s6363_s9 + $0x1d8] sm:$0xff]  ;;  %v464_v62 = vld [vmem:[%s6363_s9 + $0x210] sm:$0xff] }
  0xd9   : > { %2001 = vmatprep.subr.bf16.mxu1 %v5730_v63  ;;  %v5755_v63 = vld [vmem:[#allocation5 + $0x330] ss:$12 sps:$4 sm:$0xff]  }
  0xdb   : > { %1809 = vmatpush2.bf16.msra.mxu0 %v5732_v0  ;;  %v5760_v0 = vld [vmem:[#allocation5 + $0x31c] ss:$12 sps:$4 sm:$0xff]  }
  0xdc   : > { %2002 = vmatpush2.bf16.msra.mxu1 %v5733_v1  ;;  %1810 = vmatprep.subr.bf16.mxu0 %v5734_v2  ;;  %v6459_v1 = vpack.c.bf16 %v447_v55, %v440_v52  ;;  %v6461_v2 = vpack.c.bf16 %v449_v58, %v442_v57  ;;  %v5775_v52 = vld [vmem:[#allocation5 + $0x424] ss:$12 sps:$4 sm:$0xff]   ;;  %v497_v57 = vld [vmem:[%s6363_s9 + $0x318] sm:$0xff] }
  0xdd   : > { %2003 = vmatprep.subr.bf16.mxu1 %v5736_v3  ;;  %v6463_v3 = vpack.c.bf16 %v462_v60, %v455_v59  ;;  %v484_v55 = vld [vmem:[%s6363_s9 + $0x2b0] sm:$0xff]  ;;  %v499_v59 = vld [vmem:[%s6363_s9 + $0x328] sm:$0xff]  ;;  %v506_v60 = vld [vmem:[%s6363_s9 + $0x360] sm:$0xff] }
  0xde   : > { %v504_v58 = vld [vmem:[%s6363_s9 + $0x350] sm:$0xff]  ;;  %v6525_v6 = vpack.c.bf16 %v506_v60, %v499_v59 }
  0xdf   : > { %1811 = vmatpush2.bf16.msra.mxu0 %v5738_v4  ;;  %v6465_v4 = vpack.c.bf16 %v464_v62, %v457_v61  ;;  %v5773_v61 = vld [vmem:[#allocation5 + $0x420] ss:$12 sps:$4 sm:$0xff]  }
  0xe0   : > { %2004 = vmatpush2.bf16.msra.mxu1 %v5739_v5  ;;  %2166 = vmatprep.subr.bf16.mxu0 %v5742_v10  ;;  %v5758_v5 = vld [vmem:[#allocation5 + $0x318] ss:$12 sps:$4 sm:$0xff]   ;;  %8449 = vst [vmem:[#allocation25_spill] sm:$0xff] %v6525_v6 }
  0xe1   : > { %5500 = vmatprep.subr.bf16.mxu1 %v5742_v10  ;;  %v463_v10 = vld [vmem:[%s6363_s9 + $0x208] sm:$0xff] }
  0xe2   : > { %1813 = vmatmul.mubr.bf16.vlgmr.msra.gmra.mxu0 %v6399_v15  ;;  %v6481_v22 = vpack.c.bf16 %v463_v10, %v456_v9  ;;  %v5778_v62 = vld [vmem:[#allocation5 + $0x40c] ss:$12 sps:$4 sm:$0xff]   ;;  %v498_v10 = vld [vmem:[%s6363_s9 + $0x320] sm:$0xff] }
  0xe3   : > { %2006 = vmatmul.mubr.bf16.vlgmr.msra.gmra.mxu1 %v6401_v16  ;;  %2167 = vmatpush1.bf16.msra.mxu0 %v5740_v17  ;;  %v503_v9 = vld [vmem:[%s6363_s9 + $0x348] sm:$0xff] }
  0xe4   : > { %5516 = vmatpush1.bf16.msra.mxu1 %v5740_v17  ;;  %1822 = vmatprep.mubr.bf16.mxu0 %v6403_v18  ;;  %v5761_v17 = vld [vmem:[#allocation5 + $0x300] ss:$12 sps:$4 sm:$0xff]  }
  0xe5   : > { %2015 = vmatprep.mubr.bf16.mxu1 %v6405_v19  ;;  %2168 = vmatprep.subr.bf16.mxu0 %v5745_v23 }
  0xe6   : > { %5501 = vmatprep.subr.bf16.mxu1 %v5745_v23  ;;  %v6483_v23 = vpack.c.bf16 %v476_v12, %v469_v11  ;;  %v505_v11 = vld [vmem:[%s6363_s9 + $0x358] sm:$0xff]  ;;  %v5781_v12 = vld [vmem:[#allocation5 + $0x3f4] ss:$12 sps:$4 sm:$0xff]  }
  0xe7   : > { %2169 = vmatpush1.bf16.msra.mxu0 %v5743_v25 }
  0xe8   : > { %5517 = vmatpush1.bf16.msra.mxu1 %v5743_v25  ;;  %2170 = vmatprep.subr.bf16.mxu0 %v5748_v30  ;;  %v5764_v25 = vld [vmem:[#allocation5 + $0x468] ss:$12 sps:$4 sm:$0xff]  }
  0xe9   : > { %5502 = vmatprep.subr.bf16.mxu1 %v5748_v30  ;;  %v477_v30 = vld [vmem:[%s6363_s9 + $0x278] sm:$0xff] }
  0xea   : > { %1823 = vmatmul.mubr.bf16.gmra.mxu0 %v6419_v31  ;;  %v6501_v42 = vpack.c.bf16 %v477_v30, %v470_v29  ;;  %v6543_v29 = vpack.c.bf16 %v518_v14, %v511_v13  ;;  %v548_v13 = vld [vmem:[%s6363_s9 + $0x4b0] sm:$0xff] }
  0xeb   : > { %2016 = vmatmul.mubr.bf16.gmra.mxu1 %v6421_v32  ;;  %1832 = vmatprep.mubr.bf16.mxu0 %v6423_v33 }
  0xec   : > { %2025 = vmatprep.mubr.bf16.mxu1 %v6425_v34  ;;  %2171 = vmatpush1.bf16.msra.mxu0 %v5746_v35  ;;  %8446 = vst [vmem:[#allocation22_spill] sm:$0xff] %v6501_v42 }
  0xed   : > { %5518 = vmatpush1.bf16.msra.mxu1 %v5746_v35  ;;  %2172 = vmatprep.subr.bf16.mxu0 %v5751_v38  ;;  %v483_v35 = vld [vmem:[%s6363_s9 + $0x2a8] sm:$0xff] }
  0xee   : > { %5503 = vmatprep.subr.bf16.mxu1 %v5751_v38  ;;  %v492_v38 = vld [vmem:[%s6363_s9 + $0x2f0] sm:$0xff]  ;;  %v6503_v43 = vpack.c.bf16 %v490_v36, %v483_v35  ;;  %v5782_v35 = vld [vmem:[#allocation5 + $0x3d8] ss:$12 sps:$4 sm:$0xff]  }
  0xef   : > { %v6505_v44 = vpack.c.bf16 %v492_v38, %v485_v37  ;;  %v510_v36 = vld [vmem:[%s6363_s9 + $0x380] sm:$0xff]  ;;  %v517_v37 = vld [vmem:[%s6363_s9 + $0x3b8] sm:$0xff]  ;;  %v512_v38 = vld [vmem:[%s6363_s9 + $0x390] sm:$0xff] }
  0xf0   : > { %2173 = vmatpush1.bf16.msra.mxu0 %v5749_v45 }
  0xf1   : > { %5519 = vmatpush1.bf16.msra.mxu1 %v5749_v45  ;;  %2174 = vmatprep.subr.bf16.mxu0 %v5754_v46  ;;  %8447 = vst [vmem:[#allocation23_spill] sm:$0xff] %v6505_v44  ;;  %v5770_v45 = vld [vmem:[#allocation5 + $0x438] ss:$12 sps:$4 sm:$0xff]  }
  0xf2   : > { %5504 = vmatprep.subr.bf16.mxu1 %v5754_v46  ;;  %1833 = vmatmul.mubr.bf16.gmra.mxu0 %v6439_v47  ;;  %v482_v46 = vld [vmem:[%s6363_s9 + $0x2a0] sm:$0xff] }
  0xf3   : > { %2026 = vmatmul.mubr.bf16.gmra.mxu1 %v6441_v48  ;;  %1842 = vmatprep.mubr.bf16.mxu0 %v6443_v49 }
  0xf4   : > { %2035 = vmatprep.mubr.bf16.mxu1 %v6445_v50  ;;  %2175 = vmatpush1.bf16.msra.mxu0 %v5752_v51 }
  0xf5   : > { %5520 = vmatpush1.bf16.msra.mxu1 %v5752_v51  ;;  %2176 = vmatprep.subr.bf16.mxu0 %v5757_v56  ;;  %v489_v51 = vld [vmem:[%s6363_s9 + $0x2d8] sm:$0xff] }
  0xf6   : > { %5505 = vmatprep.subr.bf16.mxu1 %v5757_v56  ;;  %v491_v56 = vld [vmem:[%s6363_s9 + $0x2e8] sm:$0xff] }
  0xf8   : > { %2177 = vmatpush1.bf16.msra.mxu0 %v5755_v63 }
  0xf9   : > { %5521 = vmatpush1.bf16.msra.mxu1 %v5755_v63  ;;  %2178 = vmatprep.subr.bf16.mxu0 %v5760_v0  ;;  %v6519_v63 = vpack.c.bf16 %v489_v51, %v482_v46  ;;  %v532_v46 = vld [vmem:[%s6363_s9 + $0x430] sm:$0xff]  ;;  %v527_v51 = vld [vmem:[%s6363_s9 + $0x408] sm:$0xff] }
  0xfa   : > { %5506 = vmatprep.subr.bf16.mxu1 %v5760_v0  ;;  %1843 = vmatmul.mubr.bf16.gmra.mxu0 %v6459_v1  ;;  %v6521_v0 = vpack.c.bf16 %v491_v56, %v484_v55  ;;  %v5785_v55 = vld [vmem:[#allocation5 + $0x3c0] ss:$12 sps:$4 sm:$0xff]   ;;  %v5788_v56 = vld [vmem:[#allocation5 + $0x170] ss:$12 sps:$4 sm:$0xff]  }
  0xfb   : > { %2036 = vmatmul.mubr.bf16.gmra.mxu1 %v6461_v2  ;;  %1852 = vmatprep.mubr.bf16.mxu0 %v6463_v3 }
  0xfc   : > { %2045 = vmatprep.mubr.bf16.mxu1 %v6465_v4  ;;  %2179 = vmatpush1.bf16.msra.mxu0 %v5758_v5  ;;  %8448 = vst [vmem:[#allocation24_spill] sm:$0xff] %v6521_v0 }
  0xfd   : > { %5522 = vmatpush1.bf16.msra.mxu1 %v5758_v5  ;;  %2180 = vmatprep.subr.bf16.mxu0 %v5763_v8  ;;  %v6523_v5 = vpack.c.bf16 %v504_v58, %v497_v57  ;;  %v5792_v57 = vld [vmem:[#allocation5 + $0x484] ss:$12 sps:$4 sm:$0xff]   ;;  %v6559_v58 = vpack.c.bf16 %v517_v37, %v510_v36  ;;  %v547_v37 = vld [vmem:[%s6363_s9 + $0x4a8] sm:$0xff] }
  0xfe   : > { %5507 = vmatprep.subr.bf16.mxu1 %v5763_v8  ;;  %v496_v8 = vld [vmem:[%s6363_s9 + $0x310] sm:$0xff] }
  0xff   : > { %v6539_v27 = vpack.c.bf16 %v503_v9, %v496_v8  ;;  %v526_v8 = vld [vmem:[%s6363_s9 + $0x400] sm:$0xff]  ;;  %v533_v9 = vld [vmem:[%s6363_s9 + $0x438] sm:$0xff]  ;;  %v540_v36 = vld [vmem:[%s6363_s9 + $0x470] sm:$0xff] }
 0x100   : > { %2181 = vmatpush1.bf16.msra.mxu0 %v5761_v17 }
 0x101   : > { %5523 = vmatpush1.bf16.msra.mxu1 %v5761_v17  ;;  %2182 = vmatprep.subr.bf16.mxu0 %v5766_v20  ;;  %v513_v17 = vld [vmem:[%s6363_s9 + $0x398] sm:$0xff] }
 0x102   : > { %5508 = vmatprep.subr.bf16.mxu1 %v5766_v20  ;;  %1853 = vmatmul.mubr.bf16.gmra.mxu0 %v6479_v21  ;;  %v520_v20 = vld [vmem:[%s6363_s9 + $0x3d0] sm:$0xff] }
 0x103   : > { %2046 = vmatmul.mubr.bf16.gmra.mxu1 %v6481_v22  ;;  %1862 = vmatprep.mubr.bf16.mxu0 %v6483_v23  ;;  %v6545_v30 = vpack.c.bf16 %v520_v20, %v513_v17  ;;  %v6581_v17 = vpack.c.bf16 %v533_v9, %v526_v8  ;;  %v567_v8 = vld [vmem:[%s6363_s9 + $0x548] sm:$0xff]  ;;  %v574_v9 = vld [vmem:[%s6363_s9 + $0x580] sm:$0xff] }
 0x104   : > { %2055 = vmatprep.mubr.bf16.mxu1 %v6485_v24  ;;  %2183 = vmatpush2.bf16.msra.mxu0 %v5764_v25 }
 0x105   : > { %5524 = vmatpush2.bf16.msra.mxu1 %v5764_v25  ;;  %2184 = vmatprep.subr.bf16.mxu0 %v5769_v28  ;;  %v5779_v25 = vld [vmem:[#allocation5 + $0x3f0] ss:$12 sps:$4 sm:$0xff]   ;;  %8451 = vst [vmem:[#allocation27_spill] sm:$0xff] %v6545_v30  ;;  %8454 = vst [vmem:[#allocation30_spill] sm:$0xff] %v6581_v17 }
 0x106   : > { %5509 = vmatprep.subr.bf16.mxu1 %v5769_v28  ;;  %v6541_v28 = vpack.c.bf16 %v505_v11, %v498_v10  ;;  %v539_v10 = vld [vmem:[%s6363_s9 + $0x468] sm:$0xff]  ;;  %v546_v11 = vld [vmem:[%s6363_s9 + $0x4a0] sm:$0xff] }
 0x107   : > { %v6583_v20 = vpack.c.bf16 %v546_v11, %v539_v10  ;;  %v569_v10 = vld [vmem:[%s6363_s9 + $0x558] sm:$0xff]  ;;  %v576_v11 = vld [vmem:[%s6363_s9 + $0x590] sm:$0xff] }
 0x108   : > { %2185 = vmatpush2.bf16.msra.mxu0 %v5767_v39  ;;  %8450 = vst [vmem:[#allocation26_spill] sm:$0xff] %v6541_v28 }
 0x109   : > { %5525 = vmatpush2.bf16.msra.mxu1 %v5767_v39  ;;  %2186 = vmatprep.subr.bf16.mxu0 %v5772_v40  ;;  %v5787_v39 = vld [vmem:[#allocation5 + $0x3c4] ss:$12 sps:$4 sm:$0xff]  }
 0x10a   : > { %5510 = vmatprep.subr.bf16.mxu1 %v5772_v40  ;;  %1863 = vmatmul.mubr.bf16.gmra.mxu0 %v6499_v41  ;;  %v519_v40 = vld [vmem:[%s6363_s9 + $0x3c8] sm:$0xff] }
 0x10b   : > { %2056 = vmatmul.mubr.bf16.gmra.mxu1 %v6501_v42  ;;  %1872 = vmatprep.mubr.bf16.mxu0 %v6503_v43  ;;  %v6561_v59 = vpack.c.bf16 %v519_v40, %v512_v38  ;;  %v553_v38 = vld [vmem:[%s6363_s9 + $0x4d8] sm:$0xff]  ;;  %v555_v40 = vld [vmem:[%s6363_s9 + $0x4e8] sm:$0xff] }
 0x10c   : > { %2065 = vmatprep.mubr.bf16.mxu1 %v6505_v44  ;;  %2187 = vmatpush2.bf16.msra.mxu0 %v5770_v45 }
 0x10d   : > { %5526 = vmatpush2.bf16.msra.mxu1 %v5770_v45  ;;  %2188 = vmatprep.subr.bf16.mxu0 %v5775_v52  ;;  %v525_v45 = vld [vmem:[%s6363_s9 + $0x3f8] sm:$0xff]  ;;  %8452 = vst [vmem:[#allocation28_spill] sm:$0xff] %v6561_v59 }
 0x10e   : > { %5511 = vmatprep.subr.bf16.mxu1 %v5775_v52  ;;  %v534_v52 = vld [vmem:[%s6363_s9 + $0x440] sm:$0xff]  ;;  %v6563_v60 = vpack.c.bf16 %v532_v46, %v525_v45 }
 0x10f   : > { %v562_v45 = vld [vmem:[%s6363_s9 + $0x520] sm:$0xff] }
 0x110   : > { %2189 = vmatpush2.bf16.msra.mxu0 %v5773_v61 }
 0x111   : > { %5527 = vmatpush2.bf16.msra.mxu1 %v5773_v61  ;;  %2190 = vmatprep.subr.bf16.mxu0 %v5778_v62  ;;  %v6565_v61 = vpack.c.bf16 %v534_v52, %v527_v51  ;;  %v6601_v51 = vpack.c.bf16 %v547_v37, %v540_v36  ;;  %v566_v36 = vld [vmem:[%s6363_s9 + $0x540] sm:$0xff]  ;;  %v573_v37 = vld [vmem:[%s6363_s9 + $0x578] sm:$0xff] }
 0x112   : > { %5512 = vmatprep.subr.bf16.mxu1 %v5778_v62  ;;  %1873 = vmatmul.mubr.bf16.gmra.mxu0 %v6519_v63  ;;  %v524_v62 = vld [vmem:[%s6363_s9 + $0x3f0] sm:$0xff] }
 0x113   : > { %2066 = vmatmul.mubr.bf16.gmra.mxu1 %v6521_v0  ;;  %1882 = vmatprep.mubr.bf16.mxu0 %v6523_v5  ;;  %8453 = vst [vmem:[#allocation29_spill] sm:$0xff] %v6565_v61  ;;  %8456 = vst [vmem:[#allocation32_spill] sm:$0xff] %v6601_v51  ;;  %v5794_v0 = vld [vmem:[#allocation5 + $0x98] ss:$12 sps:$4 sm:$0xff]  }
 0x114   : > { %2075 = vmatprep.mubr.bf16.mxu1 %v6525_v6  ;;  %2191 = vmatpush2.bf16.msra.mxu0 %v5776_v7  ;;  %v584_v6 = vld [vmem:[%s6363_s9 + $0x5d0] sm:$0xff] }
 0x115   : > { %5528 = vmatpush2.bf16.msra.mxu1 %v5776_v7  ;;  %2192 = vmatprep.subr.bf16.mxu0 %v5781_v12  ;;  %v531_v7 = vld [vmem:[%s6363_s9 + $0x428] sm:$0xff] }
 0x116   : > { %5513 = vmatprep.subr.bf16.mxu1 %v5781_v12  ;;  %v541_v12 = vld [vmem:[%s6363_s9 + $0x478] sm:$0xff]  ;;  %v6579_v14 = vpack.c.bf16 %v531_v7, %v524_v62  ;;  %v554_v62 = vld [vmem:[%s6363_s9 + $0x4e0] sm:$0xff] }
 0x117   : > { %v561_v7 = vld [vmem:[%s6363_s9 + $0x518] sm:$0xff] }
 0x118   : > { %2193 = vmatpush2.bf16.msra.mxu0 %v5779_v25 }
 0x119   : > { %5529 = vmatpush2.bf16.msra.mxu1 %v5779_v25  ;;  %2194 = vmatprep.subr.bf16.mxu0 %v5784_v26  ;;  %v6585_v25 = vpack.c.bf16 %v548_v13, %v541_v12  ;;  %v6621_v13 = vpack.c.bf16 %v561_v7, %v554_v62  ;;  %v6639_v62 = vpack.c.bf16 %v573_v37, %v566_v36  ;;  %v595_v36 = vld [vmem:[%s6363_s9 + $0x628] sm:$0xff]  ;;  %v602_v37 = vld [vmem:[%s6363_s9 + $0x660] sm:$0xff] }
 0x11a   : > { %5514 = vmatprep.subr.bf16.mxu1 %v5784_v26  ;;  %1883 = vmatmul.mubr.bf16.gmra.mxu0 %v6539_v27  ;;  %v538_v26 = vld [vmem:[%s6363_s9 + $0x460] sm:$0xff] }
 0x11b   : > { %2076 = vmatmul.mubr.bf16.gmra.mxu1 %v6541_v28  ;;  %1892 = vmatprep.mubr.bf16.mxu0 %v6543_v29  ;;  %8455 = vst [vmem:[#allocation31_spill] sm:$0xff] %v6585_v25  ;;  %8458 = vst [vmem:[#allocation34_spill] sm:$0xff] %v6621_v13  ;;  %v416_v28 = vld [vmem:[%s6363_s9 + $0x90] sm:$0xff] }
 0x11c   : > { %2085 = vmatprep.mubr.bf16.mxu1 %v6545_v30  ;;  %2195 = vmatpush2.bf16.msra.mxu0 %v5782_v35  ;;  %v577_v30 = vld [vmem:[%s6363_s9 + $0x598] sm:$0xff] }
 0x11d   : > { %5530 = vmatpush2.bf16.msra.mxu1 %v5782_v35  ;;  %2196 = vmatprep.subr.bf16.mxu0 %v5787_v39  ;;  %v545_v35 = vld [vmem:[%s6363_s9 + $0x498] sm:$0xff] }
 0x11e   : > { %5515 = vmatprep.subr.bf16.mxu1 %v5787_v39  ;;  %v560_v39 = vld [vmem:[%s6363_s9 + $0x510] sm:$0xff]  ;;  %v6599_v46 = vpack.c.bf16 %v545_v35, %v538_v26  ;;  %v6623_v26 = vpack.c.bf16 %v574_v9, %v567_v8  ;;  %v6625_v35 = vpack.c.bf16 %v576_v11, %v569_v10  ;;  %v587_v11 = vld [vmem:[%s6363_s9 + $0x5e8] sm:$0xff] }
 0x11f   : > { %v6603_v52 = vpack.c.bf16 %v560_v39, %v553_v38  ;;  %v568_v38 = vld [vmem:[%s6363_s9 + $0x550] sm:$0xff]  ;;  %v575_v39 = vld [vmem:[%s6363_s9 + $0x588] sm:$0xff] }
 0x120   : > { %2197 = vmatpush2.bf16.msra.mxu0 %v5785_v55  ;;  %8459 = vst [vmem:[#allocation35_spill] sm:$0xff] %v6625_v35  ;;  %v6641_v7 = vpack.c.bf16 %v575_v39, %v568_v38  ;;  %v580_v10 = vld [vmem:[%s6363_s9 + $0x5b0] sm:$0xff]  ;;  %v597_v38 = vld [vmem:[%s6363_s9 + $0x638] sm:$0xff] }
 0x121   : > { %5531 = vmatpush2.bf16.msra.mxu1 %v5785_v55  ;;  %4857 = vmatprep.subr.bf16.mxu0 %v5788_v56  ;;  %v6605_v55 = vpack.c.bf16 %v562_v45, %v555_v40  ;;  %v552_v56 = vld [vmem:[%s6363_s9 + $0x4d0] sm:$0xff]  ;;  %v581_v40 = vld [vmem:[%s6363_s9 + $0x5b8] sm:$0xff] }
 0x122   : > { %2373 = vmatprep.subr.bf16.mxu1 %v5792_v57  ;;  %1893 = vmatmul.mubr.bf16.gmra.mxu0 %v6559_v58  ;;  %v559_v57 = vld [vmem:[%s6363_s9 + $0x508] sm:$0xff]  ;;  %v588_v45 = vld [vmem:[%s6363_s9 + $0x5f0] sm:$0xff]  ;;  %8460 = vst [vmem:[#allocation36_spill] sm:$0xff] %v6641_v7 }
 0x123   : > { %2086 = vmatmul.mubr.bf16.gmra.mxu1 %v6561_v59  ;;  %1902 = vmatprep.mubr.bf16.mxu0 %v6563_v60  ;;  %8457 = vst [vmem:[#allocation33_spill] sm:$0xff] %v6605_v55  ;;  %v6619_v12 = vpack.c.bf16 %v559_v57, %v552_v56  ;;  %v583_v56 = vld [vmem:[%s6363_s9 + $0x5c8] sm:$0xff]  ;;  %v590_v57 = vld [vmem:[%s6363_s9 + $0x600] sm:$0xff]  ;;  %v6643_v8 = vpack.c.bf16 %v588_v45, %v581_v40  ;;  %v604_v39 = vld [vmem:[%s6363_s9 + $0x670] sm:$0xff] }
 0x124   : > { %2095 = vmatprep.mubr.bf16.mxu1 %v6565_v61  ;;  %v6645_v9 = vpack.c.bf16 %v590_v57, %v583_v56  ;;  %v6659_v40 = vpack.c.bf16 %v587_v11, %v580_v10  ;;  %v6663_v56 = vpack.c.bf16 %v602_v37, %v595_v36  ;;  %v6665_v57 = vpack.c.bf16 %v604_v39, %v597_v38  ;;  %v609_v10 = vld [vmem:[%s6363_s9 + $0x698] sm:$0xff]  ;;  %v618_v11 = vld [vmem:[%s6363_s9 + $0x6e0] sm:$0xff] }
 0x125   : > { %v617_v61 = vld [vmem:[%s6363_s9 + $0x6d8] sm:$0xff]  ;;  %v570_v59 = vld [vmem:[%s6363_s9 + $0x560] sm:$0xff] }
 0x126   : > { %8461 = vst [vmem:[#allocation37_spill] sm:$0xff] %v6645_v9  ;;  %8462 = vst [vmem:[#allocation38_spill] sm:$0xff] %v6659_v40 }
 0x127   : > { %8464 = vst [vmem:[#allocation40_spill] sm:$0xff] %v6663_v56  ;;  %8465 = vst [vmem:[#allocation41_spill] sm:$0xff] %v6665_v57 }
 0x12a   : > { %1903 = vmatmul.mubr.bf16.gmra.mxu0 %v6579_v14 }
 0x12b   : > { %2096 = vmatmul.mubr.bf16.gmra.mxu1 %v6581_v17  ;;  %1912 = vmatprep.mubr.bf16.mxu0 %v6583_v20  ;;  %v610_v17 = vld [vmem:[%s6363_s9 + $0x6a0] sm:$0xff] }
 0x12c   : > { %2105 = vmatprep.mubr.bf16.mxu1 %v6585_v25  ;;  %v603_v25 = vld [vmem:[%s6363_s9 + $0x668] sm:$0xff] }
 0x132   : > { %1913 = vmatmul.mubr.bf16.gmra.mxu0 %v6599_v46 }
 0x133   : > { %2106 = vmatmul.mubr.bf16.gmra.mxu1 %v6601_v51  ;;  %1922 = vmatprep.mubr.bf16.mxu0 %v6603_v52  ;;  %v596_v51 = vld [vmem:[%s6363_s9 + $0x630] sm:$0xff] }
 0x134   : > { %2115 = vmatprep.mubr.bf16.mxu1 %v6605_v55  ;;  %v601_v55 = vld [vmem:[%s6363_s9 + $0x658] sm:$0xff]  ;;  %v6681_v37 = vpack.c.bf16 %v603_v25, %v596_v51  ;;  %v571_v25 = vld [vmem:[%s6363_s9 + $0x568] sm:$0xff]  ;;  %v578_v51 = vld [vmem:[%s6363_s9 + $0x5a0] sm:$0xff] }
 0x136   : > { %8467 = vst [vmem:[#allocation43_spill] sm:$0xff] %v6681_v37 }
 0x13a   : > { %1923 = vmatmul.mubr.bf16.gmra.mxu0 %v6619_v12 }
 0x13b   : > { %2116 = vmatmul.mubr.bf16.gmra.mxu1 %v6621_v13  ;;  %1932 = vmatprep.mubr.bf16.mxu0 %v6623_v26  ;;  %v589_v13 = vld [vmem:[%s6363_s9 + $0x5f8] sm:$0xff] }
 0x13c   : > { %2125 = vmatprep.mubr.bf16.mxu1 %v6625_v35  ;;  %v582_v35 = vld [vmem:[%s6363_s9 + $0x5c0] sm:$0xff] }
 0x13d   : > { %v6661_v45 = vpack.c.bf16 %v589_v13, %v582_v35  ;;  %v616_v13 = vld [vmem:[%s6363_s9 + $0x6d0] sm:$0xff]  ;;  %v611_v35 = vld [vmem:[%s6363_s9 + $0x6a8] sm:$0xff] }
 0x13e   : > { %v6683_v38 = vpack.c.bf16 %v616_v13, %v609_v10  ;;  %v6685_v39 = vpack.c.bf16 %v618_v11, %v611_v35  ;;  %v6701_v13 = vpack.c.bf16 %v617_v61, %v610_v17  ;;  %v6705_v11 = vpack.c.bf16 %v578_v51, %v571_v25  ;;  %v417_v61 = vld [vmem:[%s6363_s9 + $0x98] sm:$0xff]  ;;  %v424_v17 = vld [vmem:[%s6363_s9 + $0xd0] sm:$0xff] }
 0x13f   : > { %8463 = vst [vmem:[#allocation39_spill] sm:$0xff] %v6661_v45  ;;  %v6721_v51 = vpack.c.bf16 %v577_v30, %v570_v59  ;;  %v606_v30 = vld [vmem:[%s6363_s9 + $0x680] sm:$0xff] }
 0x140   : > { %8468 = vst [vmem:[#allocation44_spill] sm:$0xff] %v6683_v38  ;;  %8469 = vst [vmem:[#allocation45_spill] sm:$0xff] %v6685_v39  ;;  %v5795_v59 = vld [vmem:[#allocation5 + $0x140] ss:$12 sps:$4 sm:$0xff]  }
 0x141   : > { %8471 = vst [vmem:[#allocation47_spill] sm:$0xff] %v6701_v13  ;;  %8473 = vst [vmem:[#allocation49_spill] sm:$0xff] %v6705_v11 }
 0x142   : > { %1933 = vmatmul.mubr.bf16.gmra.mxu0 %v6639_v62  ;;  %8475 = vst [vmem:[#allocation51_spill] sm:$0xff] %v6721_v51 }
 0x143   : > { %2126 = vmatmul.mubr.bf16.gmra.mxu1 %v6641_v7  ;;  %1942 = vmatprep.mubr.bf16.mxu0 %v6643_v8  ;;  %v594_v7 = vld [vmem:[%s6363_s9 + $0x620] sm:$0xff] }
 0x144   : > { %2135 = vmatprep.mubr.bf16.mxu1 %v6645_v9  ;;  %v6679_v36 = vpack.c.bf16 %v601_v55, %v594_v7  ;;  %v615_v9 = vld [vmem:[%s6363_s9 + $0x6c8] sm:$0xff]  ;;  %v410_v7 = vld [vmem:[%s6363_s9 + $0x60] sm:$0xff] }
 0x145   : > { %v403_v55 = vld [vmem:[%s6363_s9 + $0x28] sm:$0xff] }
 0x146   : > { %8466 = vst [vmem:[#allocation42_spill] sm:$0xff] %v6679_v36  ;;  %v6703_v35 = vpack.c.bf16 %v410_v7, %v403_v55  ;;  %v5789_v55 = vld [vmem:[#allocation5 + $0xb0] ss:$12 sps:$4 sm:$0xff]   ;;  %v5790_v7 = vld [vmem:[#allocation5 + $0x480] ss:$12 sps:$4 sm:$0xff]  }
 0x148   : > { %8472 = vst [vmem:[#allocation48_spill] sm:$0xff] %v6703_v35 }
 0x14a   : > { %1943 = vmatmul.mubr.bf16.gmra.mxu0 %v6659_v40 }
 0x14b   : > { %2136 = vmatmul.mubr.bf16.gmra.mxu1 %v6661_v45  ;;  %1952 = vmatprep.mubr.bf16.mxu0 %v6663_v56  ;;  %v608_v45 = vld [vmem:[%s6363_s9 + $0x690] sm:$0xff] }
 0x14c   : > { %2145 = vmatprep.mubr.bf16.mxu1 %v6665_v57  ;;  %v6699_v10 = vpack.c.bf16 %v615_v9, %v608_v45  ;;  %v409_v57 = vld [vmem:[%s6363_s9 + $0x58] sm:$0xff]  ;;  %v592_v45 = vld [vmem:[%s6363_s9 + $0x610] sm:$0xff] }
 0x14d   : > { %v585_v9 = vld [vmem:[%s6363_s9 + $0x5d8] sm:$0xff] }
 0x14e   : > { %8470 = vst [vmem:[#allocation46_spill] sm:$0xff] %v6699_v10 }
 0x152   : > { %1953 = vmatmul.mubr.bf16.gmra.mxu0 %v6679_v36  ;;  %v599_v36 = vld [vmem:[%s6363_s9 + $0x648] sm:$0xff] }
 0x153   : > { %2146 = vmatmul.mubr.bf16.gmra.mxu1 %v6681_v37  ;;  %1962 = vmatprep.mubr.bf16.mxu0 %v6683_v38  ;;  %v402_v37 = vld [vmem:[%s6363_s9 + $0x20] sm:$0xff]  ;;  %v591_v38 = vld [vmem:[%s6363_s9 + $0x608] sm:$0xff] }
 0x154   : > { %2155 = vmatprep.mubr.bf16.mxu1 %v6685_v39  ;;  %v6719_v25 = vpack.c.bf16 %v409_v57, %v402_v37  ;;  %v5797_v39 = vld [vmem:[#allocation5 + $0x2f0] ss:$12 sps:$4 sm:$0xff]   ;;  %v431_v57 = vld [vmem:[%s6363_s9 + $0x108] sm:$0xff]  ;;  %v438_v37 = vld [vmem:[%s6363_s9 + $0x140] sm:$0xff] }
 0x156   : > { %8474 = vst [vmem:[#allocation50_spill] sm:$0xff] %v6719_v25 }
 0x15a   : > { %1963 = vmatmul.mubr.bf16.gmra.mxu0 %v6699_v10  ;;  %v423_v10 = vld [vmem:[%s6363_s9 + $0xc8] sm:$0xff] }
 0x15b   : > { %2156 = vmatmul.mubr.bf16.gmra.mxu1 %v6701_v13  ;;  %2198 = vmatprep.mubr.bf16.mxu0 %v6703_v35  ;;  %v5793_v13 = vld [vmem:[#allocation5 + $0x158] ss:$12 sps:$4 sm:$0xff]   ;;  %v6723_v35 = vpack.c.bf16 %v424_v17, %v417_v61  ;;  %v6739_v61 = vpack.c.bf16 %v423_v10, %v416_v28  ;;  %v6741_v17 = vpack.c.bf16 %v591_v38, %v584_v6  ;;  %v452_v28 = vld [vmem:[%s6363_s9 + $0x1b0] sm:$0xff] }
 0x15c   : > { %2318 = vmatprep.mubr.bf16.mxu1 %v6705_v11  ;;  %v6725_v11 = vpack.c.bf16 %v592_v45, %v585_v9  ;;  %v6743_v9 = vpack.c.bf16 %v438_v37, %v431_v57  ;;  %v6745_v45 = vpack.c.bf16 %v606_v30, %v599_v36  ;;  %v445_v6 = vld [vmem:[%s6363_s9 + $0x178] sm:$0xff]  ;;  %v620_v36 = vld [vmem:[%s6363_s9 + $0x6f0] sm:$0xff] }
 0x15d   : > { %8476 = vst [vmem:[#allocation52_spill] sm:$0xff] %v6723_v35  ;;  %8478 = vst [vmem:[#allocation54_spill] sm:$0xff] %v6739_v61  ;;  %v5800_v38 = vld [vmem:[#allocation5 + $0x68] ss:$12 sps:$4 sm:$0xff]   ;;  %v6763_v37 = vpack.c.bf16 %v452_v28, %v445_v6  ;;  %v466_v6 = vld [vmem:[%s6363_s9 + $0x220] sm:$0xff] }
 0x15e   : > { %8477 = vst [vmem:[#allocation53_spill] sm:$0xff] %v6725_v11  ;;  %8479 = vst [vmem:[#allocation55_spill] sm:$0xff] %v6741_v17  ;;  %v5806_v28 = vld [vmem:[#allocation5 + $0x38] ss:$12 sps:$4 sm:$0xff]  }
 0x15f   : > { %8480 = vst [vmem:[#allocation56_spill] sm:$0xff] %v6743_v9  ;;  %8481 = vst [vmem:[#allocation57_spill] sm:$0xff] %v6745_v45 }
 0x160   : > { %8484 = vst [vmem:[#allocation60_spill] sm:$0xff] %v6763_v37 }
 0x162   : > { %2199 = vmatmul.mubr.bf16.vlgmr.msra.gmra.mxu0 %v6719_v25 }
 0x163   : > { %2319 = vmatmul.mubr.bf16.vlgmr.msra.gmra.mxu1 %v6721_v51  ;;  %4858 = vmatpush3.bf16.msra.mxu0 %v5789_v55  ;;  %v5796_v55 = vld [vmem:[#allocation5 + $0x80] ss:$12 sps:$4 sm:$0xff]   ;;  %v437_v51 = vld [vmem:[%s6363_s9 + $0x138] sm:$0xff] }
 0x164   : > { %2374 = vmatpush1.bf16.msra.mxu1 %v5790_v7  ;;  %2208 = vmatprep.mubr.bf16.mxu0 %v6723_v35  ;;  %v430_v7 = vld [vmem:[%s6363_s9 + $0x100] sm:$0xff]  ;;  %v5798_v35 = vld [vmem:[#allocation5 + $0x128] ss:$12 sps:$4 sm:$0xff]  }
 0x165   : > { %2328 = vmatprep.mubr.bf16.mxu1 %v6725_v11  ;;  %4859 = vmatprep.subr.bf16.mxu0 %v5793_v13  ;;  %v598_v11 = vld [vmem:[%s6363_s9 + $0x640] sm:$0xff]  ;;  %v605_v13 = vld [vmem:[%s6363_s9 + $0x678] sm:$0xff]  ;;  %v6759_v10 = vpack.c.bf16 %v437_v51, %v430_v7  ;;  %v612_v51 = vld [vmem:[%s6363_s9 + $0x6b0] sm:$0xff] }
 0x166   : > { %4969 = vmatprep.subr.bf16.mxu1 %v5797_v39  ;;  %v5801_v39 = vld [vmem:[#allocation5 + $0x110] ss:$12 sps:$4 sm:$0xff]   ;;  %v6761_v57 = vpack.c.bf16 %v605_v13, %v598_v11  ;;  %v451_v11 = vld [vmem:[%s6363_s9 + $0x1a8] sm:$0xff] }
 0x167   : > { %4860 = vmatpush3.bf16.msra.mxu0 %v5794_v0  ;;  %v613_v0 = vld [vmem:[%s6363_s9 + $0x6b8] sm:$0xff]  ;;  %8482 = vst [vmem:[#allocation58_spill] sm:$0xff] %v6759_v10  ;;  %v619_v7 = vld [vmem:[%s6363_s9 + $0x6e8] sm:$0xff] }
 0x168   : > { %4861 = vmatprep.subr.bf16.mxu0 %v5795_v59  ;;  %8483 = vst [vmem:[#allocation59_spill] sm:$0xff] %v6761_v57  ;;  %v6765_v30 = vpack.c.bf16 %v620_v36, %v613_v0  ;;  %v5802_v59 = vld [vmem:[#allocation5 + $0x50] ss:$12 sps:$4 sm:$0xff]   ;;  %v459_v13 = vld [vmem:[%s6363_s9 + $0x1e8] sm:$0xff] }
 0x169   : > { %v5809_v0 = vld [vmem:[#allocation5 + $0xe0] ss:$12 sps:$4 sm:$0xff]  }
 0x16a   : > { %2209 = vmatmul.mubr.bf16.gmra.mxu0 %v6739_v61  ;;  %8485 = vst [vmem:[#allocation61_spill] sm:$0xff] %v6765_v30 }
 0x16b   : > { %2329 = vmatmul.mubr.bf16.gmra.mxu1 %v6741_v17  ;;  %2218 = vmatprep.mubr.bf16.mxu0 %v6743_v9  ;;  %v5803_v17 = vld [vmem:[#allocation5 + $0x2d8] ss:$12 sps:$4 sm:$0xff]  }
 0x16c   : > { %2338 = vmatprep.mubr.bf16.mxu1 %v6745_v45  ;;  %4862 = vmatpush3.bf16.msra.mxu0 %v5796_v55  ;;  %v5805_v55 = vld [vmem:[#allocation5 + $0xf8] ss:$12 sps:$4 sm:$0xff]  }
 0x16d   : > { %4863 = vmatprep.subr.bf16.mxu0 %v5798_v35  ;;  %v444_v35 = vld [vmem:[%s6363_s9 + $0x170] sm:$0xff] }
 0x16e   : > { %v6777_v36 = vpack.c.bf16 %v451_v11, %v444_v35  ;;  %v465_v35 = vld [vmem:[%s6363_s9 + $0x218] sm:$0xff]  ;;  %v404_v11 = vld [vmem:[%s6363_s9 + $0x30] sm:$0xff] }
 0x170   : > { %4864 = vmatpush3.bf16.msra.mxu0 %v5800_v38  ;;  %8486 = vst [vmem:[#allocation62_spill] sm:$0xff] %v6777_v36  ;;  %v6779_v38 = vpack.c.bf16 %v619_v7, %v612_v51  ;;  %v411_v51 = vld [vmem:[%s6363_s9 + $0x68] sm:$0xff]  ;;  %v473_v7 = vld [vmem:[%s6363_s9 + $0x258] sm:$0xff] }
 0x171   : > { %4865 = vmatprep.subr.bf16.mxu0 %v5801_v39  ;;  %v6781_v39 = vpack.c.bf16 %v466_v6, %v459_v13  ;;  %v480_v13 = vld [vmem:[%s6363_s9 + $0x290] sm:$0xff] }
 0x172   : > { %2219 = vmatmul.mubr.bf16.gmra.mxu0 %v6759_v10  ;;  %8487 = vst [vmem:[#allocation63_spill] sm:$0xff] %v6779_v38  ;;  %v5814_v6 = vld [vmem:[#allocation5 + $0x8] ss:$12 sps:$4 sm:$0xff]   ;;  %v6797_v45 = vpack.c.bf16 %v480_v13, %v473_v7  ;;  %v494_v13 = vld [vmem:[%s6363_s9 + $0x300] sm:$0xff] }
 0x173   : > { %2339 = vmatmul.mubr.bf16.gmra.mxu1 %v6761_v57  ;;  %2228 = vmatprep.mubr.bf16.mxu0 %v6763_v37  ;;  %8488 = vst [vmem:[#allocation64_spill] sm:$0xff] %v6781_v39  ;;  %v5812_v57 = vld [vmem:[#allocation5 + $0xc8] ss:$12 sps:$4 sm:$0xff]  }
 0x174   : > { %2348 = vmatprep.mubr.bf16.mxu1 %v6765_v30  ;;  %4866 = vmatpush3.bf16.msra.mxu0 %v5802_v59  ;;  %v5810_v30 = vld [vmem:[#allocation5 + $0x20] ss:$12 sps:$4 sm:$0xff]   ;;  %8491 = vst [vmem:[#allocation67_spill] sm:$0xff] %v6797_v45 }
 0x175   : > { %4867 = vmatprep.subr.bf16.mxu0 %v5805_v55  ;;  %v458_v59 = vld [vmem:[%s6363_s9 + $0x1e0] sm:$0xff]  ;;  %v8382_v55 = vmov 0   ;;  %v487_v7 = vld [vmem:[%s6363_s9 + $0x2c8] sm:$0xff] }
 0x178   : > { %4868 = vmatpush3.bf16.msra.mxu0 %v5806_v28  ;;  %v5815_v28 = vld [vmem:[#allocation5 + $0x470] ss:$12 sps:$4 sm:$0xff]  }
 0x179   : > { %4869 = vmatprep.subr.bf16.mxu0 %v5809_v0  ;;  %v6793_v0 = vpack.c.bf16 %v465_v35, %v458_v59  ;;  %v418_v59 = vld [vmem:[%s6363_s9 + $0xa0] sm:$0xff]  ;;  %v425_v35 = vld [vmem:[%s6363_s9 + $0xd8] sm:$0xff] }
 0x17a   : > { %2229 = vmatmul.mubr.bf16.gmra.mxu0 %v6777_v36  ;;  %v5826_v36 = vld [vmem:[#allocation5 + $0x1a0] ss:$12 sps:$4 sm:$0xff]  }
 0x17b   : > { %2349 = vmatmul.mubr.bf16.gmra.mxu1 %v6779_v38  ;;  %2238 = vmatprep.mubr.bf16.mxu0 %v6781_v39  ;;  %8489 = vst [vmem:[#allocation65_spill] sm:$0xff] %v6793_v0  ;;  %v6795_v38 = vpack.c.bf16 %v411_v51, %v404_v11  ;;  %v5804_v11 = vld [vmem:[#allocation5 + $0x218] ss:$12 sps:$4 sm:$0xff]   ;;  %v8492_v51 = vmov 0  }
 0x17c   : > { %2391 = vmatprep.mubr.bf16.mxu1 %v8382_v55  ;;  %4870 = vmatpush3.bf16.msra.mxu0 %v5810_v30  ;;  %v5799_v55 = vld [vmem:[#allocation5 + $0x230] ss:$12 sps:$4 sm:$0xff]   ;;  %v479_v30 = vld [vmem:[%s6363_s9 + $0x288] sm:$0xff]  ;;  %v5821_v39 = vld [vmem:[#allocation5 + $0x278] ss:$12 sps:$4 sm:$0xff]  }
 0x17d   : > { %4871 = vmatprep.subr.bf16.mxu0 %v5812_v57  ;;  %8490 = vst [vmem:[#allocation66_spill] sm:$0xff] %v6795_v38  ;;  %v472_v57 = vld [vmem:[%s6363_s9 + $0x250] sm:$0xff] }
 0x180   : > { %4872 = vmatpush3.bf16.msra.mxu0 %v5814_v6  ;;  %v5807_v6 = vld [vmem:[#allocation5 + $0x2c0] ss:$12 sps:$4 sm:$0xff]  }
 0x181   : > { %5081 = vmatprep.subr.bf16.mxu0 %v5815_v28  ;;  %v6810_v28 = vpack.c.bf16 %v479_v30, %v472_v57  ;;  %v493_v57 = vld [vmem:[%s6363_s9 + $0x2f8] sm:$0xff]  ;;  %v432_v30 = vld [vmem:[%s6363_s9 + $0x110] sm:$0xff] }
 0x182   : > { %2239 = vmatmul.mubr.bf16.gmra.mxu0 %v6793_v0  ;;  %v5811_v0 = vld [vmem:[#allocation5 + $0x2a8] ss:$12 sps:$4 sm:$0xff]  }
 0x183   : > { %4622 = vmatmul.mubr.msk.bf16.vlgmr.msra.gmra.mxu1 %vm1731_vm0, %v6795_v38  ;;  %2248 = vmatprep.mubr.bf16.mxu0 %v6797_v45  ;;  %8493 = vst [vmem:[#allocation68_spill] sm:$0xff] %v6810_v28  ;;  %v6814_v38 = vpack.c.bf16 %v494_v13, %v487_v7  ;;  %v5808_v45 = vld [vmem:[#allocation5 + $0x200] ss:$12 sps:$4 sm:$0xff]   ;;  %v508_v7 = vld [vmem:[%s6363_s9 + $0x370] sm:$0xff] }
 0x184   : > { %4970 = vmatpush3.bf16.msra.mxu1 %v5799_v55  ;;  %2401 = vmatprep.mubr.bf16.mxu1 %v8492_v51  ;;  %v6812_v55 = vpack.c.bf16 %v425_v35, %v418_v59  ;;  %v439_v59 = vld [vmem:[%s6363_s9 + $0x148] sm:$0xff]  ;;  %v501_v35 = vld [vmem:[%s6363_s9 + $0x338] sm:$0xff] }
 0x185   : > { %4971 = vmatprep.subr.bf16.mxu1 %v5803_v17  ;;  %8495 = vst [vmem:[#allocation70_spill] sm:$0xff] %v6814_v38  ;;  %v486_v17 = vld [vmem:[%s6363_s9 + $0x2c0] sm:$0xff]  ;;  %v5817_v13 = vld [vmem:[#allocation5 + $0x290] ss:$12 sps:$4 sm:$0xff]  }
 0x186   : > { %8494 = vst [vmem:[#allocation69_spill] sm:$0xff] %v6812_v55 }
 0x188   : > { %4972 = vmatpush3.bf16.msra.mxu1 %v5804_v11  ;;  %v5813_v11 = vld [vmem:[#allocation5 + $0x1e8] ss:$12 sps:$4 sm:$0xff]  }
 0x189   : > { %4973 = vmatprep.subr.bf16.mxu1 %v5807_v6  ;;  %v6827_v6 = vpack.c.bf16 %v493_v57, %v486_v17  ;;  %v446_v17 = vld [vmem:[%s6363_s9 + $0x180] sm:$0xff]  ;;  %v453_v57 = vld [vmem:[%s6363_s9 + $0x1b8] sm:$0xff] }
 0x18a   : > { %2249 = vmatmul.mubr.bf16.gmra.mxu0 %v6810_v28  ;;  %v5818_v28 = vld [vmem:[#allocation5 + $0x1d0] ss:$12 sps:$4 sm:$0xff]  }
 0x18b   : > { %4623 = vmatmul.mubr.msk.bf16.gmra.mxu1 %vm1731_vm0, %v6812_v55  ;;  %2258 = vmatprep.mubr.bf16.mxu0 %v6814_v38  ;;  %8496 = vst [vmem:[#allocation71_spill] sm:$0xff] %v6827_v6  ;;  %v6829_v55 = vpack.c.bf16 %v439_v59, %v432_v30  ;;  %v6831_v38 = vpack.c.bf16 %v508_v7, %v501_v35  ;;  %v932_v30 = vlaneseq  ;;  %v515_v59 = vld [vmem:[%s6363_s9 + $0x3a8] sm:$0xff]  ;;  %v522_v35 = vld [vmem:[%s6363_s9 + $0x3e0] sm:$0xff] }
 0x18c   : > { %2411 = vmatprep.mubr.bf16.mxu1 %v8492_v51  ;;  %4974 = vmatpush3.bf16.msra.mxu1 %v5808_v45  ;;  %v500_v45 = vld [vmem:[%s6363_s9 + $0x330] sm:$0xff]  ;;  %v5822_v7 = vld [vmem:[#allocation5 + $0x1b8] ss:$12 sps:$4 sm:$0xff]  }
 0x18d   : > { %4975 = vmatprep.subr.bf16.mxu1 %v5811_v0  ;;  %8497 = vst [vmem:[#allocation72_spill] sm:$0xff] %v6829_v55  ;;  %8498 = vst [vmem:[#allocation73_spill] sm:$0xff] %v6831_v38  ;;  %v507_v0 = vld [vmem:[%s6363_s9 + $0x368] sm:$0xff] }
 0x190   : > { %4976 = vmatpush3.bf16.msra.mxu1 %v5813_v11  ;;  %v5825_v11 = vld [vmem:[#allocation5 + $0x260] ss:$12 sps:$4 sm:$0xff]  }
 0x191   : > { %4977 = vmatprep.subr.bf16.mxu1 %v5817_v13  ;;  %v6844_v13 = vpack.c.bf16 %v507_v0, %v500_v45  ;;  %v514_v45 = vld [vmem:[%s6363_s9 + $0x3a0] sm:$0xff] }
 0x192   : > { %2259 = vmatmul.mubr.bf16.gmra.mxu0 %v6827_v6  ;;  %v6850_v6 = vshrl.u32 %v932_v30, 7  ;;  %v467_v30 = vld [vmem:[%s6363_s9 + $0x228] sm:$0xff] }
 0x193   : > { %4624 = vmatmul.mubr.msk.bf16.gmra.mxu1 %vm1731_vm0, %v6829_v55  ;;  %2268 = vmatprep.mubr.bf16.mxu0 %v6831_v38  ;;  %8499 = vst [vmem:[#allocation74_spill] sm:$0xff] %v6844_v13  ;;  %v6846_v55 = vpack.c.bf16 %v453_v57, %v446_v17  ;;  %v6848_v38 = vpack.c.bf16 %v522_v35, %v515_v59  ;;  %v521_v17 = vld [vmem:[%s6363_s9 + $0x3d8] sm:$0xff]  ;;  %v460_v57 = vld [vmem:[%s6363_s9 + $0x1f0] sm:$0xff] }
 0x194   : > { %2421 = vmatprep.mubr.bf16.mxu1 %v8492_v51  ;;  %4978 = vmatpush3.bf16.msra.mxu1 %v5818_v28  ;;  %8502 = vst [vmem:[#allocation77_spill] sm:$0xff] %v6850_v6  ;;  %v5829_v28 = vld [vmem:[#allocation5 + $0x248] ss:$12 sps:$4 sm:$0xff]   ;;  %v934_v0 = vsub.s32 0, %v6850_v6  ;;  %v529_v59 = vld [vmem:[%s6363_s9 + $0x418] sm:$0xff] }
 0x195   : > { %4979 = vmatprep.subr.bf16.mxu1 %v5821_v39  ;;  %8500 = vst [vmem:[#allocation75_spill] sm:$0xff] %v6846_v55  ;;  %8501 = vst [vmem:[#allocation76_spill] sm:$0xff] %v6848_v38  ;;  %v930_v39 = vld [vmem:[#allocation7] sm:$0x7]  ;;  %v536_v35 = vld [vmem:[%s6363_s9 + $0x450] sm:$0xff] }
 0x196   : > { %v6871_v37 = vrot.slane %v930_v39, %v934_v0  ;;  %v6873_v10 = vpack.c.bf16 %v536_v35, %v529_v59  ;;  %v543_v35 = vld [vmem:[%s6363_s9 + $0x488] sm:$0xff] }
 0x198   : > { %4980 = vmatpush3.bf16.msra.mxu1 %v5822_v7  ;;  %v5830_v7 = vld [vmem:[#allocation5 + $0x188] ss:$12 sps:$4 sm:$0xff]   ;;  %8505 = vst [vmem:[#allocation80_spill] sm:$0xff] %v6873_v10 }
 0x199   : > { %4981 = vmatprep.subr.bf16.mxu1 %v5825_v11  ;;  %v938_v11 = vsub.s32 1, %v6850_v6 }
 0x19a   : > { %2269 = vmatmul.mubr.bf16.gmra.mxu0 %v6844_v13  ;;  %v6867_v13 = vpack.c.bf16 %v521_v17, %v514_v45  ;;  %v528_v45 = vld [vmem:[%s6363_s9 + $0x410] sm:$0xff]  ;;  %v535_v17 = vld [vmem:[%s6363_s9 + $0x448] sm:$0xff] }
 0x19b   : > { %4625 = vmatmul.mubr.msk.bf16.gmra.mxu1 %vm1731_vm0, %v6846_v55  ;;  %2278 = vmatprep.mubr.bf16.mxu0 %v6848_v38  ;;  %v6865_v55 = vld [vmem:[#allocation5 + $0x488] ss:$12 sps:$4 sm:$0xff]   ;;  %v6869_v38 = vpack.c.bf16 %v467_v30, %v460_v57  ;;  %v481_v57 = vld [vmem:[%s6363_s9 + $0x298] sm:$0xff]  ;;  %v6893_v61 = vpack.c.bf16 %v535_v17, %v528_v45 }
 0x19c   : > { %2431 = vmatprep.mubr.bf16.mxu1 %v8492_v51  ;;  %4982 = vmatpush3.bf16.msra.mxu1 %v5826_v36  ;;  %8503 = vst [vmem:[#allocation78_spill] sm:$0xff] %v6867_v13  ;;  %v6875_v36 = vrot.slane %v930_v39, %v938_v11  ;;  %v474_v39 = vld [vmem:[%s6363_s9 + $0x260] sm:$0xff] }
 0x19d   : > { %4983 = vmatprep.subr.bf16.mxu1 %v5829_v28  ;;  %8504 = vst [vmem:[#allocation79_spill] sm:$0xff] %v6869_v38  ;;  %8506 = vst [vmem:[#allocation81_spill] sm:$0xff] %v6893_v61 }
 0x1a0   : > { %4984 = vmatpush3.bf16.msra.mxu1 %v5830_v7  ;;  %v550_v7 = vld [vmem:[%s6363_s9 + $0x4c0] sm:$0xff] }
 0x1a1   : > { %5370 = vmatprep.subr.bf16.mxu1 %v6865_v55  ;;  %v6900_v44 = vpack.c.bf16 %v550_v7, %v543_v35  ;;  %v557_v7 = vld [vmem:[%s6363_s9 + $0x4f8] sm:$0xff] }
 0x1a2   : > { %v1814_v28 = vpop.f32.mrf.mxu0  ;;  %2279 = vmatmul.mubr.bf16.gmra.mxu0 %v6867_v13 }
 0x1a3   : > { %v2007_v6 = vpop.f32.mrf.mxu1  ;;  %4626 = vmatmul.mubr.msk.bf16.gmra.mxu1 %vm1731_vm0, %v6869_v38  ;;  %v1815_v0 = vadd.f32 %v1814_v28, %v6871_v37  ;;  %2288 = vmatprep.mubr.bf16.mxu0 %v6873_v10  ;;  %v6895_v28 = vpack.c.bf16 %v481_v57, %v474_v39  ;;  %8508 = vst [vmem:[#allocation83_spill] sm:$0xff] %v6900_v44  ;;  %v495_v57 = vld [vmem:[%s6363_s9 + $0x308] sm:$0xff] }
 0x1a4   : > { %2441 = vmatprep.mubr.bf16.mxu1 %v8492_v51  ;;  %v1816_v30 = vpop.f32.mrf.mxu0 }
 0x1a5   : > { %v2009_v59 = vpop.f32.mrf.mxu1  ;;  %v6890_v11 = vadd.f32 %v2007_v6, %v1815_v0  ;;  %v1817_v13 = vadd.f32 %v1816_v30, %v6875_v36  ;;  %8507 = vst [vmem:[#allocation82_spill] sm:$0xff] %v6895_v28 }
 0x1a6   : > { %v1818_v38 = vpop.f32.mrf.mxu0 }
 0x1a7   : > { %v2011_v9 = vpop.f32.mrf.mxu1  ;;  %v6897_v10 = vadd.f32 %v2009_v59, %v1817_v13  ;;  %v1819_v25 = vadd.f32 %v1818_v38, %v6871_v37  ;;  %v542_v38 = vld [vmem:[%s6363_s9 + $0x480] sm:$0xff] }
 0x1a8   : > { %v1820_v6 = vpop.f32.mrf.mxu0 }
 0x1a9   : > { %v2013_v0 = vpop.f32.mrf.mxu1  ;;  %v6902_v56 = vadd.f32 %v2011_v9, %v1819_v25  ;;  %v1821_v30 = vadd.f32 %v1820_v6, %v6875_v36  ;;  %v549_v25 = vld [vmem:[%s6363_s9 + $0x4b8] sm:$0xff]  ;;  %v488_v9 = vld [vmem:[%s6363_s9 + $0x2d0] sm:$0xff] }
 0x1aa   : > { %v1824_v45 = vpop.f32.mrf.mxu0  ;;  %2289 = vmatmul.mubr.bf16.gmra.mxu0 %v6893_v61  ;;  %v564_v6 = vld [vmem:[%s6363_s9 + $0x530] sm:$0xff]  ;;  %v6922_v42 = vpack.c.bf16 %v549_v25, %v542_v38 }
 0x1ab   : > { %8509 = vst [vmem:[#allocation84_spill] sm:$0xff] %v6902_v56  ;;  %v2017_v17 = vpop.f32.mrf.mxu1  ;;  %4627 = vmatmul.mubr.msk.bf16.gmra.mxu1 %vm1731_vm0, %v6895_v28  ;;  %v6909_v13 = vadd.f32 %v2013_v0, %v1821_v30  ;;  %v1825_v39 = vadd.f32 %v1824_v45, %v6871_v37  ;;  %2298 = vmatprep.mubr.bf16.mxu0 %v6900_v44 }
 0x1ac   : > { %2451 = vmatprep.mubr.bf16.mxu1 %v8492_v51  ;;  %v1826_v59 = vpop.f32.mrf.mxu0  ;;  %8512 = vst [vmem:[#allocation87_spill] sm:$0xff] %v6922_v42  ;;  %v6924_v45 = vpack.c.bf16 %v495_v57, %v488_v9  ;;  %v502_v57 = vld [vmem:[%s6363_s9 + $0x340] sm:$0xff] }
 0x1ad   : > { %8510 = vst [vmem:[#allocation85_spill] sm:$0xff] %v6909_v13  ;;  %v2019_v35 = vpop.f32.mrf.mxu1  ;;  %v6919_v61 = vadd.f32 %v2017_v17, %v1825_v39  ;;  %v1827_v28 = vadd.f32 %v1826_v59, %v6875_v36  ;;  %v6929_v13 = vpack.c.bf16 %v564_v6, %v557_v7 }
 0x1ae   : > { %v1828_v0 = vpop.f32.mrf.mxu0  ;;  %8513 = vst [vmem:[#allocation88_spill] sm:$0xff] %v6924_v45 }
 0x1af   : > { %8511 = vst [vmem:[#allocation86_spill] sm:$0xff] %v6919_v61  ;;  %v2021_v30 = vpop.f32.mrf.mxu1  ;;  %v6926_v44 = vadd.f32 %v2019_v35, %v1827_v28  ;;  %v1829_v40 = vadd.f32 %v1828_v0, %v6871_v37  ;;  %8514 = vst [vmem:[#allocation89_spill] sm:$0xff] %v6929_v13  ;;  %v556_v28 = vld [vmem:[%s6363_s9 + $0x4f0] sm:$0xff]  ;;  %v509_v35 = vld [vmem:[%s6363_s9 + $0x378] sm:$0xff] }
 0x1b0   : > { %v1830_v17 = vpop.f32.mrf.mxu0 }
 0x1b1   : > { %v2023_v39 = vpop.f32.mrf.mxu1  ;;  %v6931_v61 = vadd.f32 %v2021_v30, %v1829_v40  ;;  %v1831_v59 = vadd.f32 %v1830_v17, %v6875_v36  ;;  %v563_v40 = vld [vmem:[%s6363_s9 + $0x528] sm:$0xff] }
 0x1b2   : > { %v1834_v56 = vpop.f32.mrf.mxu0  ;;  %2299 = vmatmul.mubr.bf16.gmra.mxu0 %v6922_v42  ;;  %v6949_v42 = vpack.c.bf16 %v563_v40, %v556_v28 }
 0x1b3   : > { %8515 = vst [vmem:[#allocation90_spill] sm:$0xff] %v6931_v61  ;;  %v2027_v38 = vpop.f32.mrf.mxu1  ;;  %4628 = vmatmul.mubr.msk.bf16.gmra.mxu1 %vm1731_vm0, %v6924_v45  ;;  %v6938_v25 = vadd.f32 %v2023_v39, %v1831_v59  ;;  %v1835_v9 = vadd.f32 %v1834_v56, %v6871_v37  ;;  %2308 = vmatprep.mubr.bf16.mxu0 %v6929_v13 }
 0x1b4   : > { %2461 = vmatprep.mubr.bf16.mxu1 %v8492_v51  ;;  %v1836_v7 = vpop.f32.mrf.mxu0  ;;  %8517 = vst [vmem:[#allocation92_spill] sm:$0xff] %v6949_v42  ;;  %v6951_v39 = vpack.c.bf16 %v509_v35, %v502_v57  ;;  %v516_v57 = vld [vmem:[%s6363_s9 + $0x3b0] sm:$0xff] }
 0x1b5   : > { %8516 = vst [vmem:[#allocation91_spill] sm:$0xff] %v6938_v25  ;;  %v2029_v6 = vpop.f32.mrf.mxu1  ;;  %v6946_v0 = vadd.f32 %v2027_v38, %v1835_v9  ;;  %v1837_v30 = vadd.f32 %v1836_v7, %v6875_v36 }
 0x1b6   : > { %v1838_v17 = vpop.f32.mrf.mxu0  ;;  %8518 = vst [vmem:[#allocation93_spill] sm:$0xff] %v6951_v39 }
 0x1b7   : > { %v2031_v45 = vpop.f32.mrf.mxu1  ;;  %v6953_v56 = vadd.f32 %v2029_v6, %v1837_v30  ;;  %v1839_v59 = vadd.f32 %v1838_v17, %v6871_v37 }
 0x1b8   : > { %v1840_v13 = vpop.f32.mrf.mxu0 }
 0x1b9   : > { %v2033_v25 = vpop.f32.mrf.mxu1  ;;  %v6956_v61 = vadd.f32 %v2031_v45, %v1839_v59  ;;  %v1841_v38 = vadd.f32 %v1840_v13, %v6875_v36  ;;  %v523_v45 = vld [vmem:[%s6363_s9 + $0x3e8] sm:$0xff] }
 0x1ba   : > { %v1844_v9 = vpop.f32.mrf.mxu0  ;;  %2309 = vmatmul.mubr.bf16.gmra.mxu0 %v6949_v42  ;;  %v6972_v42 = vpack.c.bf16 %v523_v45, %v516_v57 }
 0x1bb   : > { %8519 = vst [vmem:[#allocation94_spill] sm:$0xff] %v6956_v61  ;;  %v2037_v7 = vpop.f32.mrf.mxu1  ;;  %4629 = vmatmul.mubr.msk.bf16.gmra.mxu1 %vm1731_vm0, %v6951_v39  ;;  %v6962_v28 = vadd.f32 %v2033_v25, %v1841_v38  ;;  %v1845_v40 = vadd.f32 %v1844_v9, %v6871_v37  ;;  %2584 = vmatprep.mubr.bf16.mxu0 %v6385_v53  ;;  %v5816_v9 = vld [vmem:[#allocation5 + $0x3b0] ss:$12 sps:$4 sm:$0xff]  }
 0x1bc   : > { %2471 = vmatprep.mubr.bf16.mxu1 %v8492_v51  ;;  %v1846_v35 = vpop.f32.mrf.mxu0  ;;  %8521 = vst [vmem:[#allocation96_spill] sm:$0xff] %v6972_v42 }
 0x1bd   : > { %8520 = vst [vmem:[#allocation95_spill] sm:$0xff] %v6962_v28  ;;  %v2039_v6 = vpop.f32.mrf.mxu1  ;;  %v6969_v13 = vadd.f32 %v2037_v7, %v1845_v40  ;;  %v1847_v30 = vadd.f32 %v1846_v35, %v6875_v36  ;;  %v5819_v28 = vld [vmem:[#allocation5 + $0x458] ss:$12 sps:$4 sm:$0xff]  }
 0x1be   : > { %v1848_v17 = vpop.f32.mrf.mxu0 }
 0x1bf   : > { %v2041_v59 = vpop.f32.mrf.mxu1  ;;  %v6974_v25 = vadd.f32 %v2039_v6, %v1847_v30  ;;  %v1849_v38 = vadd.f32 %v1848_v17, %v6871_v37  ;;  %v530_v6 = vld [vmem:[%s6363_s9 + $0x420] sm:$0xff]  ;;  %v537_v30 = vld [vmem:[%s6363_s9 + $0x458] sm:$0xff] }
 0x1c0   : > { %v1850_v53 = vpop.f32.mrf.mxu0  ;;  %v5820_v17 = vld [vmem:[#allocation5 + $0x398] ss:$12 sps:$4 sm:$0xff]  }
 0x1c1   : > { %8522 = vst [vmem:[#allocation97_spill] sm:$0xff] %v6974_v25  ;;  %v2043_v39 = vpop.f32.mrf.mxu1  ;;  %v6977_v61 = vadd.f32 %v2041_v59, %v1849_v38  ;;  %v1851_v7 = vadd.f32 %v1850_v53, %v6875_v36  ;;  %v5823_v53 = vld [vmem:[#allocation5 + $0x440] ss:$12 sps:$4 sm:$0xff]  }
 0x1c2   : > { %v1854_v40 = vpop.f32.mrf.mxu0  ;;  %2585 = vmatmul.mubr.bf16.vlgmr.msra.gmra.mxu0 %v6399_v15 }
 0x1c3   : > { %8523 = vst [vmem:[#allocation98_spill] sm:$0xff] %v6977_v61  ;;  %v2047_v35 = vpop.f32.mrf.mxu1  ;;  %4630 = vmatmul.mubr.msk.bf16.gmra.mxu1 %vm1731_vm0, %v6972_v42  ;;  %v6983_v57 = vadd.f32 %v2043_v39, %v1851_v7  ;;  %v1855_v45 = vadd.f32 %v1854_v40, %v6871_v37  ;;  %5082 = vmatpush3.bf16.msra.mxu0 %v5816_v9 }
 0x1c4   : > { %2481 = vmatprep.mubr.bf16.mxu1 %v8492_v51  ;;  %v1856_v59 = vpop.f32.mrf.mxu0  ;;  %2592 = vmatprep.mubr.bf16.mxu0 %v6403_v18  ;;  %v6993_v42 = vpack.c.bf16 %v537_v30, %v530_v6  ;;  %v5824_v18 = vld [vmem:[#allocation5 + $0x380] ss:$12 sps:$4 sm:$0xff]  }
 0x1c5   : > { %8524 = vst [vmem:[#allocation99_spill] sm:$0xff] %v6983_v57  ;;  %v2049_v38 = vpop.f32.mrf.mxu1  ;;  %5083 = vmatprep.subr.bf16.mxu0 %v5819_v28  ;;  %v6990_v61 = vadd.f32 %v2047_v35, %v1855_v45  ;;  %v1857_v15 = vadd.f32 %v1856_v59, %v6875_v36  ;;  %v5827_v45 = vld [vmem:[#allocation5 + $0x428] ss:$12 sps:$4 sm:$0xff]  }
 0x1c6   : > { %v1858_v39 = vpop.f32.mrf.mxu0  ;;  %8526 = vst [vmem:[#allocation101_spill] sm:$0xff] %v6993_v42 }
 0x1c7   : > { %8525 = vst [vmem:[#allocation100_spill] sm:$0xff] %v6990_v61  ;;  %v2051_v7 = vpop.f32.mrf.mxu1  ;;  %v6995_v9 = vadd.f32 %v2049_v38, %v1857_v15  ;;  %v1859_v40 = vadd.f32 %v1858_v39, %v6871_v37  ;;  %5084 = vmatpush3.bf16.msra.mxu0 %v5820_v17  ;;  %v544_v17 = vld [vmem:[%s6363_s9 + $0x490] sm:$0xff]  ;;  %v551_v38 = vld [vmem:[%s6363_s9 + $0x4c8] sm:$0xff] }
 0x1c8   : > { %v1860_v57 = vpop.f32.mrf.mxu0  ;;  %5085 = vmatprep.subr.bf16.mxu0 %v5823_v53  ;;  %v5828_v15 = vld [vmem:[#allocation5 + $0x368] ss:$12 sps:$4 sm:$0xff]  }
 0x1c9   : > { %v2053_v25 = vpop.f32.mrf.mxu1  ;;  %v6998_v28 = vadd.f32 %v2051_v7, %v1859_v40  ;;  %v1861_v35 = vadd.f32 %v1860_v57, %v6875_v36 }
 0x1ca   : > { %v1864_v59 = vpop.f32.mrf.mxu0  ;;  %2593 = vmatmul.mubr.bf16.gmra.mxu0 %v6419_v31  ;;  %v5831_v31 = vld [vmem:[#allocation5 + $0x410] ss:$12 sps:$4 sm:$0xff]  }
 0x1cb   : > { %v2057_v61 = vpop.f32.mrf.mxu1  ;;  %4631 = vmatmul.mubr.msk.bf16.gmra.mxu1 %vm1731_vm0, %v6993_v42  ;;  %v7004_v6 = vadd.f32 %v2053_v25, %v1861_v35  ;;  %v1865_v30 = vadd.f32 %v1864_v59, %v6871_v37  ;;  %2600 = vmatprep.mubr.bf16.mxu0 %v6423_v33  ;;  %v7014_v35 = vpack.c.bf16 %v551_v38, %v544_v17 }
 0x1cc   : > { %2491 = vmatprep.mubr.bf16.mxu1 %v8492_v51  ;;  %v1866_v53 = vpop.f32.mrf.mxu0  ;;  %5086 = vmatpush3.bf16.msra.mxu0 %v5824_v18  ;;  %v5832_v18 = vld [vmem:[#allocation5 + $0x350] ss:$12 sps:$4 sm:$0xff]  }
 0x1cd   : > { %8527 = vst [vmem:[#allocation102_spill] sm:$0xff] %v7004_v6  ;;  %v2059_v57 = vpop.f32.mrf.mxu1  ;;  %v7011_v39 = vadd.f32 %v2057_v61, %v1865_v30  ;;  %v1867_v7 = vadd.f32 %v1866_v53, %v6875_v36  ;;  %5087 = vmatprep.subr.bf16.mxu0 %v5827_v45  ;;  %8529 = vst [vmem:[#allocation104_spill] sm:$0xff] %v7014_v35  ;;  %v5834_v45 = vld [vmem:[#allocation5 + $0x3f8] ss:$12 sps:$4 sm:$0xff]  }
 0x1ce   : > { %v1868_v25 = vpop.f32.mrf.mxu0 }
 0x1cf   : > { %8528 = vst [vmem:[#allocation103_spill] sm:$0xff] %v7011_v39  ;;  %v2061_v40 = vpop.f32.mrf.mxu1  ;;  %v7016_v59 = vadd.f32 %v2059_v57, %v1867_v7  ;;  %v1869_v33 = vadd.f32 %v1868_v25, %v6871_v37  ;;  %v558_v57 = vld [vmem:[%s6363_s9 + $0x500] sm:$0xff] }
 0x1d0   : > { %v1870_v42 = vpop.f32.mrf.mxu0  ;;  %5088 = vmatpush3.bf16.msra.mxu0 %v5828_v15  ;;  %v565_v15 = vld [vmem:[%s6363_s9 + $0x538] sm:$0xff] }
 0x1d1   : > { %v2063_v6 = vpop.f32.mrf.mxu1  ;;  %v7019_v61 = vadd.f32 %v2061_v40, %v1869_v33  ;;  %v1871_v30 = vadd.f32 %v1870_v42, %v6875_v36  ;;  %5089 = vmatprep.subr.bf16.mxu0 %v5831_v31  ;;  %v5835_v31 = vld [vmem:[#allocation5 + $0x338] ss:$12 sps:$4 sm:$0xff]  }
 0x1d2   : > { %v1874_v53 = vpop.f32.mrf.mxu0  ;;  %2601 = vmatmul.mubr.bf16.gmra.mxu0 %v6439_v47  ;;  %v5836_v47 = vld [vmem:[#allocation5 + $0x3e0] ss:$12 sps:$4 sm:$0xff]  }
 0x1d3   : > { %v2067_v39 = vpop.f32.mrf.mxu1  ;;  %4632 = vmatmul.mubr.msk.bf16.gmra.mxu1 %vm1731_vm0, %v7014_v35  ;;  %v7025_v17 = vadd.f32 %v2063_v6, %v1871_v30  ;;  %v1875_v38 = vadd.f32 %v1874_v53, %v6871_v37  ;;  %2608 = vmatprep.mubr.bf16.mxu0 %v6443_v49  ;;  %v7035_v30 = vpack.c.bf16 %v565_v15, %v558_v57 }
 0x1d4   : > { %2501 = vmatprep.mubr.bf16.mxu1 %v8492_v51  ;;  %v1876_v42 = vpop.f32.mrf.mxu0  ;;  %5090 = vmatpush3.bf16.msra.mxu0 %v5832_v18  ;;  %v5837_v18 = vld [vmem:[#allocation5 + $0x320] ss:$12 sps:$4 sm:$0xff]  }
 0x1d5   : > { %8530 = vst [vmem:[#allocation105_spill] sm:$0xff] %v7025_v17  ;;  %v2069_v7 = vpop.f32.mrf.mxu1  ;;  %v7032_v25 = vadd.f32 %v2067_v39, %v1875_v38  ;;  %v1877_v40 = vadd.f32 %v1876_v42, %v6875_v36  ;;  %5091 = vmatprep.subr.bf16.mxu0 %v5834_v45  ;;  %8532 = vst [vmem:[#allocation107_spill] sm:$0xff] %v7035_v30  ;;  %v5838_v45 = vld [vmem:[#allocation5 + $0x3c8] ss:$12 sps:$4 sm:$0xff]  }
 0x1d6   : > { %v1878_v6 = vpop.f32.mrf.mxu0 }
 0x1d7   : > { %8531 = vst [vmem:[#allocation106_spill] sm:$0xff] %v7032_v25  ;;  %v2071_v33 = vpop.f32.mrf.mxu1  ;;  %v7037_v53 = vadd.f32 %v2069_v7, %v1877_v40  ;;  %v1879_v49 = vadd.f32 %v1878_v6, %v6871_v37  ;;  %v572_v7 = vld [vmem:[%s6363_s9 + $0x570] sm:$0xff] }
 0x1d8   : > { %v1880_v35 = vpop.f32.mrf.mxu0  ;;  %5092 = vmatpush3.bf16.msra.mxu0 %v5835_v31  ;;  %v579_v31 = vld [vmem:[%s6363_s9 + $0x5a8] sm:$0xff] }
 0x1d9   : > { %v2073_v17 = vpop.f32.mrf.mxu1  ;;  %v7040_v39 = vadd.f32 %v2071_v33, %v1879_v49  ;;  %v1881_v38 = vadd.f32 %v1880_v35, %v6875_v36  ;;  %5093 = vmatprep.subr.bf16.mxu0 %v5836_v47  ;;  %v5839_v47 = vld [vmem:[#allocation5 + $0x308] ss:$12 sps:$4 sm:$0xff]   ;;  %v7056_v49 = vpack.c.bf16 %v579_v31, %v572_v7  ;;  %v586_v31 = vld [vmem:[%s6363_s9 + $0x5e0] sm:$0xff] }
 0x1da   : > { %v1884_v42 = vpop.f32.mrf.mxu0  ;;  %2609 = vmatmul.mubr.bf16.gmra.mxu0 %v6459_v1 }
 0x1db   : > { %v2077_v25 = vpop.f32.mrf.mxu1  ;;  %4633 = vmatmul.mubr.msk.bf16.gmra.mxu1 %vm1731_vm0, %v7035_v30  ;;  %v7046_v57 = vadd.f32 %v2073_v17, %v1881_v38  ;;  %v1885_v15 = vadd.f32 %v1884_v42, %v6871_v37  ;;  %2616 = vmatprep.mubr.bf16.mxu0 %v6463_v3  ;;  %8533 = vst [vmem:[#allocation108_spill] sm:$0xff] %v7056_v49 }
 0x1dc   : > { %2511 = vmatprep.mubr.bf16.mxu1 %v8492_v51  ;;  %v1886_v35 = vpop.f32.mrf.mxu0  ;;  %5094 = vmatpush3.bf16.msra.mxu0 %v5837_v18 }
 0x1dd   : > { %v2079_v40 = vpop.f32.mrf.mxu1  ;;  %v7053_v6 = vadd.f32 %v2077_v25, %v1885_v15  ;;  %v1887_v33 = vadd.f32 %v1886_v35, %v6875_v36  ;;  %5095 = vmatprep.subr.bf16.mxu0 %v5838_v45 }
 0x1de   : > { %v1888_v1 = vpop.f32.mrf.mxu0 }
 0x1df   : > { %v2081_v17 = vpop.f32.mrf.mxu1  ;;  %v7058_v38 = vadd.f32 %v2079_v40, %v1887_v33  ;;  %v1889_v3 = vadd.f32 %v1888_v1, %v6871_v37  ;;  %v593_v40 = vld [vmem:[%s6363_s9 + $0x618] sm:$0xff] }
 0x1e0   : > { %v1890_v42 = vpop.f32.mrf.mxu0  ;;  %5096 = vmatpush3.bf16.msra.mxu0 %v5839_v47 }
 0x1e1   : > { %v2083_v30 = vpop.f32.mrf.mxu1  ;;  %v7061_v18 = vadd.f32 %v2081_v17, %v1889_v3  ;;  %v1891_v25 = vadd.f32 %v1890_v42, %v6875_v36 }
 0x1e2   : > { %v1894_v15 = vpop.f32.mrf.mxu0  ;;  %2617 = vmatmul.mubr.bf16.gmra.mxu0 %v6479_v21  ;;  %v7077_v21 = vpack.c.bf16 %v593_v40, %v586_v31 }
 0x1e3   : > { %v2087_v35 = vpop.f32.mrf.mxu1  ;;  %4634 = vmatmul.mubr.msk.bf16.gmra.mxu1 %vm1731_vm0, %v7056_v49  ;;  %v7067_v45 = vadd.f32 %v2083_v30, %v1891_v25  ;;  %v1895_v7 = vadd.f32 %v1894_v15, %v6871_v37  ;;  %2624 = vmatprep.mubr.bf16.mxu0 %v6483_v23 }
 0x1e4   : > { %2521 = vmatprep.mubr.bf16.mxu1 %v8492_v51  ;;  %v1896_v47 = vpop.f32.mrf.mxu0  ;;  %8535 = vst [vmem:[#allocation110_spill] sm:$0xff] %v7077_v21 }
 0x1e5   : > { %8534 = vst [vmem:[#allocation109_spill] sm:$0xff] %v7067_v45  ;;  %v2089_v33 = vpop.f32.mrf.mxu1  ;;  %v7074_v1 = vadd.f32 %v2087_v35, %v1895_v7  ;;  %v1897_v17 = vadd.f32 %v1896_v47, %v6875_v36  ;;  %v600_v47 = vld [vmem:[%s6363_s9 + $0x650] sm:$0xff] }
 0x1e6   : > { %v1898_v3 = vpop.f32.mrf.mxu0 }
 0x1e7   : > { %v2091_v42 = vpop.f32.mrf.mxu1  ;;  %v7079_v30 = vadd.f32 %v2089_v33, %v1897_v17  ;;  %v1899_v25 = vadd.f32 %v1898_v3, %v6871_v37  ;;  %v607_v33 = vld [vmem:[%s6363_s9 + $0x688] sm:$0xff] }
 0x1e8   : > { %v1900_v15 = vpop.f32.mrf.mxu0 }
 0x1e9   : > { %v2093_v23 = vpop.f32.mrf.mxu1  ;;  %v7082_v49 = vadd.f32 %v2091_v42, %v1899_v25  ;;  %v1901_v45 = vadd.f32 %v1900_v15, %v6875_v36 }
 0x1ea   : > { %v1904_v35 = vpop.f32.mrf.mxu0  ;;  %2625 = vmatmul.mubr.bf16.gmra.mxu0 %v6499_v41  ;;  %v7098_v41 = vpack.c.bf16 %v607_v33, %v600_v47 }
 0x1eb   : > { %8536 = vst [vmem:[#allocation111_spill] sm:$0xff] %v7082_v49  ;;  %v2097_v7 = vpop.f32.mrf.mxu1  ;;  %4635 = vmatmul.mubr.msk.bf16.gmra.mxu1 %vm1731_vm0, %v7077_v21  ;;  %v7088_v31 = vadd.f32 %v2093_v23, %v1901_v45  ;;  %v1905_v40 = vadd.f32 %v1904_v35, %v6871_v37  ;;  %2632 = vmatprep.mubr.bf16.mxu0 %v6503_v43 }
 0x1ec   : > { %2531 = vmatprep.mubr.bf16.mxu1 %v8492_v51  ;;  %v1906_v17 = vpop.f32.mrf.mxu0  ;;  %8538 = vst [vmem:[#allocation113_spill] sm:$0xff] %v7098_v41 }
 0x1ed   : > { %8537 = vst [vmem:[#allocation112_spill] sm:$0xff] %v7088_v31  ;;  %v2099_v3 = vpop.f32.mrf.mxu1  ;;  %v7095_v42 = vadd.f32 %v2097_v7, %v1905_v40  ;;  %v1907_v25 = vadd.f32 %v1906_v17, %v6875_v36  ;;  %v614_v17 = vld [vmem:[%s6363_s9 + $0x6c0] sm:$0xff] }
 0x1ee   : > { %v1908_v15 = vpop.f32.mrf.mxu0 }
 0x1ef   : > { %v2101_v21 = vpop.f32.mrf.mxu1  ;;  %v7100_v45 = vadd.f32 %v2099_v3, %v1907_v25  ;;  %v1909_v23 = vadd.f32 %v1908_v15, %v6871_v37 }
 0x1f0   : > { %v1910_v35 = vpop.f32.mrf.mxu0 }
 0x1f1   : > { %8539 = vst [vmem:[#allocation114_spill] sm:$0xff] %v7100_v45  ;;  %v2103_v43 = vpop.f32.mrf.mxu1  ;;  %v7103_v31 = vadd.f32 %v2101_v21, %v1909_v23  ;;  %v1911_v49 = vadd.f32 %v1910_v35, %v6875_v36  ;;  %v621_v21 = vld [vmem:[%s6363_s9 + $0x6f8] sm:$0xff] }
 0x1f2   : > { %v1914_v7 = vpop.f32.mrf.mxu0  ;;  %2633 = vmatmul.mubr.bf16.gmra.mxu0 %v6519_v63 }
 0x1f3   : > { %8540 = vst [vmem:[#allocation115_spill] sm:$0xff] %v7103_v31  ;;  %v2107_v40 = vpop.f32.mrf.mxu1  ;;  %4636 = vmatmul.mubr.msk.bf16.gmra.mxu1 %vm1731_vm0, %v7098_v41  ;;  %v7109_v47 = vadd.f32 %v2103_v43, %v1911_v49  ;;  %v1915_v33 = vadd.f32 %v1914_v7, %v6871_v37  ;;  %2640 = vmatprep.mubr.bf16.mxu0 %v6523_v5 }
 0x1f4   : > { %2541 = vmatprep.mubr.bf16.mxu1 %v8492_v51  ;;  %v1916_v3 = vpop.f32.mrf.mxu0  ;;  %v7119_v31 = vpack.c.bf16 %v621_v21, %v614_v17 }
 0x1f5   : > { %8541 = vst [vmem:[#allocation116_spill] sm:$0xff] %v7109_v47  ;;  %v2109_v25 = vpop.f32.mrf.mxu1  ;;  %v7116_v15 = vadd.f32 %v2107_v40, %v1915_v33  ;;  %v1917_v23 = vadd.f32 %v1916_v3, %v6875_v36 }
 0x1f6   : > { %v1918_v35 = vpop.f32.mrf.mxu0  ;;  %8542 = vst [vmem:[#allocation117_spill] sm:$0xff] %v7119_v31 }
 0x1f7   : > { %v2111_v41 = vpop.f32.mrf.mxu1  ;;  %v7121_v63 = vadd.f32 %v2109_v25, %v1917_v23  ;;  %v1919_v49 = vadd.f32 %v1918_v35, %v6871_v37 }
 0x1f8   : > { %v1920_v43 = vpop.f32.mrf.mxu0 }
 0x1f9   : > { %v2113_v51 = vpop.f32.mrf.mxu1  ;;  %v7124_v7 = vadd.f32 %v2111_v41, %v1919_v49  ;;  %v1921_v5 = vadd.f32 %v1920_v43, %v6875_v36 }
 0x1fa   : > { %v1924_v47 = vpop.f32.mrf.mxu0  ;;  %2641 = vmatmul.mubr.bf16.gmra.mxu0 %v6539_v27 }
 0x1fb   : > { %v2117_v45 = vpop.f32.mrf.mxu1  ;;  %4637 = vmatmul.mubr.msk.bf16.gmra.mxu1 %vm1731_vm0, %v7119_v31  ;;  %v7130_v40 = vadd.f32 %v2113_v51, %v1921_v5  ;;  %v1925_v33 = vadd.f32 %v1924_v47, %v6871_v37  ;;  %2648 = vmatprep.mubr.bf16.mxu0 %v6543_v29  ;;  %v8567_v31 = vld [vmem:[#allocation98_spill] sm:$0xff] }
 0x1fc   : > { %2745 = vmatprep.mubr.bf16.mxu1 %v6387_v54  ;;  %v1926_v17 = vpop.f32.mrf.mxu0 }
 0x1fd   : > { %v2119_v41 = vpop.f32.mrf.mxu1  ;;  %v7135_v21 = vadd.f32 %v2117_v45, %v1925_v33  ;;  %v1927_v3 = vadd.f32 %v1926_v17, %v6875_v36 }
 0x1fe   : > { %v1928_v25 = vpop.f32.mrf.mxu0 }
 0x1ff   : > { %v2121_v23 = vpop.f32.mrf.mxu1  ;;  %v7138_v35 = vadd.f32 %v2119_v41, %v1927_v3  ;;  %v1929_v27 = vadd.f32 %v1928_v25, %v6871_v37 }
 0x200   : > { %v1930_v49 = vpop.f32.mrf.mxu0 }
 0x201   : > { %v2123_v43 = vpop.f32.mrf.mxu1  ;;  %v7141_v51 = vadd.f32 %v2121_v23, %v1929_v27  ;;  %v1931_v29 = vadd.f32 %v1930_v49, %v6875_v36 }
 0x202   : > { %v1934_v47 = vpop.f32.mrf.mxu0  ;;  %2649 = vmatmul.mubr.bf16.gmra.mxu0 %v6559_v58 }
 0x203   : > { %v2127_v54 = vpop.f32.mrf.mxu1  ;;  %2746 = vmatmul.mubr.bf16.vlgmr.msra.gmra.mxu1 %v6401_v16  ;;  %v7146_v45 = vadd.f32 %v2123_v43, %v1931_v29  ;;  %v1935_v5 = vadd.f32 %v1934_v47, %v6871_v37  ;;  %2656 = vmatprep.mubr.bf16.mxu0 %v6563_v60 }
 0x204   : > { %5371 = vmatpush3.bf16.msra.mxu1 %v6865_v55  ;;  %v1936_v33 = vpop.f32.mrf.mxu0  ;;  %2753 = vmatprep.mubr.bf16.mxu1 %v6405_v19 }
 0x205   : > { %v2129_v17 = vpop.f32.mrf.mxu1  ;;  %v7152_v41 = vadd.f32 %v2127_v54, %v1935_v5  ;;  %v1937_v3 = vadd.f32 %v1936_v33, %v6875_v36 }
 0x206   : > { %v1938_v25 = vpop.f32.mrf.mxu0 }
 0x207   : > { %v2131_v58 = vpop.f32.mrf.mxu1  ;;  %v7155_v23 = vadd.f32 %v2129_v17, %v1937_v3  ;;  %v1939_v16 = vadd.f32 %v1938_v25, %v6871_v37 }
 0x208   : > { %v1940_v27 = vpop.f32.mrf.mxu0 }
 0x209   : > { %v2133_v49 = vpop.f32.mrf.mxu1  ;;  %v7158_v43 = vadd.f32 %v2131_v58, %v1939_v16  ;;  %v1941_v60 = vadd.f32 %v1940_v27, %v6875_v36 }
 0x20a   : > { %v1944_v55 = vpop.f32.mrf.mxu0  ;;  %2657 = vmatmul.mubr.bf16.gmra.mxu0 %v6579_v14 }
 0x20b   : > { %v2137_v29 = vpop.f32.mrf.mxu1  ;;  %2754 = vmatmul.mubr.bf16.gmra.mxu1 %v6421_v32  ;;  %v7163_v19 = vadd.f32 %v2133_v49, %v1941_v60  ;;  %v1945_v47 = vadd.f32 %v1944_v55, %v6871_v37  ;;  %2664 = vmatprep.mubr.bf16.mxu0 %v6583_v20 }
 0x20c   : > { %2761 = vmatprep.mubr.bf16.mxu1 %v6425_v34  ;;  %v1946_v54 = vpop.f32.mrf.mxu0 }
 0x20d   : > { %v2139_v5 = vpop.f32.mrf.mxu1  ;;  %v7168_v33 = vadd.f32 %v2137_v29, %v1945_v47  ;;  %v1947_v17 = vadd.f32 %v1946_v54, %v6875_v36 }
 0x20e   : > { %v1948_v3 = vpop.f32.mrf.mxu0 }
 0x20f   : > { %v2141_v25 = vpop.f32.mrf.mxu1  ;;  %v7171_v58 = vadd.f32 %v2139_v5, %v1947_v17  ;;  %v1949_v32 = vadd.f32 %v1948_v3, %v6871_v37 }
 0x210   : > { %v1950_v14 = vpop.f32.mrf.mxu0 }
 0x211   : > { %v2143_v16 = vpop.f32.mrf.mxu1  ;;  %v7174_v27 = vadd.f32 %v2141_v25, %v1949_v32  ;;  %v1951_v20 = vadd.f32 %v1950_v14, %v6875_v36 }
 0x212   : > { %v1954_v49 = vpop.f32.mrf.mxu0  ;;  %2665 = vmatmul.mubr.bf16.gmra.mxu0 %v6599_v46 }
 0x213   : > { %v2147_v34 = vpop.f32.mrf.mxu1  ;;  %2762 = vmatmul.mubr.bf16.gmra.mxu1 %v6441_v48  ;;  %v7179_v60 = vadd.f32 %v2143_v16, %v1951_v20  ;;  %v1955_v55 = vadd.f32 %v1954_v49, %v6871_v37  ;;  %2672 = vmatprep.mubr.bf16.mxu0 %v6603_v52 }
 0x214   : > { %2769 = vmatprep.mubr.bf16.mxu1 %v6445_v50  ;;  %v1956_v29 = vpop.f32.mrf.mxu0 }
 0x215   : > { %v2149_v47 = vpop.f32.mrf.mxu1  ;;  %v7184_v54 = vadd.f32 %v2147_v34, %v1955_v55  ;;  %v1957_v5 = vadd.f32 %v1956_v29, %v6875_v36 }
 0x216   : > { %v1958_v17 = vpop.f32.mrf.mxu0 }
 0x217   : > { %v2151_v3 = vpop.f32.mrf.mxu1  ;;  %v7187_v25 = vadd.f32 %v2149_v47, %v1957_v5  ;;  %v1959_v48 = vadd.f32 %v1958_v17, %v6871_v37 }
 0x218   : > { %v1960_v46 = vpop.f32.mrf.mxu0 }
 0x219   : > { %v2153_v32 = vpop.f32.mrf.mxu1  ;;  %v7190_v14 = vadd.f32 %v2151_v3, %v1959_v48  ;;  %v1961_v52 = vadd.f32 %v1960_v46, %v6875_v36  ;;  %v5840_v46 = vld [vmem:[#allocation8 + $0x78] sm:$0xff]  }
 0x21a   : > { %v1964_v16 = vpop.f32.mrf.mxu0  ;;  %2673 = vmatmul.mubr.bf16.gmra.mxu0 %v6619_v12  ;;  %5210 = vmatprep.subr.bf16.mxu1 %v5840_v46  ;;  %v8547_v46 = vld [vmem:[#allocation86_spill] sm:$0xff] }
 0x21b   : > { %v2157_v50 = vpop.f32.mrf.mxu1  ;;  %2770 = vmatmul.mubr.bf16.gmra.mxu1 %v6461_v2  ;;  %v7195_v20 = vadd.f32 %v2153_v32, %v1961_v52  ;;  %v1965_v49 = vadd.f32 %v1964_v16, %v6871_v37  ;;  %2680 = vmatprep.mubr.bf16.mxu0 %v6623_v26 }
 0x21c   : > { %2777 = vmatprep.mubr.bf16.mxu1 %v6465_v4  ;;  %v1966_v34 = vpop.f32.mrf.mxu0 }
 0x21d   : > { %v2159_v55 = vpop.f32.mrf.mxu1  ;;  %v7200_v29 = vadd.f32 %v2157_v50, %v1965_v49  ;;  %v1967_v47 = vadd.f32 %v1966_v34, %v6875_v36 }
 0x21e   : > { %v1968_v5 = vpop.f32.mrf.mxu0 }
 0x21f   : > { %v2161_v17 = vpop.f32.mrf.mxu1  ;;  %v7203_v3 = vadd.f32 %v2159_v55, %v1967_v47  ;;  %v1969_v2 = vadd.f32 %v1968_v5, %v6871_v37 }
 0x220   : > { %v1970_v12 = vpop.f32.mrf.mxu0 }
 0x221   : > { %v2163_v48 = vpop.f32.mrf.mxu1  ;;  %v7206_v32 = vadd.f32 %v2161_v17, %v1969_v2  ;;  %v1971_v26 = vadd.f32 %v1970_v12, %v6875_v36 }
 0x222   : > { %v2200_v4 = vpop.f32.mrf.mxu0  ;;  %2681 = vmatmul.mubr.bf16.gmra.mxu0 %v6639_v62 }
 0x223   : > { %v2320_v52 = vpop.f32.mrf.mxu1  ;;  %2778 = vmatmul.mubr.bf16.gmra.mxu1 %v6481_v22  ;;  %v7211_v16 = vadd.f32 %v2163_v48, %v1971_v26  ;;  %v7214_v50 = vadd.f32 %v2200_v4, %v6890_v11  ;;  %2688 = vmatprep.mubr.bf16.mxu0 %v6643_v8  ;;  %v8543_v11 = vld [vmem:[#allocation84_spill] sm:$0xff]  ;;  %v8546_v48 = vld [vmem:[#allocation22_spill] sm:$0xff] }
 0x224   : > { %v7217_v37 = vadd.f32 %v2320_v52, %v7152_v41  ;;  %2785 = vmatprep.mubr.bf16.mxu1 %v6485_v24  ;;  %v2202_v49 = vpop.f32.mrf.mxu0  ;;  %v8544_v24 = vld [vmem:[#allocation85_spill] sm:$0xff]  ;;  %v8548_v4 = vld [vmem:[#allocation40_spill] sm:$0xff]  ;;  %v8549_v52 = vld [vmem:[#allocation23_spill] sm:$0xff] }
 0x225   : > { %v2322_v36 = vpop.f32.mrf.mxu1  ;;  %v7222_v34 = vadd.f32 %v2202_v49, %v6897_v10 }
 0x226   : > { %v7225_v22 = vadd.f32 %v2322_v36, %v7155_v23  ;;  %v2204_v62 = vpop.f32.mrf.mxu0  ;;  %v8545_v23 = vld [vmem:[#allocation38_spill] sm:$0xff] }
 0x227   : > { %v2324_v55 = vpop.f32.mrf.mxu1  ;;  %v7228_v47 = vadd.f32 %v2204_v62, %v8543_v11 }
 0x228   : > { %v7231_v41 = vadd.f32 %v2324_v55, %v7158_v43  ;;  %v2206_v8 = vpop.f32.mrf.mxu0 }
 0x229   : > { %v2326_v5 = vpop.f32.mrf.mxu1  ;;  %v7234_v17 = vadd.f32 %v2206_v8, %v8544_v24  ;;  %v8550_v8 = vld [vmem:[#allocation90_spill] sm:$0xff] }
 0x22a   : > { %v7237_v2 = vadd.f32 %v2326_v5, %v7163_v19  ;;  %v2210_v10 = vpop.f32.mrf.mxu0  ;;  %2689 = vmatmul.mubr.bf16.gmra.mxu0 %v8545_v23 }
 0x22b   : > { %v2330_v12 = vpop.f32.mrf.mxu1  ;;  %2786 = vmatmul.mubr.bf16.gmra.mxu1 %v8546_v48  ;;  %v7242_v26 = vadd.f32 %v2210_v10, %v8547_v46  ;;  %2696 = vmatprep.mubr.bf16.mxu0 %v8548_v4  ;;  %v8553_v4 = vld [vmem:[#allocation24_spill] sm:$0xff] }
 0x22c   : > { %v7245_v43 = vadd.f32 %v2330_v12, %v7168_v33  ;;  %2793 = vmatprep.mubr.bf16.mxu1 %v8549_v52  ;;  %v2212_v49 = vpop.f32.mrf.mxu0  ;;  %v8551_v12 = vld [vmem:[#allocation91_spill] sm:$0xff] }
 0x22d   : > { %v2332_v36 = vpop.f32.mrf.mxu1  ;;  %v7250_v19 = vadd.f32 %v2212_v49, %v6926_v44  ;;  %v8554_v49 = vld [vmem:[#allocation44_spill] sm:$0xff] }
 0x22e   : > { %v7253_v62 = vadd.f32 %v2332_v36, %v7171_v58  ;;  %v2214_v55 = vpop.f32.mrf.mxu0  ;;  %v8552_v58 = vld [vmem:[#allocation42_spill] sm:$0xff]  ;;  %v8555_v36 = vld [vmem:[#allocation25_spill] sm:$0xff] }
 0x22f   : > { %v2334_v11 = vpop.f32.mrf.mxu1  ;;  %v7256_v5 = vadd.f32 %v2214_v55, %v8550_v8 }
 0x230   : > { %v7259_v33 = vadd.f32 %v2334_v11, %v7174_v27  ;;  %v2216_v24 = vpop.f32.mrf.mxu0 }
 0x231   : > { %v2336_v10 = vpop.f32.mrf.mxu1  ;;  %v7262_v23 = vadd.f32 %v2216_v24, %v8551_v12  ;;  %v8556_v12 = vld [vmem:[#allocation94_spill] sm:$0xff] }
 0x232   : > { %v7265_v48 = vadd.f32 %v2336_v10, %v7179_v60  ;;  %v2220_v44 = vpop.f32.mrf.mxu0  ;;  %2697 = vmatmul.mubr.bf16.gmra.mxu0 %v8552_v58  ;;  %v8558_v58 = vld [vmem:[#allocation95_spill] sm:$0xff] }
 0x233   : > { %v2340_v46 = vpop.f32.mrf.mxu1  ;;  %2794 = vmatmul.mubr.bf16.gmra.mxu1 %v8553_v4  ;;  %v7270_v52 = vadd.f32 %v2220_v44, %v6946_v0  ;;  %2704 = vmatprep.mubr.bf16.mxu0 %v8554_v49 }
 0x234   : > { %v7273_v27 = vadd.f32 %v2340_v46, %v7184_v54  ;;  %2801 = vmatprep.mubr.bf16.mxu1 %v8555_v36  ;;  %v2222_v55 = vpop.f32.mrf.mxu0 }
 0x235   : > { %v2342_v11 = vpop.f32.mrf.mxu1  ;;  %v7278_v60 = vadd.f32 %v2222_v55, %v6953_v56  ;;  %v8561_v55 = vld [vmem:[#allocation26_spill] sm:$0xff] }
 0x236   : > { %v7281_v8 = vadd.f32 %v2342_v11, %v7187_v25  ;;  %v2224_v24 = vpop.f32.mrf.mxu0  ;;  %v8560_v25 = vld [vmem:[#allocation46_spill] sm:$0xff] }
 0x237   : > { %v2344_v10 = vpop.f32.mrf.mxu1  ;;  %v7284_v0 = vadd.f32 %v2224_v24, %v8556_v12  ;;  %v8563_v24 = vld [vmem:[#allocation27_spill] sm:$0xff] }
 0x238   : > { %v7287_v54 = vadd.f32 %v2344_v10, %v7190_v14  ;;  %v2226_v44 = vpop.f32.mrf.mxu0  ;;  %v8564_v10 = vld [vmem:[#allocation48_spill] sm:$0xff] }
 0x239   : > { %v2346_v46 = vpop.f32.mrf.mxu1  ;;  %v7290_v4 = vadd.f32 %v2226_v44, %v8558_v58 }
 0x23a   : > { %8557 = vst [vmem:[#allocation84_spill] sm:$0xff] %v7287_v54  ;;  %v7293_v49 = vadd.f32 %v2346_v46, %v7195_v20  ;;  %v2230_v56 = vpop.f32.mrf.mxu0  ;;  %2705 = vmatmul.mubr.bf16.gmra.mxu0 %v8560_v25  ;;  %v8565_v20 = vld [vmem:[#allocation97_spill] sm:$0xff] }
 0x23b   : > { %v2350_v36 = vpop.f32.mrf.mxu1  ;;  %2802 = vmatmul.mubr.bf16.gmra.mxu1 %v8561_v55  ;;  %v7298_v11 = vadd.f32 %v2230_v56, %v6969_v13  ;;  %2906 = vmatprep.mubr.bf16.mxu0 %v8564_v10 }
 0x23c   : > { %8559 = vst [vmem:[#allocation85_spill] sm:$0xff] %v7293_v49  ;;  %v7301_v14 = vadd.f32 %v2350_v36, %v7200_v29  ;;  %2809 = vmatprep.mubr.bf16.mxu1 %v8563_v24  ;;  %v2232_v12 = vpop.f32.mrf.mxu0  ;;  %v8569_v24 = vld [vmem:[#allocation99_spill] sm:$0xff] }
 0x23d   : > { %v2352_v44 = vpop.f32.mrf.mxu1  ;;  %v7306_v46 = vadd.f32 %v2232_v12, %v8565_v20 }
 0x23e   : > { %8562 = vst [vmem:[#allocation38_spill] sm:$0xff] %v7301_v14  ;;  %v7309_v58 = vadd.f32 %v2352_v44, %v7203_v3  ;;  %v2234_v25 = vpop.f32.mrf.mxu0  ;;  %v8571_v3 = vld [vmem:[#allocation28_spill] sm:$0xff]  ;;  %v8572_v44 = vld [vmem:[#allocation50_spill] sm:$0xff] }
 0x23f   : > { %v2354_v55 = vpop.f32.mrf.mxu1  ;;  %v7312_v13 = vadd.f32 %v2234_v25, %v8567_v31  ;;  %v8574_v25 = vld [vmem:[#allocation29_spill] sm:$0xff] }
 0x240   : > { %8566 = vst [vmem:[#allocation22_spill] sm:$0xff] %v7309_v58  ;;  %v7315_v29 = vadd.f32 %v2354_v55, %v7206_v32  ;;  %v2236_v56 = vpop.f32.mrf.mxu0  ;;  %v8573_v58 = vld [vmem:[#allocation100_spill] sm:$0xff] }
 0x241   : > { %v2356_v36 = vpop.f32.mrf.mxu1  ;;  %v7318_v10 = vadd.f32 %v2236_v56, %v8569_v24  ;;  %v8575_v55 = vld [vmem:[#allocation52_spill] sm:$0xff] }
 0x242   : > { %8568 = vst [vmem:[#allocation86_spill] sm:$0xff] %v7315_v29  ;;  %v7321_v14 = vadd.f32 %v2356_v36, %v7211_v16  ;;  %v2240_v12 = vpop.f32.mrf.mxu0  ;;  %2907 = vmatmul.mubr.bf16.vlgmr.msra.gmra.mxu0 %v8572_v44  ;;  %v8576_v29 = vld [vmem:[#allocation102_spill] sm:$0xff] }
 0x243   : > { %v2393_v20 = vpop.f32.mrf.mxu1  ;;  %2810 = vmatmul.mubr.bf16.gmra.mxu1 %v8571_v3  ;;  %v7326_v31 = vadd.f32 %v2240_v12, %v8573_v58  ;;  %2914 = vmatprep.mubr.bf16.mxu0 %v8575_v55 }
 0x244   : > { %8570 = vst [vmem:[#allocation40_spill] sm:$0xff] %v7321_v14  ;;  %v2394_v32 = vadd.f32 %v2393_v20, %v7214_v50  ;;  %2817 = vmatprep.mubr.bf16.mxu1 %v8574_v25  ;;  %v2242_v56 = vpop.f32.mrf.mxu0 }
 0x245   : > { %v2395_v24 = vpop.f32.mrf.mxu1  ;;  %v7332_v16 = vadd.f32 %v2242_v56, %v6995_v9 }
 0x246   : > { %v2396_v36 = vadd.f32 %v2395_v24, %v7222_v34  ;;  %v2244_v14 = vpop.f32.mrf.mxu0  ;;  %v3196_v20 = vmax.f32 %v2394_v32, 0.0  ;;  %v8577_v34 = vld [vmem:[#allocation30_spill] sm:$0xff] }
 0x247   : > { %v2397_v3 = vpop.f32.mrf.mxu1  ;;  %v7336_v44 = vadd.f32 %v2244_v14, %v6998_v28  ;;  %v8578_v24 = vld [vmem:[#allocation54_spill] sm:$0xff] }
 0x248   : > { %v2398_v58 = vadd.f32 %v2397_v3, %v7228_v47  ;;  %v2246_v12 = vpop.f32.mrf.mxu0  ;;  %v3197_v9 = vmax.f32 %v2396_v36, 0.0  ;;  %v8579_v47 = vld [vmem:[#allocation103_spill] sm:$0xff] }
 0x249   : > { %v2399_v50 = vpop.f32.mrf.mxu1  ;;  %v7340_v55 = vadd.f32 %v2246_v12, %v8576_v29  ;;  %v8581_v29 = vld [vmem:[#allocation56_spill] sm:$0xff] }
 0x24a   : > { %v3199_v25 = vmax.f32 %v2398_v58, 0.0  ;;  %v2400_v49 = vadd.f32 %v2399_v50, %v7234_v17  ;;  %v2250_v56 = vpop.f32.mrf.mxu0  ;;  %2915 = vmatmul.mubr.bf16.gmra.mxu0 %v8578_v24  ;;  %v8580_v58 = vld [vmem:[#allocation31_spill] sm:$0xff] }
 0x24b   : > { %v2403_v54 = vpop.f32.mrf.mxu1  ;;  %2818 = vmatmul.mubr.bf16.gmra.mxu1 %v8577_v34  ;;  %v7348_v3 = vadd.f32 %v2250_v56, %v8579_v47  ;;  %2922 = vmatprep.mubr.bf16.mxu0 %v8581_v29 }
 0x24c   : > { %v7345_v28 = vpack.c.bf16 %v3199_v25, %v3196_v20  ;;  %v3200_v14 = vmax.f32 %v2400_v49, 0.0  ;;  %v2404_v32 = vadd.f32 %v2403_v54, %v7242_v26  ;;  %2825 = vmatprep.mubr.bf16.mxu1 %v8580_v58  ;;  %v2252_v17 = vpop.f32.mrf.mxu0  ;;  %v8582_v58 = vld [vmem:[#allocation105_spill] sm:$0xff] }
 0x24d   : > { %v2405_v36 = vpop.f32.mrf.mxu1  ;;  %v7354_v12 = vadd.f32 %v2252_v17, %v7016_v59 }
 0x24e   : > { %v2406_v50 = vadd.f32 %v2405_v36, %v7250_v19  ;;  %v7357_v34 = vpack.c.bf16 %v3200_v14, %v3197_v9  ;;  %v2254_v20 = vpop.f32.mrf.mxu0  ;;  %v3202_v24 = vmax.f32 %v2404_v32, 0.0  ;;  %v8583_v14 = vld [vmem:[#allocation32_spill] sm:$0xff]  ;;  %v8584_v36 = vld [vmem:[#allocation58_spill] sm:$0xff] }
 0x24f   : > { %v2407_v49 = vpop.f32.mrf.mxu1  ;;  %v7360_v25 = vadd.f32 %v2254_v20, %v7019_v61 }
 0x250   : > { %v2408_v26 = vadd.f32 %v2407_v49, %v7256_v5  ;;  %v2256_v54 = vpop.f32.mrf.mxu0  ;;  %v3203_v17 = vmax.f32 %v2406_v50, 0.0  ;;  %v8585_v5 = vld [vmem:[#allocation106_spill] sm:$0xff] }
 0x251   : > { %v2409_v56 = vpop.f32.mrf.mxu1  ;;  %v7364_v29 = vadd.f32 %v2256_v54, %v8582_v58  ;;  %v8587_v54 = vld [vmem:[#allocation60_spill] sm:$0xff] }
 0x252   : > { %v3205_v47 = vmax.f32 %v2408_v26, 0.0  ;;  %v2410_v59 = vadd.f32 %v2409_v56, %v7262_v23  ;;  %v2260_v19 = vpop.f32.mrf.mxu0  ;;  %2923 = vmatmul.mubr.bf16.gmra.mxu0 %v8584_v36  ;;  %v8586_v26 = vld [vmem:[#allocation33_spill] sm:$0xff] }
 0x253   : > { %v2413_v9 = vpop.f32.mrf.mxu1  ;;  %2826 = vmatmul.mubr.bf16.gmra.mxu1 %v8583_v14  ;;  %v7372_v49 = vadd.f32 %v2260_v19, %v8585_v5  ;;  %2930 = vmatprep.mubr.bf16.mxu0 %v8587_v54  ;;  %v5856_v23 = vld [vmem:[#allocation8 + $0xb8] sm:$0xff]  }
 0x254   : > { %v7369_v61 = vpack.c.bf16 %v3205_v47, %v3202_v24  ;;  %v3206_v20 = vmax.f32 %v2410_v59, 0.0  ;;  %v2414_v32 = vadd.f32 %v2413_v9, %v7270_v52  ;;  %2833 = vmatprep.mubr.bf16.mxu1 %v8586_v26  ;;  %v2262_v50 = vpop.f32.mrf.mxu0  ;;  %5404 = vmatprep.subr.bf16.mxu0 %v5856_v23 }
 0x255   : > { %v2415_v56 = vpop.f32.mrf.mxu1  ;;  %v7378_v58 = vadd.f32 %v2262_v50, %v7037_v53  ;;  %5405 = vmatpush3.bf16.msra.mxu0 %v5856_v23  ;;  %v8588_v50 = vld [vmem:[#allocation34_spill] sm:$0xff] }
 0x256   : > { %v2416_v14 = vadd.f32 %v2415_v56, %v7278_v60  ;;  %v7381_v24 = vpack.c.bf16 %v3206_v20, %v3203_v17  ;;  %v2264_v47 = vpop.f32.mrf.mxu0  ;;  %v3208_v5 = vmax.f32 %v2414_v32, 0.0  ;;  %v8589_v23 = vld [vmem:[#allocation62_spill] sm:$0xff] }
 0x257   : > { %v2417_v59 = vpop.f32.mrf.mxu1  ;;  %v7384_v52 = vadd.f32 %v2264_v47, %v7040_v39  ;;  %v8590_v47 = vld [vmem:[#allocation35_spill] sm:$0xff] }
 0x258   : > { %v2418_v19 = vadd.f32 %v2417_v59, %v7284_v0  ;;  %v2266_v9 = vpop.f32.mrf.mxu0  ;;  %v3209_v17 = vmax.f32 %v2416_v14, 0.0 }
 0x259   : > { %v2419_v36 = vpop.f32.mrf.mxu1  ;;  %v7388_v53 = vadd.f32 %v2266_v9, %v7046_v57  ;;  %v8591_v57 = vld [vmem:[#allocation64_spill] sm:$0xff] }
 0x25a   : > { %v3211_v26 = vmax.f32 %v2418_v19, 0.0  ;;  %v2420_v60 = vadd.f32 %v2419_v36, %v7290_v4  ;;  %v2270_v20 = vpop.f32.mrf.mxu0  ;;  %2931 = vmatmul.mubr.bf16.gmra.mxu0 %v8589_v23 }
 0x25b   : > { %v2423_v54 = vpop.f32.mrf.mxu1  ;;  %2834 = vmatmul.mubr.bf16.gmra.mxu1 %v8588_v50  ;;  %v7396_v0 = vadd.f32 %v2270_v20, %v7053_v6  ;;  %2938 = vmatprep.mubr.bf16.mxu0 %v8591_v57  ;;  %v8592_v50 = vld [vmem:[#allocation109_spill] sm:$0xff] }
 0x25c   : > { %v7393_v39 = vpack.c.bf16 %v3211_v26, %v3208_v5  ;;  %v3212_v56 = vmax.f32 %v2420_v60, 0.0  ;;  %v2424_v32 = vadd.f32 %v2423_v54, %v7298_v11  ;;  %2841 = vmatprep.mubr.bf16.mxu1 %v8590_v47  ;;  %v2272_v4 = vpop.f32.mrf.mxu0  ;;  %v8594_v57 = vld [vmem:[#allocation65_spill] sm:$0xff] }
 0x25d   : > { %v2425_v14 = vpop.f32.mrf.mxu1  ;;  %v7402_v59 = vadd.f32 %v2272_v4, %v7058_v38 }
 0x25e   : > { %v2426_v19 = vadd.f32 %v2425_v14, %v7306_v46  ;;  %v7405_v9 = vpack.c.bf16 %v3212_v56, %v3209_v17  ;;  %v2274_v36 = vpop.f32.mrf.mxu0  ;;  %v3214_v20 = vmax.f32 %v2424_v32, 0.0  ;;  %v8593_v56 = vld [vmem:[#allocation36_spill] sm:$0xff]  ;;  %v8595_v14 = vld [vmem:[#allocation37_spill] sm:$0xff] }
 0x25f   : > { %v2427_v5 = vpop.f32.mrf.mxu1  ;;  %v7408_v6 = vadd.f32 %v2274_v36, %v7061_v18  ;;  %v8596_v36 = vld [vmem:[#allocation67_spill] sm:$0xff] }
 0x260   : > { %v2428_v11 = vadd.f32 %v2427_v5, %v7312_v13  ;;  %v2276_v26 = vpop.f32.mrf.mxu0  ;;  %v3215_v47 = vmax.f32 %v2426_v19, 0.0 }
 0x261   : > { %v2429_v60 = vpop.f32.mrf.mxu1  ;;  %v7412_v23 = vadd.f32 %v2276_v26, %v8592_v50 }
 0x262   : > { %v3217_v54 = vmax.f32 %v2428_v11, 0.0  ;;  %v2430_v38 = vadd.f32 %v2429_v60, %v7318_v10  ;;  %v2280_v46 = vpop.f32.mrf.mxu0  ;;  %2939 = vmatmul.mubr.bf16.gmra.mxu0 %v8594_v57  ;;  %v5857_v10 = vld [vmem:[#allocation8 + $0xb0] sm:$0xff]  }
 0x263   : > { %v2433_v17 = vpop.f32.mrf.mxu1  ;;  %2842 = vmatmul.mubr.bf16.gmra.mxu1 %v8593_v56  ;;  %v7420_v13 = vadd.f32 %v2280_v46, %v7074_v1  ;;  %2946 = vmatprep.mubr.bf16.mxu0 %v8596_v36  ;;  %v8598_v57 = vld [vmem:[#allocation112_spill] sm:$0xff]  ;;  %v8599_v36 = vld [vmem:[#allocation39_spill] sm:$0xff] }
 0x264   : > { %v7417_v18 = vpack.c.bf16 %v3217_v54, %v3214_v20  ;;  %v3218_v4 = vmax.f32 %v2430_v38, 0.0  ;;  %v2434_v32 = vadd.f32 %v2433_v17, %v7326_v31  ;;  %2849 = vmatprep.mubr.bf16.mxu1 %v8595_v14  ;;  %v2282_v19 = vpop.f32.mrf.mxu0  ;;  %5406 = vmatprep.subr.bf16.mxu0 %v5857_v10  ;;  %v8597_v54 = vld [vmem:[#allocation111_spill] sm:$0xff] }
 0x265   : > { %v2435_v5 = vpop.f32.mrf.mxu1  ;;  %v7426_v11 = vadd.f32 %v2282_v19, %v7079_v30  ;;  %5407 = vmatpush3.bf16.msra.mxu0 %v5857_v10  ;;  %v8600_v10 = vld [vmem:[#allocation68_spill] sm:$0xff] }
 0x266   : > { %v2436_v26 = vadd.f32 %v2435_v5, %v7332_v16  ;;  %v7429_v60 = vpack.c.bf16 %v3218_v4, %v3215_v47  ;;  %v2284_v20 = vpop.f32.mrf.mxu0  ;;  %v3220_v17 = vmax.f32 %v2434_v32, 0.0 }
 0x267   : > { %v2437_v1 = vpop.f32.mrf.mxu1  ;;  %v7432_v31 = vadd.f32 %v2284_v20, %v8597_v54  ;;  %v8601_v20 = vld [vmem:[#allocation41_spill] sm:$0xff]  ;;  %v8603_v54 = vld [vmem:[#allocation114_spill] sm:$0xff] }
 0x268   : > { %v2438_v50 = vadd.f32 %v2437_v1, %v7336_v44  ;;  %v2286_v38 = vpop.f32.mrf.mxu0  ;;  %v3221_v47 = vmax.f32 %v2436_v26, 0.0  ;;  %v8602_v1 = vld [vmem:[#allocation70_spill] sm:$0xff] }
 0x269   : > { %v2439_v46 = vpop.f32.mrf.mxu1  ;;  %v7436_v30 = vadd.f32 %v2286_v38, %v8598_v57  ;;  %v8604_v57 = vld [vmem:[#allocation115_spill] sm:$0xff] }
 0x26a   : > { %v3223_v56 = vmax.f32 %v2438_v50, 0.0  ;;  %v2440_v16 = vadd.f32 %v2439_v46, %v7340_v55  ;;  %v2290_v4 = vpop.f32.mrf.mxu0  ;;  %2947 = vmatmul.mubr.bf16.gmra.mxu0 %v8600_v10  ;;  %v8605_v10 = vld [vmem:[#allocation116_spill] sm:$0xff] }
 0x26b   : > { %v2443_v14 = vpop.f32.mrf.mxu1  ;;  %2850 = vmatmul.mubr.bf16.gmra.mxu1 %v8599_v36  ;;  %v7444_v44 = vadd.f32 %v2290_v4, %v7095_v42  ;;  %2954 = vmatprep.mubr.bf16.mxu0 %v8602_v1 }
 0x26c   : > { %v7441_v19 = vpack.c.bf16 %v3223_v56, %v3220_v17  ;;  %v3224_v5 = vmax.f32 %v2440_v16, 0.0  ;;  %v2444_v32 = vadd.f32 %v2443_v14, %v7348_v3  ;;  %2857 = vmatprep.mubr.bf16.mxu1 %v8601_v20  ;;  %v2292_v55 = vpop.f32.mrf.mxu0 }
 0x26d   : > { %v2445_v26 = vpop.f32.mrf.mxu1  ;;  %v7450_v50 = vadd.f32 %v2292_v55, %v8603_v54 }
 0x26e   : > { %v2446_v38 = vadd.f32 %v2445_v26, %v7354_v12  ;;  %v7453_v46 = vpack.c.bf16 %v3224_v5, %v3221_v47  ;;  %v2294_v17 = vpop.f32.mrf.mxu0  ;;  %v3226_v14 = vmax.f32 %v2444_v32, 0.0  ;;  %v8606_v5 = vld [vmem:[#allocation43_spill] sm:$0xff] }
 0x26f   : > { %v2447_v56 = vpop.f32.mrf.mxu1  ;;  %v7456_v42 = vadd.f32 %v2294_v17, %v8604_v57  ;;  %v8607_v26 = vld [vmem:[#allocation71_spill] sm:$0xff]  ;;  %v8609_v57 = vld [vmem:[#allocation73_spill] sm:$0xff] }
 0x270   : > { %v2448_v3 = vadd.f32 %v2447_v56, %v7360_v25  ;;  %v2296_v16 = vpop.f32.mrf.mxu0  ;;  %v3227_v55 = vmax.f32 %v2446_v38, 0.0  ;;  %v8608_v56 = vld [vmem:[#allocation45_spill] sm:$0xff] }
 0x271   : > { %v2449_v4 = vpop.f32.mrf.mxu1  ;;  %v7460_v20 = vadd.f32 %v2296_v16, %v8605_v10 }
 0x272   : > { %v3229_v36 = vmax.f32 %v2448_v3, 0.0  ;;  %v2450_v1 = vadd.f32 %v2449_v4, %v7364_v29  ;;  %v2300_v12 = vpop.f32.mrf.mxu0  ;;  %2955 = vmatmul.mubr.bf16.gmra.mxu0 %v8607_v26  ;;  %v5858_v29 = vld [vmem:[#allocation8 + $0xa8] sm:$0xff]  }
 0x273   : > { %v2453_v47 = vpop.f32.mrf.mxu1  ;;  %2858 = vmatmul.mubr.bf16.gmra.mxu1 %v8606_v5  ;;  %v7468_v25 = vadd.f32 %v2300_v12, %v7116_v15  ;;  %2962 = vmatprep.mubr.bf16.mxu0 %v8609_v57  ;;  %v8611_v57 = vld [vmem:[#allocation74_spill] sm:$0xff] }
 0x274   : > { %v7465_v54 = vpack.c.bf16 %v3229_v36, %v3226_v14  ;;  %v3230_v17 = vmax.f32 %v2450_v1, 0.0  ;;  %v2454_v32 = vadd.f32 %v2453_v47, %v7372_v49  ;;  %2865 = vmatprep.mubr.bf16.mxu1 %v8608_v56  ;;  %v2302_v38 = vpop.f32.mrf.mxu0  ;;  %5408 = vmatprep.subr.bf16.mxu0 %v5858_v29  ;;  %v8610_v56 = vld [vmem:[#allocation47_spill] sm:$0xff] }
 0x275   : > { %v2455_v3 = vpop.f32.mrf.mxu1  ;;  %v7474_v16 = vadd.f32 %v2302_v38, %v7121_v63  ;;  %5409 = vmatpush3.bf16.msra.mxu0 %v5858_v29  ;;  %v8612_v38 = vld [vmem:[#allocation76_spill] sm:$0xff] }
 0x276   : > { %v2456_v4 = vadd.f32 %v2455_v3, %v7378_v58  ;;  %v7477_v14 = vpack.c.bf16 %v3230_v17, %v3227_v55  ;;  %v2304_v36 = vpop.f32.mrf.mxu0  ;;  %v3232_v47 = vmax.f32 %v2454_v32, 0.0 }
 0x277   : > { %v2457_v15 = vpop.f32.mrf.mxu1  ;;  %v7480_v49 = vadd.f32 %v2304_v36, %v7124_v7 }
 0x278   : > { %v2458_v10 = vadd.f32 %v2457_v15, %v7384_v52  ;;  %v2306_v1 = vpop.f32.mrf.mxu0  ;;  %v3233_v55 = vmax.f32 %v2456_v4, 0.0 }
 0x279   : > { %v2459_v12 = vpop.f32.mrf.mxu1  ;;  %v7484_v63 = vadd.f32 %v2306_v1, %v7130_v40  ;;  %v8613_v40 = vld [vmem:[#allocation66_spill] sm:$0xff] }
 0x27a   : > { %v3235_v5 = vmax.f32 %v2458_v10, 0.0  ;;  %v2460_v58 = vadd.f32 %v2459_v12, %v7388_v53  ;;  %v2310_v26 = vpop.f32.mrf.mxu0  ;;  %2963 = vmatmul.mubr.bf16.gmra.mxu0 %v8611_v57  ;;  %v8614_v57 = vld [vmem:[#allocation78_spill] sm:$0xff] }
 0x27b   : > { %v2463_v17 = vpop.f32.mrf.mxu1  ;;  %2866 = vmatmul.mubr.bf16.gmra.mxu1 %v8610_v56  ;;  %v7492_v52 = vadd.f32 %v2310_v26, %v7135_v21  ;;  %2970 = vmatprep.mubr.bf16.mxu0 %v8612_v38 }
 0x27c   : > { %v7489_v7 = vpack.c.bf16 %v3235_v5, %v3232_v47  ;;  %v3236_v29 = vmax.f32 %v2460_v58, 0.0  ;;  %v2464_v32 = vadd.f32 %v2463_v17, %v7396_v0  ;;  %5372 = vmatprep.mubr.msk.bf16.mxu1 %vm1731_vm0, %v8613_v40  ;;  %v2312_v53 = vpop.f32.mrf.mxu0  ;;  %v5841_v5 = vld [vmem:[#allocation8 + $0x38] sm:$0xff]  }
 0x27d   : > { %v2465_v3 = vpop.f32.mrf.mxu1  ;;  %v7499_v4 = vadd.f32 %v2312_v53, %v7138_v35  ;;  %v8616_v40 = vld [vmem:[#allocation80_spill] sm:$0xff] }
 0x27e   : > { %v2466_v36 = vadd.f32 %v2465_v3, %v7402_v59  ;;  %v7502_v15 = vpack.c.bf16 %v3236_v29, %v3233_v55  ;;  %v2314_v10 = vpop.f32.mrf.mxu0  ;;  %v3238_v58 = vmax.f32 %v2464_v32, 0.0  ;;  %v5842_v59 = vld [vmem:[#allocation8 + $0x70] sm:$0xff]   ;;  %v8615_v29 = vld [vmem:[#allocation69_spill] sm:$0xff] }
 0x27f   : > { %v2467_v1 = vpop.f32.mrf.mxu1  ;;  %v7505_v21 = vadd.f32 %v2314_v10, %v7141_v51  ;;  %v5843_v10 = vld [vmem:[#allocation8 + $0x30] sm:$0xff]  }
 0x280   : > { %v2468_v0 = vadd.f32 %v2467_v1, %v7408_v6  ;;  %v2316_v12 = vpop.f32.mrf.mxu0  ;;  %v3239_v51 = vmax.f32 %v2466_v36, 0.0  ;;  %v5844_v36 = vld [vmem:[#allocation8 + $0x68] sm:$0xff]  }
 0x281   : > { %v2469_v47 = vpop.f32.mrf.mxu1  ;;  %v7509_v17 = vadd.f32 %v2316_v12, %v7146_v45  ;;  %v8617_v45 = vld [vmem:[#allocation72_spill] sm:$0xff] }
 0x282   : > { %v3241_v26 = vmax.f32 %v2468_v0, 0.0  ;;  %v2470_v35 = vadd.f32 %v2469_v47, %v7412_v23  ;;  %v4873_v56 = vpop.f32.mrf.mxu0  ;;  %2971 = vmatmul.mubr.bf16.gmra.mxu0 %v8614_v57  ;;  %v5859_v23 = vld [vmem:[#allocation8 + $0xa0] sm:$0xff]  }
 0x283   : > { %v2473_v55 = vpop.f32.mrf.mxu1  ;;  %5373 = vmatmul.mubr.msk.bf16.vlgmr.msra.gmra.mxu1 %vm1731_vm0, %v8615_v29  ;;  %2978 = vmatprep.mubr.bf16.mxu0 %v8616_v40  ;;  %v8619_v40 = vld [vmem:[#allocation75_spill] sm:$0xff] }
 0x284   : > { %v7515_v6 = vpack.c.bf16 %v3241_v26, %v3238_v58  ;;  %v3242_v38 = vmax.f32 %v2470_v35, 0.0  ;;  %v2474_v32 = vadd.f32 %v2473_v55, %v7420_v13  ;;  %5376 = vmatprep.mubr.msk.bf16.mxu1 %vm1731_vm0, %v8617_v45  ;;  %v4874_v3 = vpop.f32.mrf.mxu0  ;;  %5211 = vmatpush3.bf16.msra.mxu1 %v5841_v5  ;;  %v5845_v55 = vld [vmem:[#allocation8 + $0x28] sm:$0xff]  }
 0x285   : > { %v2475_v53 = vpop.f32.mrf.mxu1  ;;  %v7522_v0 = vadd.f32 %v4874_v3, %v4873_v56  ;;  %5212 = vmatprep.subr.bf16.mxu1 %v5842_v59  ;;  %5410 = vmatprep.subr.bf16.mxu0 %v5859_v23  ;;  %v5846_v59 = vld [vmem:[#allocation8 + $0x60] sm:$0xff]  }
 0x286   : > { %v2476_v1 = vadd.f32 %v2475_v53, %v7426_v11  ;;  %v7524_v12 = vpack.c.bf16 %v3242_v38, %v3239_v51  ;;  %v4876_v47 = vpop.f32.mrf.mxu0  ;;  %5411 = vmatpush3.bf16.msra.mxu0 %v5859_v23  ;;  %v3244_v5 = vmax.f32 %v2474_v32, 0.0  ;;  %v8618_v38 = vld [vmem:[#allocation81_spill] sm:$0xff]  ;;  %v8620_v53 = vld [vmem:[#allocation83_spill] sm:$0xff] }
 0x287   : > { %v2477_v13 = vpop.f32.mrf.mxu1 }
 0x288   : > { %v2478_v58 = vadd.f32 %v2477_v13, %v7432_v31  ;;  %v4877_v35 = vpop.f32.mrf.mxu0  ;;  %5213 = vmatpush3.bf16.msra.mxu1 %v5843_v10  ;;  %v3245_v31 = vmax.f32 %v2476_v1, 0.0  ;;  %v5848_v1 = vld [vmem:[#allocation8 + $0x58] sm:$0xff]  }
 0x289   : > { %v2479_v26 = vpop.f32.mrf.mxu1  ;;  %v7528_v56 = vadd.f32 %v4877_v35, %v4876_v47  ;;  %5214 = vmatprep.subr.bf16.mxu1 %v5844_v36  ;;  %v5847_v36 = vld [vmem:[#allocation8 + $0x20] sm:$0xff]  }
 0x28a   : > { %v3247_v57 = vmax.f32 %v2478_v58, 0.0  ;;  %v2480_v11 = vadd.f32 %v2479_v26, %v7436_v30  ;;  %v4879_v51 = vpop.f32.mrf.mxu0  ;;  %2979 = vmatmul.mubr.bf16.gmra.mxu0 %v8618_v38  ;;  %v8621_v30 = vld [vmem:[#allocation79_spill] sm:$0xff] }
 0x28b   : > { %v2483_v29 = vpop.f32.mrf.mxu1  ;;  %5377 = vmatmul.mubr.msk.bf16.gmra.mxu1 %vm1731_vm0, %v8619_v40  ;;  %2986 = vmatprep.mubr.bf16.mxu0 %v8620_v53 }
 0x28c   : > { %v7533_v45 = vpack.c.bf16 %v3247_v57, %v3244_v5  ;;  %v3248_v23 = vmax.f32 %v2480_v11, 0.0  ;;  %v2484_v32 = vadd.f32 %v2483_v29, %v7444_v44  ;;  %5380 = vmatprep.mubr.msk.bf16.mxu1 %vm1731_vm0, %v8621_v30  ;;  %v4880_v10 = vpop.f32.mrf.mxu0  ;;  %5215 = vmatpush3.bf16.msra.mxu1 %v5845_v55  ;;  %v5849_v11 = vld [vmem:[#allocation8 + $0x18] sm:$0xff]  }
 0x28d   : > { %v2485_v3 = vpop.f32.mrf.mxu1  ;;  %v7540_v47 = vadd.f32 %v4880_v10, %v4879_v51  ;;  %5216 = vmatprep.subr.bf16.mxu1 %v5846_v59  ;;  %v5860_v10 = vld [vmem:[#allocation8 + $0x98] sm:$0xff]  }
 0x28e   : > { %v2486_v13 = vadd.f32 %v2485_v3, %v7450_v50  ;;  %v7542_v58 = vpack.c.bf16 %v3248_v23, %v3245_v31  ;;  %v4882_v35 = vpop.f32.mrf.mxu0  ;;  %v3250_v29 = vmax.f32 %v2484_v32, 0.0  ;;  %v5850_v50 = vld [vmem:[#allocation8 + $0x50] sm:$0xff]   ;;  %v8623_v23 = vld [vmem:[#allocation82_spill] sm:$0xff]  ;;  %v8624_v3 = vld [vmem:[#allocation89_spill] sm:$0xff]  ;;  %5412 = vmatprep.subr.bf16.mxu0 %v5860_v10 }
 0x28f   : > { %v2487_v26 = vpop.f32.mrf.mxu1  ;;  %v8622_v31 = vld [vmem:[#allocation87_spill] sm:$0xff]  ;;  %5413 = vmatpush3.bf16.msra.mxu0 %v5860_v10 }
 0x290   : > { %v2488_v44 = vadd.f32 %v2487_v26, %v7456_v42  ;;  %v4883_v57 = vpop.f32.mrf.mxu0  ;;  %5217 = vmatpush3.bf16.msra.mxu1 %v5847_v36  ;;  %v3251_v42 = vmax.f32 %v2486_v13, 0.0  ;;  %v5851_v26 = vld [vmem:[#allocation8 + $0x10] sm:$0xff]   ;;  %v5852_v13 = vld [vmem:[#allocation8 + $0x48] sm:$0xff]  }
 0x291   : > { %v2489_v5 = vpop.f32.mrf.mxu1  ;;  %v7546_v40 = vadd.f32 %v4883_v57, %v4882_v35  ;;  %5218 = vmatprep.subr.bf16.mxu1 %v5848_v1 }
 0x292   : > { %v3253_v38 = vmax.f32 %v2488_v44, 0.0  ;;  %v2490_v55 = vadd.f32 %v2489_v5, %v7460_v20  ;;  %v4885_v51 = vpop.f32.mrf.mxu0  ;;  %2987 = vmatmul.mubr.bf16.gmra.mxu0 %v8622_v31  ;;  %v8625_v20 = vld [vmem:[#allocation88_spill] sm:$0xff] }
 0x293   : > { %v2493_v59 = vpop.f32.mrf.mxu1  ;;  %5381 = vmatmul.mubr.msk.bf16.gmra.mxu1 %vm1731_vm0, %v8623_v23  ;;  %2994 = vmatprep.mubr.bf16.mxu0 %v8624_v3  ;;  %v8627_v3 = vld [vmem:[#allocation93_spill] sm:$0xff] }
 0x294   : > { %v7551_v53 = vpack.c.bf16 %v3253_v38, %v3250_v29  ;;  %v3254_v30 = vmax.f32 %v2490_v55, 0.0  ;;  %v2494_v32 = vadd.f32 %v2493_v59, %v7468_v25  ;;  %5384 = vmatprep.mubr.msk.bf16.mxu1 %vm1731_vm0, %v8625_v20  ;;  %v4886_v1 = vpop.f32.mrf.mxu0  ;;  %5219 = vmatpush3.bf16.msra.mxu1 %v5849_v11  ;;  %v5853_v59 = vld [vmem:[#allocation8 + $0x8] sm:$0xff]  }
 0x295   : > { %v2495_v36 = vpop.f32.mrf.mxu1  ;;  %v7558_v44 = vadd.f32 %v4886_v1, %v4885_v51  ;;  %5220 = vmatprep.subr.bf16.mxu1 %v5850_v50  ;;  %v5854_v50 = vld [vmem:[#allocation8 + $0x40] sm:$0xff]  }
 0x296   : > { %v2496_v35 = vadd.f32 %v2495_v36, %v7474_v16  ;;  %v7560_v5 = vpack.c.bf16 %v3254_v30, %v3251_v42  ;;  %v4888_v57 = vpop.f32.mrf.mxu0  ;;  %v3256_v11 = vmax.f32 %v2494_v32, 0.0  ;;  %v8626_v30 = vld [vmem:[#allocation92_spill] sm:$0xff]  ;;  %v8628_v36 = vld [vmem:[#allocation49_spill] sm:$0xff] }
 0x297   : > { %v2497_v25 = vpop.f32.mrf.mxu1 }
 0x298   : > { %v2498_v29 = vadd.f32 %v2497_v25, %v7480_v49  ;;  %v4889_v55 = vpop.f32.mrf.mxu0  ;;  %5221 = vmatpush3.bf16.msra.mxu1 %v5851_v26  ;;  %v3257_v49 = vmax.f32 %v2496_v35, 0.0 }
 0x299   : > { %v2499_v38 = vpop.f32.mrf.mxu1  ;;  %v7564_v51 = vadd.f32 %v4889_v55, %v4888_v57  ;;  %5222 = vmatprep.subr.bf16.mxu1 %v5852_v13  ;;  %v5855_v13 = vld [vmem:[#allocation8] sm:$0xff]  }
 0x29a   : > { %v3259_v31 = vmax.f32 %v2498_v29, 0.0  ;;  %v2500_v16 = vadd.f32 %v2499_v38, %v7484_v63  ;;  %v4891_v42 = vpop.f32.mrf.mxu0  ;;  %2995 = vmatmul.mubr.bf16.gmra.mxu0 %v8626_v30  ;;  %v8629_v63 = vld [vmem:[#allocation96_spill] sm:$0xff] }
 0x29b   : > { %v2503_v23 = vpop.f32.mrf.mxu1  ;;  %5385 = vmatmul.mubr.msk.bf16.gmra.mxu1 %vm1731_vm0, %v8627_v3  ;;  %3002 = vmatprep.mubr.bf16.mxu0 %v8628_v36  ;;  %v8632_v36 = vld [vmem:[#allocation53_spill] sm:$0xff] }
 0x29c   : > { %v7569_v20 = vpack.c.bf16 %v3259_v31, %v3256_v11  ;;  %v3260_v10 = vmax.f32 %v2500_v16, 0.0  ;;  %v2504_v32 = vadd.f32 %v2503_v23, %v7492_v52  ;;  %5388 = vmatprep.mubr.msk.bf16.mxu1 %vm1731_vm0, %v8629_v63  ;;  %v4892_v26 = vpop.f32.mrf.mxu0  ;;  %5223 = vmatpush3.bf16.msra.mxu1 %v5853_v59 }
 0x29d   : > { %v2505_v1 = vpop.f32.mrf.mxu1  ;;  %v7576_v57 = vadd.f32 %v4892_v26, %v4891_v42  ;;  %5224 = vmatprep.subr.bf16.mxu1 %v5854_v50  ;;  %v8630_v42 = vld [vmem:[#allocation51_spill] sm:$0xff]  ;;  %v8631_v50 = vld [vmem:[#allocation101_spill] sm:$0xff] }
 0x29e   : > { %v2506_v25 = vadd.f32 %v2505_v1, %v7499_v4  ;;  %v7578_v35 = vpack.c.bf16 %v3260_v10, %v3257_v49  ;;  %v4894_v38 = vpop.f32.mrf.mxu0  ;;  %v3262_v31 = vmax.f32 %v2504_v32, 0.0  ;;  %v8633_v32 = vld [vmem:[#allocation104_spill] sm:$0xff] }
 0x29f   : > { %v2507_v29 = vpop.f32.mrf.mxu1 }
 0x2a0   : > { %v2508_v52 = vadd.f32 %v2507_v29, %v7505_v21  ;;  %v4895_v11 = vpop.f32.mrf.mxu0  ;;  %5225 = vmatpush3.bf16.msra.mxu1 %v5855_v13  ;;  %v3263_v3 = vmax.f32 %v2506_v25, 0.0 }
 0x2a1   : > { %v2509_v55 = vpop.f32.mrf.mxu1  ;;  %v7582_v59 = vadd.f32 %v4895_v11, %v4894_v38 }
 0x2a2   : > { %v3265_v16 = vmax.f32 %v2508_v52, 0.0  ;;  %v2510_v23 = vadd.f32 %v2509_v55, %v7509_v17  ;;  %v4897_v4 = vpop.f32.mrf.mxu0  ;;  %3003 = vmatmul.mubr.bf16.gmra.mxu0 %v8630_v42  ;;  %v5861_v17 = vld [vmem:[#allocation8 + $0x90] sm:$0xff]  }
 0x2a3   : > { %v2513_v30 = vpop.f32.mrf.mxu1  ;;  %5389 = vmatmul.mubr.msk.bf16.gmra.mxu1 %vm1731_vm0, %v8631_v50  ;;  %3010 = vmatprep.mubr.bf16.mxu0 %v8632_v36  ;;  %v8638_v36 = vld [vmem:[#allocation108_spill] sm:$0xff] }
 0x2a4   : > { %v7587_v49 = vpack.c.bf16 %v3265_v16, %v3262_v31  ;;  %v3266_v21 = vmax.f32 %v2510_v23, 0.0  ;;  %v2514_v10 = vadd.f32 %v2513_v30, %v7217_v37  ;;  %5392 = vmatprep.mubr.msk.bf16.mxu1 %vm1731_vm0, %v8633_v32  ;;  %v4898_v1 = vpop.f32.mrf.mxu0  ;;  %5414 = vmatprep.subr.bf16.mxu0 %v5861_v17  ;;  %v8634_v30 = vld [vmem:[#allocation55_spill] sm:$0xff] }
 0x2a5   : > { %v2515_v63 = vpop.f32.mrf.mxu1  ;;  %v7594_v13 = vadd.f32 %v4898_v1, %v4897_v4  ;;  %5415 = vmatpush3.bf16.msra.mxu0 %v5861_v17  ;;  %v8635_v4 = vld [vmem:[#allocation107_spill] sm:$0xff] }
 0x2a6   : > { %v2516_v26 = vadd.f32 %v2515_v63, %v7225_v22  ;;  %v7596_v29 = vpack.c.bf16 %v3266_v21, %v3263_v3  ;;  %v7598_v38 = vpop.f32.mrf.mxu0  ;;  %v3268_v11 = vmax.f32 %v2514_v10, 0.0  ;;  %v8637_v21 = vld [vmem:[#allocation57_spill] sm:$0xff] }
 0x2a7   : > { %v2517_v25 = vpop.f32.mrf.mxu1 }
 0x2a8   : > { %v2518_v37 = vadd.f32 %v2517_v25, %v7231_v41  ;;  %v7601_v55 = vpop.f32.mrf.mxu0  ;;  %v3269_v42 = vmax.f32 %v2516_v26, 0.0 }
 0x2a9   : > { %v2519_v52 = vpop.f32.mrf.mxu1 }
 0x2aa   : > { %v3271_v31 = vmax.f32 %v2518_v37, 0.0  ;;  %v2520_v16 = vadd.f32 %v2519_v52, %v7237_v2  ;;  %v4903_v22 = vpop.f32.mrf.mxu0  ;;  %3011 = vmatmul.mubr.bf16.gmra.mxu0 %v8634_v30  ;;  %v8639_v30 = vld [vmem:[#allocation59_spill] sm:$0xff] }
 0x2ab   : > { %v2523_v23 = vpop.f32.mrf.mxu1  ;;  %5393 = vmatmul.mubr.msk.bf16.gmra.mxu1 %vm1731_vm0, %v8635_v4  ;;  %3018 = vmatprep.mubr.bf16.mxu0 %v8637_v21  ;;  %v8643_v21 = vld [vmem:[#allocation113_spill] sm:$0xff] }
 0x2ac   : > { %v7607_v50 = vpack.c.bf16 %v3271_v31, %v3268_v11  ;;  %v3272_v3 = vmax.f32 %v2520_v16, 0.0  ;;  %v2524_v41 = vadd.f32 %v2523_v23, %v7245_v43  ;;  %5396 = vmatprep.mubr.msk.bf16.mxu1 %vm1731_vm0, %v8638_v36  ;;  %v4904_v2 = vpop.f32.mrf.mxu0 }
 0x2ad   : > { %v2525_v10 = vpop.f32.mrf.mxu1  ;;  %v7614_v17 = vadd.f32 %v4904_v2, %v4903_v22 }
 0x2ae   : > { %8636 = vst [vmem:[#allocation23_spill] sm:$0xff] %v7607_v50  ;;  %v2526_v32 = vadd.f32 %v2525_v10, %v7253_v62  ;;  %v7616_v63 = vpack.c.bf16 %v3272_v3, %v3269_v42  ;;  %v7618_v26 = vpop.f32.mrf.mxu0  ;;  %v3274_v52 = vmax.f32 %v2524_v41, 0.0  ;;  %v8640_v62 = vld [vmem:[#allocation110_spill] sm:$0xff]  ;;  %v8642_v3 = vld [vmem:[#allocation61_spill] sm:$0xff] }
 0x2af   : > { %v2527_v1 = vpop.f32.mrf.mxu1  ;;  %v5862_v41 = vld [vmem:[#allocation8 + $0x88] sm:$0xff]  }
 0x2b0   : > { %v2528_v25 = vadd.f32 %v2527_v1, %v7259_v33  ;;  %v7621_v43 = vpop.f32.mrf.mxu0  ;;  %v3275_v22 = vmax.f32 %v2526_v32, 0.0  ;;  %5416 = vmatprep.subr.bf16.mxu0 %v5862_v41 }
 0x2b1   : > { %v2529_v37 = vpop.f32.mrf.mxu1  ;;  %5417 = vmatpush3.bf16.msra.mxu0 %v5862_v41 }
 0x2b2   : > { %v3277_v11 = vmax.f32 %v2528_v25, 0.0  ;;  %v2530_v31 = vadd.f32 %v2529_v37, %v7265_v48  ;;  %v4909_v23 = vpop.f32.mrf.mxu0  ;;  %3019 = vmatmul.mubr.bf16.gmra.mxu0 %v8639_v30  ;;  %v8646_v30 = vld [vmem:[#allocation85_spill] sm:$0xff] }
 0x2b3   : > { %v2533_v16 = vpop.f32.mrf.mxu1  ;;  %5397 = vmatmul.mubr.msk.bf16.gmra.mxu1 %vm1731_vm0, %v8640_v62  ;;  %3026 = vmatprep.mubr.bf16.mxu0 %v8642_v3 }
 0x2b4   : > { %v7627_v4 = vpack.c.bf16 %v3277_v11, %v3274_v52  ;;  %v3278_v42 = vmax.f32 %v2530_v31, 0.0  ;;  %v2534_v33 = vadd.f32 %v2533_v16, %v7273_v27  ;;  %5400 = vmatprep.mubr.msk.bf16.mxu1 %vm1731_vm0, %v8643_v21  ;;  %v4910_v36 = vpop.f32.mrf.mxu0  ;;  %v8645_v27 = vld [vmem:[#allocation84_spill] sm:$0xff] }
 0x2b5   : > { %v2535_v48 = vpop.f32.mrf.mxu1  ;;  %v7634_v2 = vadd.f32 %v4910_v36, %v4909_v23  ;;  %v8647_v23 = vld [vmem:[#allocation63_spill] sm:$0xff] }
 0x2b6   : > { %8641 = vst [vmem:[#allocation90_spill] sm:$0xff] %v7627_v4  ;;  %v2536_v10 = vadd.f32 %v2535_v48, %v7281_v8  ;;  %v7636_v1 = vpack.c.bf16 %v3278_v42, %v3275_v22  ;;  %v7638_v25 = vpop.f32.mrf.mxu0  ;;  %v3280_v31 = vmax.f32 %v2534_v33, 0.0  ;;  %v8648_v22 = vld [vmem:[#allocation117_spill] sm:$0xff]  ;;  %v8650_v48 = vld [vmem:[#allocation38_spill] sm:$0xff] }
 0x2b7   : > { %v2537_v32 = vpop.f32.mrf.mxu1 }
 0x2b8   : > { %8644 = vst [vmem:[#allocation91_spill] sm:$0xff] %v7636_v1  ;;  %v2538_v37 = vadd.f32 %v2537_v32, %v8645_v27  ;;  %v7641_v11 = vpop.f32.mrf.mxu0  ;;  %v3281_v42 = vmax.f32 %v2536_v10, 0.0  ;;  %v8651_v27 = vld [vmem:[#allocation77_spill] sm:$0xff]  ;;  %v8653_v10 = vld [vmem:[#allocation86_spill] sm:$0xff] }
 0x2b9   : > { %v2539_v52 = vpop.f32.mrf.mxu1 }
 0x2ba   : > { %v3283_v16 = vmax.f32 %v2538_v37, 0.0  ;;  %v2540_v62 = vadd.f32 %v2539_v52, %v8646_v30  ;;  %v4915_v8 = vpop.f32.mrf.mxu0  ;;  %3027 = vmatmul.mubr.bf16.gmra.mxu0 %v8647_v23  ;;  %v942_v37 = vsub.s32 2, %v8651_v27  ;;  %v8652_v52 = vld [vmem:[#allocation22_spill] sm:$0xff]  ;;  %v8654_v27 = vld [vmem:[#allocation40_spill] sm:$0xff] }
 0x2bb   : > { %v2543_v3 = vpop.f32.mrf.mxu1  ;;  %5401 = vmatmul.mubr.msk.bf16.gmra.mxu1 %vm1731_vm0, %v8648_v22 }
 0x2bc   : > { %v7647_v21 = vpack.c.bf16 %v3283_v16, %v3280_v31  ;;  %v3284_v41 = vmax.f32 %v2540_v62, 0.0  ;;  %v2544_v36 = vadd.f32 %v2543_v3, %v8650_v48  ;;  %3571 = vmatprep.mubr.bf16.mxu1 %v7357_v34  ;;  %v4916_v33 = vpop.f32.mrf.mxu0  ;;  %v5872_v3 = vld [vmem:[#allocation7] sm:$0x7] }
 0x2bd   : > { %v2545_v32 = vpop.f32.mrf.mxu1  ;;  %v7653_v4 = vadd.f32 %v4916_v33, %v4915_v8  ;;  %v7662_v34 = vrot.slane %v5872_v3, %v942_v37 }
 0x2be   : > { %8649 = vst [vmem:[#allocation42_spill] sm:$0xff] %v7647_v21  ;;  %v2546_v30 = vadd.f32 %v2545_v32, %v8652_v52  ;;  %v7655_v23 = vpack.c.bf16 %v3284_v41, %v3281_v42  ;;  %v7657_v22 = vpop.f32.mrf.mxu0  ;;  %v3286_v48 = vmax.f32 %v2544_v36, 0.0 }
 0x2bf   : > { %v2547_v1 = vpop.f32.mrf.mxu1  ;;  %v2587_v37 = vadd.f32 %v7522_v0, %v7662_v34 }
 0x2c0   : > { %v2548_v31 = vadd.f32 %v2547_v1, %v8653_v10  ;;  %v7660_v62 = vpop.f32.mrf.mxu0  ;;  %v3287_v42 = vmax.f32 %v2546_v30, 0.0 }
 0x2c1   : > { %v2549_v16 = vpop.f32.mrf.mxu1 }
 0x2c2   : > { %v3289_v21 = vmax.f32 %v2548_v31, 0.0  ;;  %v2550_v50 = vadd.f32 %v2549_v16, %v8654_v27  ;;  %v4921_v32 = vpop.f32.mrf.mxu0  ;;  %v5863_v16 = vld [vmem:[#allocation8 + $0x80] sm:$0xff]  }
 0x2c3   : > { %v4985_v8 = vpop.f32.mrf.mxu1  ;;  %3572 = vmatmul.mubr.bf16.vlgmr.msra.gmra.mxu1 %v7345_v28  ;;  %5418 = vmatprep.subr.bf16.mxu0 %v5863_v16 }
 0x2c4   : > { %v7666_v41 = vpack.c.bf16 %v3289_v21, %v3286_v48  ;;  %v3290_v33 = vmax.f32 %v2550_v50, 0.0  ;;  %3579 = vmatprep.mubr.bf16.mxu1 %v7381_v24  ;;  %v4922_v1 = vpop.f32.mrf.mxu0  ;;  %5419 = vmatpush3.bf16.msra.mxu0 %v5863_v16  ;;  %v2590_v21 = vadd.f32 %v7528_v56, %v7662_v34 }
 0x2c5   : > { %v4986_v52 = vpop.f32.mrf.mxu1  ;;  %v7671_v10 = vadd.f32 %v4922_v1, %v4921_v32 }
 0x2c6   : > { %v4987_v36 = vadd.f32 %v4986_v52, %v4985_v8  ;;  %v7673_v31 = vpack.c.bf16 %v3290_v33, %v3287_v42  ;;  %v7675_v3 = vpop.f32.mrf.mxu0  ;;  %v2595_v33 = vadd.f32 %v7540_v47, %v7662_v34 }
 0x2c7   : > { %v4988_v28 = vpop.f32.mrf.mxu1 }
 0x2c8   : > { %v7677_v30 = vadd.f32 %v4987_v36, %v2587_v37  ;;  %v7679_v50 = vpop.f32.mrf.mxu0 }
 0x2c9   : > { %v4989_v24 = vpop.f32.mrf.mxu1 }
 0x2ca   : > { %v4990_v0 = vadd.f32 %v4989_v24, %v4988_v28  ;;  %v4927_v48 = vpop.f32.mrf.mxu0  ;;  %v2598_v28 = vadd.f32 %v7546_v40, %v7662_v34 }
 0x2cb   : > { %v4991_v27 = vpop.f32.mrf.mxu1  ;;  %3580 = vmatmul.mubr.bf16.gmra.mxu1 %v7369_v61 }
 0x2cc   : > { %v7684_v32 = vadd.f32 %v4990_v0, %v2590_v21  ;;  %3587 = vmatprep.mubr.bf16.mxu1 %v7405_v9  ;;  %v4928_v8 = vpop.f32.mrf.mxu0 }
 0x2cd   : > { %v4992_v42 = vpop.f32.mrf.mxu1  ;;  %v7689_v1 = vadd.f32 %v4928_v8, %v4927_v48 }
 0x2ce   : > { %v4993_v52 = vadd.f32 %v4992_v42, %v4991_v27  ;;  %v7691_v37 = vpop.f32.mrf.mxu0  ;;  %v2603_v27 = vadd.f32 %v7558_v44, %v7662_v34 }
 0x2cf   : > { %v4994_v56 = vpop.f32.mrf.mxu1 }
 0x2d0   : > { %v7693_v36 = vadd.f32 %v4993_v52, %v2595_v33  ;;  %v7695_v16 = vpop.f32.mrf.mxu0 }
 0x2d1   : > { %v4995_v61 = vpop.f32.mrf.mxu1 }
 0x2d2   : > { %v4996_v9 = vadd.f32 %v4995_v61, %v4994_v56  ;;  %v4933_v24 = vpop.f32.mrf.mxu0  ;;  %v2606_v61 = vadd.f32 %v7564_v51, %v7662_v34 }
 0x2d3   : > { %v4997_v21 = vpop.f32.mrf.mxu1  ;;  %3588 = vmatmul.mubr.bf16.gmra.mxu1 %v7393_v39 }
 0x2d4   : > { %v7700_v47 = vadd.f32 %v4996_v9, %v2598_v28  ;;  %3595 = vmatprep.mubr.bf16.mxu1 %v7429_v60  ;;  %v4934_v0 = vpop.f32.mrf.mxu0 }
 0x2d5   : > { %v4998_v48 = vpop.f32.mrf.mxu1  ;;  %v7705_v8 = vadd.f32 %v4934_v0, %v4933_v24  ;;  %v2611_v0 = vadd.f32 %v7576_v57, %v7662_v34 }
 0x2d6   : > { %v4999_v42 = vadd.f32 %v4998_v48, %v4997_v21  ;;  %v7707_v33 = vpop.f32.mrf.mxu0 }
 0x2d7   : > { %v5000_v40 = vpop.f32.mrf.mxu1 }
 0x2d8   : > { %v7709_v52 = vadd.f32 %v4999_v42, %v2603_v27  ;;  %v7711_v56 = vpop.f32.mrf.mxu0 }
 0x2d9   : > { %v5001_v39 = vpop.f32.mrf.mxu1 }
 0x2da   : > { %8655 = vst [vmem:[#allocation24_spill] sm:$0xff] %v7709_v52  ;;  %v5002_v60 = vadd.f32 %v5001_v39, %v5000_v40  ;;  %v4939_v28 = vpop.f32.mrf.mxu0 }
 0x2db   : > { %v5003_v9 = vpop.f32.mrf.mxu1  ;;  %3596 = vmatmul.mubr.bf16.gmra.mxu1 %v7417_v18 }
 0x2dc   : > { %v7716_v44 = vadd.f32 %v5002_v60, %v2606_v61  ;;  %3603 = vmatprep.mubr.bf16.mxu1 %v7453_v46  ;;  %v4940_v24 = vpop.f32.mrf.mxu0  ;;  %v2614_v61 = vadd.f32 %v7582_v59, %v7662_v34 }
 0x2dd   : > { %v5004_v21 = vpop.f32.mrf.mxu1  ;;  %v7721_v48 = vadd.f32 %v4940_v24, %v4939_v28  ;;  %v2619_v24 = vadd.f32 %v7594_v13, %v7662_v34 }
 0x2de   : > { %8656 = vst [vmem:[#allocation44_spill] sm:$0xff] %v7716_v44  ;;  %v5005_v27 = vadd.f32 %v5004_v21, %v5003_v9  ;;  %v7723_v42 = vpop.f32.mrf.mxu0  ;;  %v4902_v21 = vadd.f32 %v7601_v55, %v7598_v38 }
 0x2df   : > { %v5006_v51 = vpop.f32.mrf.mxu1 }
 0x2e0   : > { %v7725_v40 = vadd.f32 %v5005_v27, %v2611_v0  ;;  %v7727_v39 = vpop.f32.mrf.mxu0 }
 0x2e1   : > { %v5007_v18 = vpop.f32.mrf.mxu1 }
 0x2e2   : > { %v5008_v46 = vadd.f32 %v5007_v18, %v5006_v51  ;;  %v4945_v60 = vpop.f32.mrf.mxu0 }
 0x2e3   : > { %v5009_v44 = vpop.f32.mrf.mxu1  ;;  %3604 = vmatmul.mubr.bf16.gmra.mxu1 %v7441_v19 }
 0x2e4   : > { %v7732_v57 = vadd.f32 %v5008_v46, %v2614_v61  ;;  %3611 = vmatprep.mubr.bf16.mxu1 %v7477_v14  ;;  %v4946_v28 = vpop.f32.mrf.mxu0  ;;  %v2622_v14 = vadd.f32 %v4902_v21, %v7662_v34 }
 0x2e5   : > { %v5010_v9 = vpop.f32.mrf.mxu1  ;;  %v7739_v0 = vadd.f32 %v4946_v28, %v4945_v60  ;;  %v4908_v60 = vadd.f32 %v7621_v43, %v7618_v26 }
 0x2e6   : > { %8657 = vst [vmem:[#allocation25_spill] sm:$0xff] %v7732_v57  ;;  %v5011_v59 = vadd.f32 %v5010_v9, %v5009_v44  ;;  %v7741_v27 = vpop.f32.mrf.mxu0  ;;  %v2627_v44 = vadd.f32 %v7614_v17, %v7662_v34 }
 0x2e7   : > { %v5012_v51 = vpop.f32.mrf.mxu1 }
 0x2e8   : > { %v7743_v18 = vadd.f32 %v5011_v59, %v2619_v24  ;;  %v7745_v19 = vpop.f32.mrf.mxu0 }
 0x2e9   : > { %v5013_v61 = vpop.f32.mrf.mxu1 }
 0x2ea   : > { %v5014_v46 = vadd.f32 %v5013_v61, %v5012_v51  ;;  %v4951_v57 = vpop.f32.mrf.mxu0 }
 0x2eb   : > { %v5015_v52 = vpop.f32.mrf.mxu1  ;;  %3612 = vmatmul.mubr.bf16.gmra.mxu1 %v7465_v54 }
 0x2ec   : > { %v7749_v13 = vadd.f32 %v5014_v46, %v2622_v14  ;;  %3619 = vmatprep.mubr.bf16.mxu1 %v7502_v15  ;;  %v4952_v38 = vpop.f32.mrf.mxu0  ;;  %v2630_v15 = vadd.f32 %v4908_v60, %v7662_v34 }
 0x2ed   : > { %v5016_v55 = vpop.f32.mrf.mxu1  ;;  %v7756_v28 = vadd.f32 %v4952_v38, %v4951_v57  ;;  %v4914_v57 = vadd.f32 %v7641_v11, %v7638_v25 }
 0x2ee   : > { %v5017_v9 = vadd.f32 %v5016_v55, %v5015_v52  ;;  %v7758_v24 = vpop.f32.mrf.mxu0  ;;  %v2635_v52 = vadd.f32 %v7634_v2, %v7662_v34 }
 0x2ef   : > { %v5018_v21 = vpop.f32.mrf.mxu1 }
 0x2f0   : > { %v7760_v59 = vadd.f32 %v5017_v9, %v2627_v44  ;;  %v7762_v54 = vpop.f32.mrf.mxu0 }
 0x2f1   : > { %v5019_v51 = vpop.f32.mrf.mxu1 }
 0x2f2   : > { %v5020_v61 = vadd.f32 %v5019_v51, %v5018_v21  ;;  %v4957_v14 = vpop.f32.mrf.mxu0 }
 0x2f3   : > { %v5021_v46 = vpop.f32.mrf.mxu1  ;;  %3620 = vmatmul.mubr.bf16.gmra.mxu1 %v7489_v7 }
 0x2f4   : > { %v7766_v17 = vadd.f32 %v5020_v61, %v2630_v15  ;;  %3627 = vmatprep.mubr.bf16.mxu1 %v7524_v12  ;;  %v4958_v26 = vpop.f32.mrf.mxu0  ;;  %v2638_v12 = vadd.f32 %v4914_v57, %v7662_v34 }
 0x2f5   : > { %v5022_v43 = vpop.f32.mrf.mxu1  ;;  %v7773_v38 = vadd.f32 %v4958_v26, %v4957_v14  ;;  %v2643_v14 = vadd.f32 %v7653_v4, %v7662_v34 }
 0x2f6   : > { %v5023_v55 = vadd.f32 %v5022_v43, %v5021_v46  ;;  %v7775_v44 = vpop.f32.mrf.mxu0  ;;  %v4920_v46 = vadd.f32 %v7660_v62, %v7657_v22 }
 0x2f7   : > { %v5024_v60 = vpop.f32.mrf.mxu1 }
 0x2f8   : > { %v7777_v9 = vadd.f32 %v5023_v55, %v2635_v52  ;;  %v7779_v7 = vpop.f32.mrf.mxu0 }
 0x2f9   : > { %v5025_v21 = vpop.f32.mrf.mxu1 }
 0x2fa   : > { %v5026_v51 = vadd.f32 %v5025_v21, %v5024_v60  ;;  %v4963_v15 = vpop.f32.mrf.mxu0 }
 0x2fb   : > { %v5027_v61 = vpop.f32.mrf.mxu1  ;;  %3628 = vmatmul.mubr.bf16.gmra.mxu1 %v7515_v6 }
 0x2fc   : > { %v7783_v2 = vadd.f32 %v5026_v51, %v2638_v12  ;;  %3635 = vmatprep.mubr.bf16.mxu1 %v7542_v58  ;;  %v4964_v25 = vpop.f32.mrf.mxu0  ;;  %v2646_v58 = vadd.f32 %v4920_v46, %v7662_v34 }
 0x2fd   : > { %v5028_v11 = vpop.f32.mrf.mxu1  ;;  %v7790_v26 = vadd.f32 %v4964_v25, %v4963_v15  ;;  %v2651_v15 = vadd.f32 %v7671_v10, %v7662_v34 }
 0x2fe   : > { %v5029_v43 = vadd.f32 %v5028_v11, %v5027_v61  ;;  %v7792_v52 = vpop.f32.mrf.mxu0  ;;  %v4926_v61 = vadd.f32 %v7679_v50, %v7675_v3 }
 0x2ff   : > { %v5030_v57 = vpop.f32.mrf.mxu1 }
 0x300   : > { %v7794_v55 = vadd.f32 %v5029_v43, %v2643_v14  ;;  %v7796_v6 = vpop.f32.mrf.mxu0 }
 0x301   : > { %v5031_v60 = vpop.f32.mrf.mxu1 }
 0x302   : > { %v5032_v21 = vadd.f32 %v5031_v60, %v5030_v57  ;;  %v5097_v51 = vpop.f32.mrf.mxu0  ;;  %v2654_v60 = vadd.f32 %v4926_v61, %v7662_v34 }
 0x303   : > { %v5033_v12 = vpop.f32.mrf.mxu1  ;;  %3636 = vmatmul.mubr.bf16.gmra.mxu1 %v7533_v45 }
 0x304   : > { %v7800_v4 = vadd.f32 %v5032_v21, %v2646_v58  ;;  %3643 = vmatprep.mubr.bf16.mxu1 %v7560_v5  ;;  %v5098_v62 = vpop.f32.mrf.mxu0 }
 0x305   : > { %v5034_v22 = vpop.f32.mrf.mxu1  ;;  %v5099_v11 = vadd.f32 %v5098_v62, %v5097_v51  ;;  %v4932_v51 = vadd.f32 %v7695_v16, %v7691_v37 }
 0x306   : > { %v5035_v25 = vadd.f32 %v5034_v22, %v5033_v12  ;;  %v7807_v46 = vpop.f32.mrf.mxu0 }
 0x307   : > { %v5036_v14 = vpop.f32.mrf.mxu1  ;;  %v7812_v45 = vadd.f32 %v5099_v11, %v7677_v30  ;;  %v2659_v30 = vadd.f32 %v7689_v1, %v7662_v34 }
 0x308   : > { %v7809_v43 = vadd.f32 %v5035_v25, %v2651_v15  ;;  %v7814_v5 = vpop.f32.mrf.mxu0 }
 0x309   : > { %v5037_v57 = vpop.f32.mrf.mxu1 }
 0x30a   : > { %v5038_v58 = vadd.f32 %v5037_v57, %v5036_v14  ;;  %v7817_v21 = vpop.f32.mrf.mxu0 }
 0x30b   : > { %v5039_v10 = vpop.f32.mrf.mxu1  ;;  %3644 = vmatmul.mubr.bf16.gmra.mxu1 %v7551_v53 }
 0x30c   : > { %v7820_v3 = vadd.f32 %v5038_v58, %v2654_v60  ;;  %3651 = vmatprep.mubr.bf16.mxu1 %v7578_v35  ;;  %v7823_v12 = vpop.f32.mrf.mxu0  ;;  %v2662_v35 = vadd.f32 %v4932_v51, %v7662_v34  ;;  %v2667_v60 = vadd.f32 %v7705_v8, %v7662_v34  ;;  %v4938_v58 = vadd.f32 %v7711_v56, %v7707_v33 }
 0x30d   : > { %v5040_v50 = vpop.f32.mrf.mxu1 }
 0x30e   : > { %v5041_v22 = vadd.f32 %v5040_v50, %v5039_v10  ;;  %v7829_v15 = vpop.f32.mrf.mxu0 }
 0x30f   : > { %v5042_v62 = vpop.f32.mrf.mxu1 }
 0x310   : > { %v7831_v61 = vadd.f32 %v5041_v22, %v2659_v30  ;;  %v7833_v25 = vpop.f32.mrf.mxu0 }
 0x311   : > { %v5043_v53 = vpop.f32.mrf.mxu1 }
 0x312   : > { %v5044_v11 = vadd.f32 %v5043_v53, %v5042_v62  ;;  %v7836_v57 = vpop.f32.mrf.mxu0 }
 0x313   : > { %v5045_v14 = vpop.f32.mrf.mxu1  ;;  %3652 = vmatmul.mubr.bf16.gmra.mxu1 %v7569_v20 }
 0x314   : > { %v7839_v1 = vadd.f32 %v5044_v11, %v2662_v35  ;;  %3659 = vmatprep.mubr.bf16.mxu1 %v7596_v29  ;;  %v7842_v16 = vpop.f32.mrf.mxu0  ;;  %v2670_v29 = vadd.f32 %v4938_v58, %v7662_v34  ;;  %v2675_v11 = vadd.f32 %v7721_v48, %v7662_v34 }
 0x315   : > { %v5046_v37 = vpop.f32.mrf.mxu1 }
 0x316   : > { %v5047_v10 = vadd.f32 %v5046_v37, %v5045_v14  ;;  %v7848_v30 = vpop.f32.mrf.mxu0  ;;  %v4944_v14 = vadd.f32 %v7727_v39, %v7723_v42  ;;  %v8663_v42 = vld [vmem:[#allocation91_spill] sm:$0xff] }
 0x317   : > { %v5048_v50 = vpop.f32.mrf.mxu1 }
 0x318   : > { %v7850_v51 = vadd.f32 %v5047_v10, %v2667_v60  ;;  %v7852_v22 = vpop.f32.mrf.mxu0 }
 0x319   : > { %v5049_v20 = vpop.f32.mrf.mxu1 }
 0x31a   : > { %8658 = vst [vmem:[#allocation94_spill] sm:$0xff] %v7850_v51  ;;  %v5050_v62 = vadd.f32 %v5049_v20, %v5048_v50  ;;  %v7855_v35 = vpop.f32.mrf.mxu0 }
 0x31b   : > { %v5051_v53 = vpop.f32.mrf.mxu1  ;;  %3660 = vmatmul.mubr.bf16.gmra.mxu1 %v7587_v49 }
 0x31c   : > { %v7858_v8 = vadd.f32 %v5050_v62, %v2670_v29  ;;  %3667 = vmatprep.mubr.bf16.mxu1 %v7616_v63  ;;  %v7861_v56 = vpop.f32.mrf.mxu0  ;;  %v2678_v63 = vadd.f32 %v4944_v14, %v7662_v34 }
 0x31d   : > { %v5052_v33 = vpop.f32.mrf.mxu1 }
 0x31e   : > { %8659 = vst [vmem:[#allocation95_spill] sm:$0xff] %v7858_v8  ;;  %v5053_v37 = vadd.f32 %v5052_v33, %v5051_v53  ;;  %v7867_v58 = vpop.f32.mrf.mxu0  ;;  %v8661_v8 = vld [vmem:[#allocation23_spill] sm:$0xff]  ;;  %v2683_v33 = vadd.f32 %v7739_v0, %v7662_v34 }
 0x31f   : > { %v5054_v60 = vpop.f32.mrf.mxu1 }
 0x320   : > { %v7869_v10 = vadd.f32 %v5053_v37, %v2675_v11  ;;  %v7871_v50 = vpop.f32.mrf.mxu0  ;;  %v4950_v11 = vadd.f32 %v7745_v19, %v7741_v27 }
 0x321   : > { %v5055_v49 = vpop.f32.mrf.mxu1 }
 0x322   : > { %8660 = vst [vmem:[#allocation46_spill] sm:$0xff] %v7869_v10  ;;  %v5056_v20 = vadd.f32 %v5055_v49, %v5054_v60  ;;  %v7874_v62 = vpop.f32.mrf.mxu0  ;;  %v8665_v10 = vld [vmem:[#allocation90_spill] sm:$0xff] }
 0x323   : > { %v5057_v29 = vpop.f32.mrf.mxu1  ;;  %3668 = vmatmul.mubr.bf16.gmra.mxu1 %v8661_v8 }
 0x324   : > { %v7877_v48 = vadd.f32 %v5056_v20, %v2678_v63  ;;  %3675 = vmatprep.mubr.bf16.mxu1 %v8663_v42  ;;  %v7880_v53 = vpop.f32.mrf.mxu0  ;;  %v2686_v20 = vadd.f32 %v4950_v11, %v7662_v34 }
 0x325   : > { %v5058_v39 = vpop.f32.mrf.mxu1 }
 0x326   : > { %8662 = vst [vmem:[#allocation26_spill] sm:$0xff] %v7877_v48  ;;  %v5059_v14 = vadd.f32 %v5058_v39, %v5057_v29  ;;  %v7886_v60 = vpop.f32.mrf.mxu0  ;;  %v2691_v29 = vadd.f32 %v7756_v28, %v7662_v34  ;;  %v4956_v39 = vadd.f32 %v7762_v54, %v7758_v24 }
 0x327   : > { %v5060_v37 = vpop.f32.mrf.mxu1 }
 0x328   : > { %v7888_v49 = vadd.f32 %v5059_v14, %v2683_v33  ;;  %v7890_v63 = vpop.f32.mrf.mxu0 }
 0x329   : > { %v5061_v8 = vpop.f32.mrf.mxu1 }
 0x32a   : > { %8664 = vst [vmem:[#allocation27_spill] sm:$0xff] %v7888_v49  ;;  %v5062_v42 = vadd.f32 %v5061_v8, %v5060_v37  ;;  %v7893_v51 = vpop.f32.mrf.mxu0  ;;  %v8667_v49 = vld [vmem:[#allocation42_spill] sm:$0xff] }
 0x32b   : > { %v5063_v48 = vpop.f32.mrf.mxu1  ;;  %3676 = vmatmul.mubr.bf16.gmra.mxu1 %v8665_v10 }
 0x32c   : > { %v7896_v0 = vadd.f32 %v5062_v42, %v2686_v20  ;;  %3683 = vmatprep.mubr.bf16.mxu1 %v7655_v23  ;;  %v7899_v19 = vpop.f32.mrf.mxu0  ;;  %v2694_v23 = vadd.f32 %v4956_v39, %v7662_v34 }
 0x32d   : > { %v5064_v27 = vpop.f32.mrf.mxu1 }
 0x32e   : > { %8666 = vst [vmem:[#allocation48_spill] sm:$0xff] %v7896_v0  ;;  %v5065_v33 = vadd.f32 %v5064_v27, %v5063_v48  ;;  %v7905_v14 = vpop.f32.mrf.mxu0  ;;  %v2699_v48 = vadd.f32 %v7773_v38, %v7662_v34  ;;  %v4962_v27 = vadd.f32 %v7779_v7, %v7775_v44 }
 0x32f   : > { %v5066_v11 = vpop.f32.mrf.mxu1 }
 0x330   : > { %v7907_v37 = vadd.f32 %v5065_v33, %v2691_v29  ;;  %v7909_v8 = vpop.f32.mrf.mxu0 }
 0x331   : > { %v5067_v10 = vpop.f32.mrf.mxu1 }
 0x332   : > { %v5068_v20 = vadd.f32 %v5067_v10, %v5066_v11  ;;  %v7912_v0 = vpop.f32.mrf.mxu0 }
 0x333   : > { %v5069_v42 = vpop.f32.mrf.mxu1  ;;  %3684 = vmatmul.mubr.bf16.gmra.mxu1 %v8667_v49 }
 0x334   : > { %v7915_v28 = vadd.f32 %v5068_v20, %v2694_v23  ;;  %3691 = vmatprep.mubr.bf16.mxu1 %v7673_v31  ;;  %v7918_v54 = vpop.f32.mrf.mxu0  ;;  %v2702_v31 = vadd.f32 %v4962_v27, %v7662_v34 }
 0x335   : > { %v5070_v24 = vpop.f32.mrf.mxu1 }
 0x336   : > { %8668 = vst [vmem:[#allocation97_spill] sm:$0xff] %v7915_v28  ;;  %v5071_v29 = vadd.f32 %v5070_v24, %v5069_v42  ;;  %v7924_v33 = vpop.f32.mrf.mxu0  ;;  %v2707_v42 = vadd.f32 %v7790_v26, %v7662_v34  ;;  %v4968_v24 = vadd.f32 %v7796_v6, %v7792_v52  ;;  %v5108_v26 = vadd.f32 %v7833_v25, %v7829_v15 }
 0x337   : > { %v5072_v39 = vpop.f32.mrf.mxu1  ;;  %v5102_v6 = vadd.f32 %v7814_v5, %v7807_v46  ;;  %v5117_v25 = vadd.f32 %v7861_v56, %v7855_v35  ;;  %v5114_v35 = vadd.f32 %v7852_v22, %v7848_v30  ;;  %v5129_v22 = vadd.f32 %v7899_v19, %v7893_v51 }
 0x338   : > { %v7926_v11 = vadd.f32 %v5071_v29, %v2699_v48  ;;  %v7928_v10 = vpop.f32.mrf.mxu0  ;;  %v5126_v51 = vadd.f32 %v7890_v63, %v7886_v60 }
 0x339   : > { %v5073_v49 = vpop.f32.mrf.mxu1  ;;  %v2912_v46 = vadd.f32 %v5102_v6, %v7684_v32 }
 0x33a   : > { %8669 = vst [vmem:[#allocation98_spill] sm:$0xff] %v7926_v11  ;;  %v5074_v23 = vadd.f32 %v5073_v49, %v5072_v39  ;;  %v7931_v28 = vpop.f32.mrf.mxu0  ;;  %v5105_v39 = vadd.f32 %v7823_v12, %v7817_v21 }
 0x33b   : > { %v5075_v20 = vpop.f32.mrf.mxu1  ;;  %3692 = vmatmul.mubr.bf16.gmra.mxu1 %v7666_v41 }
 0x33c   : > { %v7934_v38 = vadd.f32 %v5074_v23, %v2702_v31  ;;  %v7936_v7 = vpop.f32.mrf.mxu0  ;;  %v2710_v23 = vadd.f32 %v4968_v24, %v7662_v34  ;;  %v2917_v21 = vadd.f32 %v5105_v39, %v7693_v36  ;;  %v2920_v34 = vadd.f32 %v5108_v26, %v7700_v47 }
 0x33d   : > { %v5076_v44 = vpop.f32.mrf.mxu1  ;;  %v5111_v36 = vadd.f32 %v7842_v16, %v7836_v57  ;;  %v5120_v47 = vadd.f32 %v7871_v50, %v7867_v58  ;;  %v2933_v57 = vadd.f32 %v5117_v25, %v7725_v40  ;;  %v8671_v58 = vld [vmem:[#allocation24_spill] sm:$0xff]  ;;  %v5123_v25 = vadd.f32 %v7880_v53, %v7874_v62 }
 0x33e   : > { %8670 = vst [vmem:[#allocation99_spill] sm:$0xff] %v7934_v38  ;;  %v5077_v48 = vadd.f32 %v5076_v44, %v5075_v20  ;;  %v7942_v27 = vpop.f32.mrf.mxu0  ;;  %v2949_v62 = vadd.f32 %v5129_v22, %v7760_v59  ;;  %v5141_v63 = vadd.f32 %v7936_v7, %v7931_v28  ;;  %v2944_v59 = vadd.f32 %v5126_v51, %v7749_v13 }
 0x33f   : > { %v5078_v29 = vpop.f32.mrf.mxu1  ;;  %v2925_v50 = vadd.f32 %v5111_v36, %v8671_v58  ;;  %v5132_v36 = vadd.f32 %v7909_v8, %v7905_v14  ;;  %v2941_v14 = vadd.f32 %v5123_v25, %v7743_v18  ;;  %v5138_v28 = vadd.f32 %v7928_v10, %v7924_v33 }
 0x340   : > { %v7946_v49 = vadd.f32 %v5077_v48, %v2707_v42  ;;  %v7948_v31 = vpop.f32.mrf.mxu0 }
 0x341   : > { %v5079_v41 = vpop.f32.mrf.mxu1  ;;  %v2952_v8 = vadd.f32 %v5132_v36, %v7766_v17  ;;  %v5144_v18 = vadd.f32 %v7948_v31, %v7942_v27 }
 0x342   : > { %v5080_v38 = vadd.f32 %v5079_v41, %v5078_v29  ;;  %v7953_v11 = vpop.f32.mrf.mxu0 }
 0x343   : > { %v5374_v52 = vpop.f32.mrf.mxu1  ;;  %v2968_v27 = vadd.f32 %v5144_v18, %v7800_v4 }
 0x344   : > { %v7957_v20 = vadd.f32 %v5080_v38, %v2710_v23  ;;  %v7960_v12 = vpop.f32.mrf.mxu0  ;;  %v3078_v42 = vadd.f32 %v5374_v52, %v2917_v21 }
 0x345   : > { %v3069_v44 = vpop.f32.mrf.mxu1 }
 0x346   : > { %v7963_v24 = vpop.f32.mrf.mxu0  ;;  %v3070_v48 = vadd.f32 %v3069_v44, %v7812_v45  ;;  %v3204_v39 = vmax.f32 %v3078_v42, 0.0  ;;  %v8672_v42 = vld [vmem:[#allocation25_spill] sm:$0xff] }
 0x347   : > { %v5375_v15 = vpop.f32.mrf.mxu1 }
 0x348   : > { %v3081_v29 = vadd.f32 %v5375_v15, %v2920_v34  ;;  %v7971_v5 = vpop.f32.mrf.mxu0  ;;  %v3198_v26 = vmax.f32 %v3070_v48, 0.0  ;;  %v2936_v34 = vadd.f32 %v5120_v47, %v8672_v42 }
 0x349   : > { %v3072_v38 = vpop.f32.mrf.mxu1 }
 0x34a   : > { %v3207_v41 = vmax.f32 %v3081_v29, 0.0  ;;  %v3073_v23 = vadd.f32 %v3072_v38, %v2912_v46  ;;  %v7977_v56 = vpop.f32.mrf.mxu0  ;;  %v8673_v46 = vld [vmem:[#allocation44_spill] sm:$0xff] }
 0x34b   : > { %v5378_v45 = vpop.f32.mrf.mxu1  ;;  %v2928_v40 = vadd.f32 %v5114_v35, %v8673_v46 }
 0x34c   : > { %v3297_v32 = vpack.c.bf16 %v3207_v41, %v3204_v39  ;;  %v3201_v52 = vmax.f32 %v3073_v23, 0.0  ;;  %v7980_v16 = vpop.f32.mrf.mxu0  ;;  %v3094_v44 = vadd.f32 %v5378_v45, %v2933_v57 }
 0x34d   : > { %v3085_v6 = vpop.f32.mrf.mxu1  ;;  %v5153_v33 = vadd.f32 %v7980_v16, %v7977_v56  ;;  %v5150_v56 = vadd.f32 %v7971_v5, %v7963_v24 }
 0x34e   : > { %v3294_v21 = vpack.c.bf16 %v3201_v52, %v3198_v26  ;;  %v7984_v15 = vpop.f32.mrf.mxu0  ;;  %v3086_v48 = vadd.f32 %v3085_v6, %v2925_v50  ;;  %v3216_v47 = vmax.f32 %v3094_v44, 0.0  ;;  %v5135_v50 = vadd.f32 %v7918_v54, %v7912_v0 }
 0x34f   : > { %v5379_v30 = vpop.f32.mrf.mxu1  ;;  %v2965_v0 = vadd.f32 %v5141_v63, %v7794_v55  ;;  %v5147_v55 = vadd.f32 %v7960_v12, %v7953_v11 }
 0x350   : > { %v3097_v29 = vadd.f32 %v5379_v30, %v2936_v34  ;;  %5420 = vmatprep.mubr.bf16.mxu0 %v3294_v21  ;;  %v5155_v38 = vpop.f32.mrf.mxu0  ;;  %v3210_v26 = vmax.f32 %v3086_v48, 0.0  ;;  %v2957_v36 = vadd.f32 %v5135_v50, %v7777_v9 }
 0x351   : > { %v3088_v39 = vpop.f32.mrf.mxu1  ;;  %5421 = vmatmul.mubr.bf16.vlgmr.msra.gmra.mxu0 %v3297_v32  ;;  %v5156_v9 = vadd.f32 %v5155_v38, %v7984_v15  ;;  %v2973_v38 = vadd.f32 %v5147_v55, %v7809_v43 }
 0x352   : > { %v3219_v41 = vmax.f32 %v3097_v29, 0.0  ;;  %v3089_v23 = vadd.f32 %v3088_v39, %v2928_v40  ;;  %v7995_v19 = vpop.f32.mrf.mxu0 }
 0x353   : > { %v5382_v45 = vpop.f32.mrf.mxu1 }
 0x354   : > { %v3303_v35 = vpack.c.bf16 %v3219_v41, %v3216_v47  ;;  %v3213_v52 = vmax.f32 %v3089_v23, 0.0  ;;  %v7998_v53 = vpop.f32.mrf.mxu0  ;;  %v3110_v6 = vadd.f32 %v5382_v45, %v2949_v62  ;;  %v2960_v23 = vadd.f32 %v5138_v28, %v7783_v2 }
 0x355   : > { %v3101_v32 = vpop.f32.mrf.mxu1 }
 0x356   : > { %v3300_v57 = vpack.c.bf16 %v3213_v52, %v3210_v26  ;;  %v8002_v21 = vpop.f32.mrf.mxu0  ;;  %v3102_v44 = vadd.f32 %v3101_v32, %v2941_v14  ;;  %v3228_v17 = vmax.f32 %v3110_v6, 0.0  ;;  %v5864_v52 = vld [vmem:[#allocation11 + $0x38] sm:$0xff]   ;;  %v2981_v6 = vadd.f32 %v5153_v33, %v7831_v61 }
 0x357   : > { %v5383_v60 = vpop.f32.mrf.mxu1  ;;  %5452 = vmatprep.subr.bf16.mxu0 %v5864_v52  ;;  %v5159_v61 = vadd.f32 %v7998_v53, %v7995_v19 }
 0x358   : > { %v3113_v58 = vadd.f32 %v5383_v60, %v2952_v8  ;;  %5424 = vmatprep.mubr.bf16.mxu0 %v3300_v57  ;;  %v8009_v42 = vpop.f32.mrf.mxu0  ;;  %v3222_v29 = vmax.f32 %v3102_v44, 0.0  ;;  %5453 = vmatpush3.bf16.msra.mxu0 %v5864_v52  ;;  %v2984_v8 = vadd.f32 %v5156_v9, %v7839_v1 }
 0x359   : > { %v3104_v34 = vpop.f32.mrf.mxu1  ;;  %5425 = vmatmul.mubr.bf16.gmra.mxu0 %v3303_v35  ;;  %v5162_v1 = vadd.f32 %v8009_v42, %v8002_v21 }
 0x35a   : > { %v3231_v30 = vmax.f32 %v3113_v58, 0.0  ;;  %v3105_v22 = vadd.f32 %v3104_v34, %v2944_v59  ;;  %v5163_v7 = vpop.f32.mrf.mxu0  ;;  %v2976_v58 = vadd.f32 %v5150_v56, %v7820_v3  ;;  %v8674_v3 = vld [vmem:[#allocation46_spill] sm:$0xff] }
 0x35b   : > { %v5386_v48 = vpop.f32.mrf.mxu1 }
 0x35c   : > { %v3309_v13 = vpack.c.bf16 %v3231_v30, %v3228_v17  ;;  %v3225_v46 = vmax.f32 %v3105_v22, 0.0  ;;  %v5164_v54 = vpop.f32.mrf.mxu0  ;;  %v3126_v39 = vadd.f32 %v5386_v48, %v2965_v0  ;;  %v5865_v30 = vld [vmem:[#allocation11 + $0x30] sm:$0xff]  }
 0x35d   : > { %v3117_v40 = vpop.f32.mrf.mxu1  ;;  %v5165_v24 = vadd.f32 %v5164_v54, %v5163_v7  ;;  %5454 = vmatprep.subr.bf16.mxu0 %v5865_v30  ;;  %v8675_v54 = vld [vmem:[#allocation94_spill] sm:$0xff] }
 0x35e   : > { %v3306_v25 = vpack.c.bf16 %v3225_v46, %v3222_v29  ;;  %v5166_v31 = vpop.f32.mrf.mxu0  ;;  %v3118_v10 = vadd.f32 %v3117_v40, %v2957_v36  ;;  %v3240_v26 = vmax.f32 %v3126_v39, 0.0  ;;  %5455 = vmatpush3.bf16.msra.mxu0 %v5865_v30  ;;  %v2989_v40 = vadd.f32 %v5159_v61, %v8675_v54 }
 0x35f   : > { %v5387_v47 = vpop.f32.mrf.mxu1 }
 0x360   : > { %v3129_v41 = vadd.f32 %v5387_v47, %v2968_v27  ;;  %5428 = vmatprep.mubr.bf16.mxu0 %v3306_v25  ;;  %v5167_v51 = vpop.f32.mrf.mxu0  ;;  %v3234_v32 = vmax.f32 %v3118_v10, 0.0  ;;  %v8676_v25 = vld [vmem:[#allocation26_spill] sm:$0xff]  ;;  %v8677_v47 = vld [vmem:[#allocation95_spill] sm:$0xff] }
 0x361   : > { %v3120_v45 = vpop.f32.mrf.mxu1  ;;  %5429 = vmatmul.mubr.bf16.gmra.mxu0 %v3309_v13  ;;  %v5168_v34 = vadd.f32 %v5167_v51, %v5166_v31  ;;  %v2997_v13 = vadd.f32 %v5165_v24, %v8674_v3  ;;  %v2992_v33 = vadd.f32 %v5162_v1, %v8677_v47 }
 0x362   : > { %v3243_v4 = vmax.f32 %v3129_v41, 0.0  ;;  %v3121_v35 = vadd.f32 %v3120_v45, %v2960_v23  ;;  %v5169_v16 = vpop.f32.mrf.mxu0 }
 0x363   : > { %v5390_v62 = vpop.f32.mrf.mxu1  ;;  %v3000_v39 = vadd.f32 %v5168_v34, %v8676_v25 }
 0x364   : > { %v3315_v57 = vpack.c.bf16 %v3243_v4, %v3240_v26  ;;  %v3237_v2 = vmax.f32 %v3121_v35, 0.0  ;;  %v5170_v11 = vpop.f32.mrf.mxu0  ;;  %v3142_v15 = vadd.f32 %v5390_v62, %v2981_v6  ;;  %v5866_v26 = vld [vmem:[#allocation11 + $0x28] sm:$0xff]  }
 0x365   : > { %v3133_v12 = vpop.f32.mrf.mxu1  ;;  %v5171_v10 = vadd.f32 %v5170_v11, %v5169_v16  ;;  %5456 = vmatprep.subr.bf16.mxu0 %v5866_v26 }
 0x366   : > { %v3312_v14 = vpack.c.bf16 %v3237_v2, %v3234_v32  ;;  %v5172_v60 = vpop.f32.mrf.mxu0  ;;  %v3134_v5 = vadd.f32 %v3133_v12, %v2973_v38  ;;  %v3252_v18 = vmax.f32 %v3142_v15, 0.0  ;;  %5457 = vmatpush3.bf16.msra.mxu0 %v5866_v26  ;;  %v8678_v12 = vld [vmem:[#allocation27_spill] sm:$0xff]  ;;  %v8679_v15 = vld [vmem:[#allocation97_spill] sm:$0xff] }
 0x367   : > { %v5391_v63 = vpop.f32.mrf.mxu1 }
 0x368   : > { %v3145_v44 = vadd.f32 %v5391_v63, %v2984_v8  ;;  %5432 = vmatprep.mubr.bf16.mxu0 %v3312_v14  ;;  %v5173_v59 = vpop.f32.mrf.mxu0  ;;  %v3246_v7 = vmax.f32 %v3134_v5, 0.0  ;;  %v3005_v14 = vadd.f32 %v5171_v10, %v8678_v12  ;;  %v8680_v5 = vld [vmem:[#allocation48_spill] sm:$0xff]  ;;  %v5871_v12 = vld [vmem:[#allocation11] sm:$0xff]  }
 0x369   : > { %v3136_v50 = vpop.f32.mrf.mxu1  ;;  %5433 = vmatmul.mubr.bf16.gmra.mxu0 %v3315_v57  ;;  %v5174_v4 = vadd.f32 %v5173_v59, %v5172_v60 }
 0x36a   : > { %v3255_v17 = vmax.f32 %v3145_v44, 0.0  ;;  %v3137_v43 = vadd.f32 %v3136_v50, %v2976_v58  ;;  %v5175_v22 = vpop.f32.mrf.mxu0 }
 0x36b   : > { %v5394_v28 = vpop.f32.mrf.mxu1  ;;  %v3008_v44 = vadd.f32 %v5174_v4, %v8680_v5 }
 0x36c   : > { %v3321_v48 = vpack.c.bf16 %v3255_v17, %v3252_v18  ;;  %v3249_v29 = vmax.f32 %v3137_v43, 0.0  ;;  %v5176_v19 = vpop.f32.mrf.mxu0  ;;  %v3158_v0 = vadd.f32 %v5394_v28, %v2997_v13  ;;  %v5867_v18 = vld [vmem:[#allocation11 + $0x20] sm:$0xff]  }
 0x36d   : > { %v3149_v53 = vpop.f32.mrf.mxu1  ;;  %v5177_v21 = vadd.f32 %v5176_v19, %v5175_v22  ;;  %5458 = vmatprep.subr.bf16.mxu0 %v5867_v18  ;;  %v8681_v13 = vld [vmem:[#allocation98_spill] sm:$0xff] }
 0x36e   : > { %v3318_v46 = vpack.c.bf16 %v3249_v29, %v3246_v7  ;;  %v5178_v36 = vpop.f32.mrf.mxu0  ;;  %v3150_v42 = vadd.f32 %v3149_v53, %v2989_v40  ;;  %v3264_v55 = vmax.f32 %v3158_v0, 0.0  ;;  %5459 = vmatpush3.bf16.msra.mxu0 %v5867_v18  ;;  %v8682_v40 = vld [vmem:[#allocation99_spill] sm:$0xff] }
 0x36f   : > { %v5395_v27 = vpop.f32.mrf.mxu1  ;;  %v3013_v57 = vadd.f32 %v5177_v21, %v7907_v37 }
 0x370   : > { %v3161_v31 = vadd.f32 %v5395_v27, %v3000_v39  ;;  %5436 = vmatprep.mubr.bf16.mxu0 %v3318_v46  ;;  %v5179_v41 = vpop.f32.mrf.mxu0  ;;  %v3258_v56 = vmax.f32 %v3150_v42, 0.0  ;;  %v5868_v42 = vld [vmem:[#allocation11 + $0x18] sm:$0xff]  }
 0x371   : > { %v3152_v23 = vpop.f32.mrf.mxu1  ;;  %5437 = vmatmul.mubr.bf16.gmra.mxu0 %v3321_v48  ;;  %v5180_v45 = vadd.f32 %v5179_v41, %v5178_v36  ;;  %5460 = vmatprep.subr.bf16.mxu0 %v5868_v42 }
 0x372   : > { %v3267_v51 = vmax.f32 %v3161_v31, 0.0  ;;  %v3153_v9 = vadd.f32 %v3152_v23, %v2992_v33  ;;  %v5181_v35 = vpop.f32.mrf.mxu0  ;;  %v5869_v31 = vld [vmem:[#allocation11 + $0x10] sm:$0xff]   ;;  %5461 = vmatpush3.bf16.msra.mxu0 %v5868_v42 }
 0x373   : > { %v5398_v52 = vpop.f32.mrf.mxu1  ;;  %v3016_v38 = vadd.f32 %v5180_v45, %v8679_v15  ;;  %5462 = vmatprep.subr.bf16.mxu0 %v5869_v31 }
 0x374   : > { %v3327_v62 = vpack.c.bf16 %v3267_v51, %v3264_v55  ;;  %v3261_v32 = vmax.f32 %v3153_v9, 0.0  ;;  %v5182_v2 = vpop.f32.mrf.mxu0  ;;  %v3174_v11 = vadd.f32 %v5398_v52, %v3013_v57 }
 0x375   : > { %v3165_v6 = vpop.f32.mrf.mxu1  ;;  %v5183_v59 = vadd.f32 %v5182_v2, %v5181_v35  ;;  %v5870_v2 = vld [vmem:[#allocation11 + $0x8] sm:$0xff]  }
 0x376   : > { %v3324_v16 = vpack.c.bf16 %v3261_v32, %v3258_v56  ;;  %v5184_v8 = vpop.f32.mrf.mxu0  ;;  %v3166_v60 = vadd.f32 %v3165_v6, %v3005_v14  ;;  %v3276_v37 = vmax.f32 %v3174_v11, 0.0  ;;  %5463 = vmatpush3.bf16.msra.mxu0 %v5869_v31 }
 0x377   : > { %v5399_v63 = vpop.f32.mrf.mxu1  ;;  %v3021_v19 = vadd.f32 %v5183_v59, %v8681_v13  ;;  %5464 = vmatprep.subr.bf16.mxu0 %v5870_v2 }
 0x378   : > { %v3177_v24 = vadd.f32 %v5399_v63, %v3016_v38  ;;  %5440 = vmatprep.mubr.bf16.mxu0 %v3324_v16  ;;  %v5185_v58 = vpop.f32.mrf.mxu0  ;;  %v3270_v30 = vmax.f32 %v3166_v60, 0.0 }
 0x379   : > { %v3168_v61 = vpop.f32.mrf.mxu1  ;;  %5441 = vmatmul.mubr.bf16.gmra.mxu0 %v3327_v62  ;;  %v5186_v22 = vadd.f32 %v5185_v58, %v5184_v8 }
 0x37a   : > { %v3279_v50 = vmax.f32 %v3177_v24, 0.0  ;;  %v3169_v34 = vadd.f32 %v3168_v61, %v3008_v44  ;;  %v5187_v17 = vpop.f32.mrf.mxu0  ;;  %5465 = vmatpush3.bf16.msra.mxu0 %v5870_v2 }
 0x37b   : > { %v5402_v43 = vpop.f32.mrf.mxu1  ;;  %v3024_v25 = vadd.f32 %v5186_v22, %v8682_v40  ;;  %5466 = vmatprep.subr.bf16.mxu0 %v5871_v12 }
 0x37c   : > { %v3333_v1 = vpack.c.bf16 %v3279_v50, %v3276_v37  ;;  %v3273_v28 = vmax.f32 %v3169_v34, 0.0  ;;  %v5188_v7 = vpop.f32.mrf.mxu0 }
 0x37d   : > { %v3181_v48 = vpop.f32.mrf.mxu1  ;;  %v5189_v3 = vadd.f32 %v5188_v7, %v5187_v17 }
 0x37e   : > { %v3330_v29 = vpack.c.bf16 %v3273_v28, %v3270_v30  ;;  %v5190_v53 = vpop.f32.mrf.mxu0  ;;  %v3182_v54 = vadd.f32 %v3181_v48, %v3021_v19  ;;  %5467 = vmatpush3.bf16.msra.mxu0 %v5871_v12 }
 0x37f   : > { %v5403_v46 = vpop.f32.mrf.mxu1  ;;  %v3029_v0 = vadd.f32 %v5189_v3, %v7946_v49 }
 0x380   : > { %5444 = vmatprep.mubr.bf16.mxu0 %v3330_v29  ;;  %v5191_v39 = vpop.f32.mrf.mxu0  ;;  %v3282_v10 = vmax.f32 %v3182_v54, 0.0 }
 0x381   : > { %v3184_v36 = vpop.f32.mrf.mxu1  ;;  %5445 = vmatmul.mubr.bf16.gmra.mxu0 %v3333_v1  ;;  %v5192_v27 = vadd.f32 %v5191_v39, %v5190_v53  ;;  %v3190_v33 = vadd.f32 %v5402_v43, %v3029_v0 }
 0x382   : > { %v3185_v21 = vadd.f32 %v3184_v36, %v3024_v25 }
 0x383   : > { %v5226_v47 = vpop.f32.mrf.mxu1  ;;  %v3032_v41 = vadd.f32 %v5192_v27, %v7957_v20  ;;  %v3288_v26 = vmax.f32 %v3190_v33, 0.0 }
 0x384   : > { %v3285_v23 = vmax.f32 %v3185_v21, 0.0 }
 0x385   : > { %v5227_v55 = vpop.f32.mrf.mxu1  ;;  %v3193_v49 = vadd.f32 %v5403_v46, %v3032_v41 }
 0x386   : > { %v3336_v51 = vpack.c.bf16 %v3285_v23, %v3282_v10  ;;  %v8046_v45 = vadd.f32 %v5227_v55, %v5226_v47  ;;  %v8124_v47 = vld [vmem:[#allocation10] ss:$0 sm:$0xff] }
 0x387   : > { %v8048_v9 = vpop.f32.mrf.mxu1  ;;  %v3291_v4 = vmax.f32 %v3193_v49, 0.0 }
 0x388   : > { %5448 = vmatprep.mubr.bf16.mxu0 %v3336_v51  ;;  %v3574_v55 = vadd.f32 %v8046_v45, %v8124_v47 }
 0x389   : > { %v5230_v35 = vpop.f32.mrf.mxu1  ;;  %v3339_v52 = vpack.c.bf16 %v3291_v4, %v3288_v26 }
 0x38a   : > { %v5231_v10 = vadd.f32 %v5230_v35, %v8048_v9 }
 0x38b   : > { %v5232_v56 = vpop.f32.mrf.mxu1  ;;  %5449 = vmatmul.mubr.bf16.gmra.mxu0 %v3339_v52 }
 0x38d   : > { %v5233_v20 = vpop.f32.mrf.mxu1 }
 0x38e   : > { %v5234_v31 = vadd.f32 %v5233_v20, %v5232_v56  ;;  %v3577_v56 = vadd.f32 %v5231_v10, %v8124_v47 }
 0x38f   : > { %v5235_v62 = vpop.f32.mrf.mxu1 }
 0x390   : > { %v3582_v51 = vadd.f32 %v5234_v31, %v8124_v47 }
 0x391   : > { %v5236_v32 = vpop.f32.mrf.mxu1 }
 0x392   : > { %v5237_v21 = vadd.f32 %v5236_v32, %v5235_v62 }
 0x393   : > { %v8050_v57 = vpop.f32.mrf.mxu1 }
 0x394   : > { %v3585_v49 = vadd.f32 %v5237_v21, %v8124_v47 }
 0x395   : > { %v5239_v6 = vpop.f32.mrf.mxu1 }
 0x396   : > { %v5240_v32 = vadd.f32 %v5239_v6, %v8050_v57 }
 0x397   : > { %v8052_v16 = vpop.f32.mrf.mxu1 }
 0x398   : > { %v3590_v10 = vadd.f32 %v5240_v32, %v8124_v47 }
 0x399   : > { %v8054_v11 = vpop.f32.mrf.mxu1 }
 0x39a   : > { %v5243_v21 = vadd.f32 %v8054_v11, %v8052_v16 }
 0x39b   : > { %v5244_v14 = vpop.f32.mrf.mxu1 }
 0x39c   : > { %v3593_v16 = vadd.f32 %v5243_v21, %v8124_v47 }
 0x39d   : > { %v5245_v15 = vpop.f32.mrf.mxu1 }
 0x39e   : > { %v5246_v12 = vadd.f32 %v5245_v15, %v5244_v14 }
 0x39f   : > { %v5247_v38 = vpop.f32.mrf.mxu1 }
 0x3a1   : > { %v5248_v8 = vpop.f32.mrf.mxu1 }
 0x3a2   : > { %v5249_v9 = vadd.f32 %v5248_v8, %v5247_v38  ;;  %v3598_v38 = vadd.f32 %v5246_v12, %v8124_v47 }
 0x3a3   : > { %v8056_v63 = vpop.f32.mrf.mxu1 }
 0x3a4   : > { %v3601_v57 = vadd.f32 %v5249_v9, %v8124_v47 }
 0x3a5   : > { %v8058_v60 = vpop.f32.mrf.mxu1 }
 0x3a7   : > { %v8060_v24 = vpop.f32.mrf.mxu1 }
 0x3a9   : > { %v8062_v5 = vpop.f32.mrf.mxu1 }
 0x3ab   : > { %v8064_v44 = vpop.f32.mrf.mxu1 }
 0x3ad   : > { %v8066_v58 = vpop.f32.mrf.mxu1 }
 0x3af   : > { %v8068_v61 = vpop.f32.mrf.mxu1 }
 0x3b1   : > { %v8070_v37 = vpop.f32.mrf.mxu1 }
 0x3b3   : > { %v8072_v59 = vpop.f32.mrf.mxu1 }
 0x3b5   : > { %v8074_v50 = vpop.f32.mrf.mxu1 }
 0x3b7   : > { %v8076_v34 = vpop.f32.mrf.mxu1 }
 0x3b9   : > { %v8078_v18 = vpop.f32.mrf.mxu1 }
 0x3bb   : > { %v8080_v17 = vpop.f32.mrf.mxu1 }
 0x3bd   : > { %v8082_v43 = vpop.f32.mrf.mxu1 }
 0x3bf   : > { %v8084_v30 = vpop.f32.mrf.mxu1 }
 0x3c1   : > { %v8086_v1 = vpop.f32.mrf.mxu1 }
 0x3c3   : > { %v8088_v22 = vpop.f32.mrf.mxu1 }
 0x3c5   : > { %v8090_v28 = vpop.f32.mrf.mxu1 }
 0x3c7   : > { %v8092_v7 = vpop.f32.mrf.mxu1 }
 0x3c9   : > { %v8094_v48 = vpop.f32.mrf.mxu1 }
 0x3cb   : > { %v8096_v29 = vpop.f32.mrf.mxu1 }
 0x3cd   : > { %v8098_v3 = vpop.f32.mrf.mxu1 }
 0x3cf   : > { %v8100_v13 = vpop.f32.mrf.mxu1 }
 0x3d1   : > { %v8102_v19 = vpop.f32.mrf.mxu1 }
 0x3d3   : > { %v8104_v53 = vpop.f32.mrf.mxu1 }
 0x3d5   : > { %v8106_v46 = vpop.f32.mrf.mxu1 }
 0x3d7   : > { %v8108_v0 = vpop.f32.mrf.mxu1 }
 0x3d9   : > { %v8110_v54 = vpop.f32.mrf.mxu1 }
 0x3db   : > { %v8112_v40 = vpop.f32.mrf.mxu1 }
 0x3dd   : > { %v8114_v25 = vpop.f32.mrf.mxu1 }
 0x3df   : > { %v8116_v39 = vpop.f32.mrf.mxu1 }
 0x3e1   : > { %v8118_v36 = vpop.f32.mrf.mxu1 }
 0x3e3   : > { %v8120_v27 = vpop.f32.mrf.mxu1 }
 0x3e5   : > { %v8122_v42 = vpop.f32.mrf.mxu1 }
 0x3e6   : > { %8683 = vst [vmem:[#allocation28_spill] sm:$0xff] %v8122_v42 }
 0x3e7   : > { %v8127_v23 = vpop.f32.mrf.mxu1 }
 0x3e8   : > { %8684 = vst [vmem:[#allocation50_spill] sm:$0xff] %v8127_v23 }
 0x3e9   : > { %v8135_v35 = vpop.f32.mrf.mxu1 }
 0x411   : > { %v5422_v33 = vpop.f32.mrf.mxu0 }
 0x412   : > { %v3743_v20 = vadd.f32 %v5422_v33, %v3582_v51 }
 0x413   : > { %v3734_v41 = vpop.f32.mrf.mxu0 }
 0x414   : > { %v3735_v4 = vadd.f32 %v3734_v41, %v3574_v55  ;;  %v3863_v41 = vmax.f32 %v3743_v20, 0.0 }
 0x415   : > { %v5423_v26 = vpop.f32.mrf.mxu0 }
 0x416   : > { %v3746_v52 = vadd.f32 %v5423_v26, %v3585_v49  ;;  %v3861_v31 = vmax.f32 %v3735_v4, 0.0  ;;  %v8139_v49 = vpop.f32.mrf.mxu1  ;;  %v5252_v26 = vadd.f32 %v8058_v60, %v8056_v63 }
 0x417   : > { %v3737_v62 = vpop.f32.mrf.mxu0 }
 0x418   : > { %v3738_v2 = vadd.f32 %v3737_v62, %v3577_v56  ;;  %v3864_v23 = vmax.f32 %v3746_v52, 0.0  ;;  %v8149_v4 = vpop.f32.mrf.mxu1  ;;  %v5258_v52 = vadd.f32 %v8066_v58, %v8064_v44  ;;  %v5255_v62 = vadd.f32 %v8062_v5, %v8060_v24 }
 0x419   : > { %v5426_v45 = vpop.f32.mrf.mxu0  ;;  %v3606_v60 = vadd.f32 %v5252_v26, %v8124_v47 }
 0x41a   : > { %v3862_v42 = vmax.f32 %v3738_v2, 0.0  ;;  %v3894_v6 = vpack.c.bf16 %v3864_v23, %v3863_v41  ;;  %v3759_v11 = vadd.f32 %v5426_v45, %v3598_v38  ;;  %v8155_v45 = vpop.f32.mrf.mxu1  ;;  %v3614_v21 = vadd.f32 %v5258_v52, %v8124_v47 }
 0x41b   : > { %v3750_v55 = vpop.f32.mrf.mxu0  ;;  %v3609_v24 = vadd.f32 %v5255_v62, %v8124_v47 }
 0x41c   : > { %v3893_v33 = vpack.c.bf16 %v3862_v42, %v3861_v31  ;;  %v3751_v15 = vadd.f32 %v3750_v55, %v3590_v10  ;;  %v5261_v42 = vadd.f32 %v8070_v37, %v8068_v61  ;;  %v3867_v2 = vmax.f32 %v3759_v11, 0.0  ;;  %v8165_v10 = vpop.f32.mrf.mxu1 }
 0x41d   : > { %v5427_v14 = vpop.f32.mrf.mxu0  ;;  %v5264_v55 = vadd.f32 %v8074_v50, %v8072_v59 }
 0x41e   : > { %v3762_v8 = vadd.f32 %v5427_v14, %v3601_v57  ;;  %5468 = vmatprep.mubr.bf16.mxu0 %v3893_v33  ;;  %v3865_v32 = vmax.f32 %v3751_v15, 0.0  ;;  %v3617_v61 = vadd.f32 %v5261_v42, %v8124_v47  ;;  %v5273_v33 = vadd.f32 %v8086_v1, %v8084_v30  ;;  %v8171_v26 = vpop.f32.mrf.mxu1 }
 0x41f   : > { %v3753_v51 = vpop.f32.mrf.mxu0  ;;  %5469 = vmatmul.mubr.bf16.vlgmr.msra.gmra.mxu0 %v3894_v6  ;;  %v5270_v6 = vadd.f32 %v8082_v43, %v8080_v17  ;;  %v5267_v15 = vadd.f32 %v8078_v18, %v8076_v34  ;;  %v3622_v50 = vadd.f32 %v5264_v55, %v8124_v47 }
 0x420   : > { %v3754_v23 = vadd.f32 %v3753_v51, %v3593_v16  ;;  %v3868_v56 = vmax.f32 %v3762_v8, 0.0  ;;  %v3633_v30 = vadd.f32 %v5273_v33, %v8124_v47  ;;  %v8181_v62 = vpop.f32.mrf.mxu1 }
 0x421   : > { %v5430_v20 = vpop.f32.mrf.mxu0  ;;  %v3630_v42 = vadd.f32 %v5270_v6, %v8124_v47  ;;  %v3625_v34 = vadd.f32 %v5267_v15, %v8124_v47 }
 0x422   : > { %v3866_v9 = vmax.f32 %v3754_v23, 0.0  ;;  %v3896_v37 = vpack.c.bf16 %v3868_v56, %v3867_v2  ;;  %v3775_v5 = vadd.f32 %v5430_v20, %v3614_v21  ;;  %v5276_v56 = vadd.f32 %v8090_v28, %v8088_v22 }
 0x423   : > { %v3766_v12 = vpop.f32.mrf.mxu0  ;;  %v5285_v20 = vadd.f32 %v8102_v19, %v8100_v13 }
 0x424   : > { %v3895_v63 = vpack.c.bf16 %v3866_v9, %v3865_v32  ;;  %v3767_v58 = vadd.f32 %v3766_v12, %v3606_v60  ;;  %v3871_v11 = vmax.f32 %v3775_v5, 0.0  ;;  %v5282_v9 = vadd.f32 %v8098_v3, %v8096_v29 }
 0x425   : > { %v5431_v44 = vpop.f32.mrf.mxu0  ;;  %v3638_v28 = vadd.f32 %v5276_v56, %v8124_v47  ;;  %v3649_v13 = vadd.f32 %v5285_v20, %v8124_v47  ;;  %v5288_v5 = vadd.f32 %v8106_v46, %v8104_v53  ;;  %v8686_v56 = vld [vmem:[#allocation50_spill] sm:$0xff] }
 0x426   : > { %v3778_v31 = vadd.f32 %v5431_v44, %v3617_v61  ;;  %5472 = vmatprep.mubr.bf16.mxu0 %v3895_v63  ;;  %v3869_v8 = vmax.f32 %v3767_v58, 0.0  ;;  %v5279_v63 = vadd.f32 %v8094_v48, %v8092_v7  ;;  %v8187_v44 = vpop.f32.mrf.mxu1  ;;  %v3646_v58 = vadd.f32 %v5282_v9, %v8124_v47 }
 0x427   : > { %v3769_v41 = vpop.f32.mrf.mxu0  ;;  %5473 = vmatmul.mubr.bf16.gmra.mxu0 %v3896_v37  ;;  %v3654_v53 = vadd.f32 %v5288_v5, %v8124_v47  ;;  %v5303_v20 = vadd.f32 %v8135_v35, %v8686_v56 }
 0x428   : > { %v3770_v57 = vadd.f32 %v3769_v41, %v3609_v24  ;;  %v3872_v38 = vmax.f32 %v3778_v31, 0.0  ;;  %v3641_v7 = vadd.f32 %v5279_v63, %v8124_v47  ;;  %v5297_v41 = vadd.f32 %v8118_v36, %v8116_v39  ;;  %v5314_v55 = vpop.f32.mrf.mxu1 }
 0x429   : > { %v5434_v14 = vpop.f32.mrf.mxu0 }
 0x42a   : > { %v3870_v16 = vmax.f32 %v3770_v57, 0.0  ;;  %v3898_v1 = vpack.c.bf16 %v3872_v38, %v3871_v11  ;;  %v3791_v18 = vadd.f32 %v5434_v14, %v3630_v42  ;;  %v5294_v57 = vadd.f32 %v8114_v25, %v8112_v40 }
 0x42b   : > { %v3782_v51 = vpop.f32.mrf.mxu0  ;;  %v5291_v14 = vadd.f32 %v8110_v54, %v8108_v0  ;;  %v3665_v46 = vadd.f32 %v5297_v41, %v8124_v47  ;;  %v5315_v41 = vadd.f32 %v5314_v55, %v8187_v44 }
 0x42c   : > { %v3897_v59 = vpack.c.bf16 %v3870_v16, %v3869_v8  ;;  %v3783_v43 = vadd.f32 %v3782_v51, %v3622_v50  ;;  %v3875_v37 = vmax.f32 %v3791_v18, 0.0  ;;  %v5316_v51 = vpop.f32.mrf.mxu1  ;;  %v3662_v36 = vadd.f32 %v5294_v57, %v8124_v47 }
 0x42d   : > { %v5435_v17 = vpop.f32.mrf.mxu0 }
 0x42e   : > { %v3794_v23 = vadd.f32 %v5435_v17, %v3633_v30  ;;  %5476 = vmatprep.mubr.bf16.mxu0 %v3897_v59  ;;  %v3873_v60 = vmax.f32 %v3783_v43, 0.0  ;;  %v3657_v30 = vadd.f32 %v5291_v14, %v8124_v47  ;;  %v5309_v17 = vadd.f32 %v8165_v10, %v8155_v45  ;;  %v5317_v43 = vpop.f32.mrf.mxu1 }
 0x42f   : > { %v3785_v52 = vpop.f32.mrf.mxu0  ;;  %5477 = vmatmul.mubr.bf16.gmra.mxu0 %v3898_v1  ;;  %v8685_v1 = vld [vmem:[#allocation28_spill] sm:$0xff] }
 0x430   : > { %v3786_v32 = vadd.f32 %v3785_v52, %v3625_v34  ;;  %v3876_v2 = vmax.f32 %v3794_v23, 0.0  ;;  %v5300_v42 = vadd.f32 %v8685_v1, %v8120_v27  ;;  %v5306_v34 = vadd.f32 %v8149_v4, %v8139_v49  ;;  %v5319_v63 = vpop.f32.mrf.mxu1 }
 0x431   : > { %v5438_v12 = vpop.f32.mrf.mxu0  ;;  %v3681_v45 = vadd.f32 %v5309_v17, %v8124_v47 }
 0x432   : > { %v3874_v61 = vmax.f32 %v3786_v32, 0.0  ;;  %v3900_v19 = vpack.c.bf16 %v3876_v2, %v3875_v37  ;;  %v3807_v48 = vadd.f32 %v5438_v12, %v3646_v58  ;;  %v3670_v27 = vadd.f32 %v5300_v42, %v8124_v47 }
 0x433   : > { %v3798_v21 = vpop.f32.mrf.mxu0 }
 0x434   : > { %v3899_v22 = vpack.c.bf16 %v3874_v61, %v3873_v60  ;;  %v3799_v3 = vadd.f32 %v3798_v21, %v3638_v28  ;;  %v3879_v16 = vmax.f32 %v3807_v48, 0.0  ;;  %v3678_v61 = vadd.f32 %v5306_v34, %v8124_v47  ;;  %v5320_v28 = vpop.f32.mrf.mxu1 }
 0x435   : > { %v5439_v29 = vpop.f32.mrf.mxu0  ;;  %v3673_v21 = vadd.f32 %v5303_v20, %v8124_v47  ;;  %v5318_v48 = vadd.f32 %v5317_v43, %v5316_v51 }
 0x436   : > { %v3810_v31 = vadd.f32 %v5439_v29, %v3649_v13  ;;  %5480 = vmatprep.mubr.bf16.mxu0 %v3899_v22  ;;  %v3877_v15 = vmax.f32 %v3799_v3, 0.0  ;;  %v5312_v3 = vadd.f32 %v8181_v62, %v8171_v26  ;;  %v3689_v62 = vadd.f32 %v5315_v41, %v8124_v47 }
 0x437   : > { %v3801_v24 = vpop.f32.mrf.mxu0  ;;  %5481 = vmatmul.mubr.bf16.gmra.mxu0 %v3900_v19  ;;  %v3694_v14 = vadd.f32 %v5318_v48, %v8124_v47 }
 0x438   : > { %v3802_v33 = vadd.f32 %v3801_v24, %v3641_v7  ;;  %v3880_v6 = vmax.f32 %v3810_v31, 0.0  ;;  %v5321_v31 = vadd.f32 %v5320_v28, %v5319_v63 }
 0x439   : > { %v5442_v38 = vpop.f32.mrf.mxu0 }
 0x43a   : > { %v3878_v8 = vmax.f32 %v3802_v33, 0.0  ;;  %v3902_v39 = vpack.c.bf16 %v3880_v6, %v3879_v16  ;;  %v3823_v0 = vadd.f32 %v5442_v38, %v3662_v36  ;;  %v3686_v6 = vadd.f32 %v5312_v3, %v8124_v47 }
 0x43b   : > { %v3814_v11 = vpop.f32.mrf.mxu0  ;;  %v3697_v38 = vadd.f32 %v5321_v31, %v8124_v47 }
 0x43c   : > { %v3901_v59 = vpack.c.bf16 %v3878_v8, %v3877_v15  ;;  %v3815_v40 = vadd.f32 %v3814_v11, %v3654_v53  ;;  %v3883_v2 = vmax.f32 %v3823_v0, 0.0 }
 0x43d   : > { %v5443_v50 = vpop.f32.mrf.mxu0 }
 0x43e   : > { %v3826_v25 = vadd.f32 %v5443_v50, %v3665_v46  ;;  %5484 = vmatprep.mubr.bf16.mxu0 %v3901_v59  ;;  %v3881_v32 = vmax.f32 %v3815_v40, 0.0  ;;  %v8224_v50 = vld [vmem:[#allocation13] ss:$0 sm:$0xff] }
 0x43f   : > { %v3817_v54 = vpop.f32.mrf.mxu0  ;;  %5485 = vmatmul.mubr.bf16.gmra.mxu0 %v3902_v39 }
 0x440   : > { %v3818_v23 = vadd.f32 %v3817_v54, %v3657_v30  ;;  %v3884_v18 = vmax.f32 %v3826_v25, 0.0 }
 0x441   : > { %v5446_v52 = vpop.f32.mrf.mxu0 }
 0x442   : > { %v3882_v9 = vmax.f32 %v3818_v23, 0.0  ;;  %v3904_v10 = vpack.c.bf16 %v3884_v18, %v3883_v2  ;;  %v3839_v35 = vadd.f32 %v5446_v52, %v3678_v61 }
 0x443   : > { %v3830_v12 = vpop.f32.mrf.mxu0 }
 0x444   : > { %v3903_v60 = vpack.c.bf16 %v3882_v9, %v3881_v32  ;;  %v3831_v49 = vadd.f32 %v3830_v12, %v3670_v27  ;;  %v3887_v7 = vmax.f32 %v3839_v35, 0.0 }
 0x445   : > { %v5447_v37 = vpop.f32.mrf.mxu0 }
 0x446   : > { %v3842_v4 = vadd.f32 %v5447_v37, %v3681_v45  ;;  %5488 = vmatprep.mubr.bf16.mxu0 %v3903_v60  ;;  %v3885_v58 = vmax.f32 %v3831_v49, 0.0 }
 0x447   : > { %v3833_v22 = vpop.f32.mrf.mxu0  ;;  %5489 = vmatmul.mubr.bf16.gmra.mxu0 %v3904_v10 }
 0x448   : > { %v3834_v13 = vadd.f32 %v3833_v22, %v3673_v21  ;;  %v3888_v19 = vmax.f32 %v3842_v4, 0.0 }
 0x44a   : > { %v3886_v29 = vmax.f32 %v3834_v13, 0.0  ;;  %v3906_v33 = vpack.c.bf16 %v3888_v19, %v3887_v7 }
 0x44b   : > { %v5450_v5 = vpop.f32.mrf.mxu0 }
 0x44c   : > { %v3905_v24 = vpack.c.bf16 %v3886_v29, %v3885_v58  ;;  %v3855_v16 = vadd.f32 %v5450_v5, %v3694_v14 }
 0x44d   : > { %v3846_v57 = vpop.f32.mrf.mxu0 }
 0x44e   : > { %5492 = vmatprep.mubr.bf16.mxu0 %v3905_v24  ;;  %v3847_v8 = vadd.f32 %v3846_v57, %v3686_v6  ;;  %v3891_v53 = vmax.f32 %v3855_v16, 0.0 }
 0x44f   : > { %5493 = vmatmul.mubr.bf16.gmra.mxu0 %v3906_v33  ;;  %v5451_v15 = vpop.f32.mrf.mxu0 }
 0x450   : > { %v3858_v26 = vadd.f32 %v5451_v15, %v3697_v38  ;;  %v3889_v55 = vmax.f32 %v3847_v8, 0.0 }
 0x451   : > { %v3849_v11 = vpop.f32.mrf.mxu0 }
 0x452   : > { %v3850_v51 = vadd.f32 %v3849_v11, %v3689_v62  ;;  %v3892_v44 = vmax.f32 %v3858_v26, 0.0 }
 0x454   : > { %v3890_v59 = vmax.f32 %v3850_v51, 0.0  ;;  %v3908_v39 = vpack.c.bf16 %v3892_v44, %v3891_v53 }
 0x456   : > { %v3907_v46 = vpack.c.bf16 %v3890_v59, %v3889_v55 }
 0x458   : > { %5496 = vmatprep.mubr.bf16.mxu0 %v3907_v46 }
 0x459   : > { %5497 = vmatmul.mubr.bf16.gmra.mxu0 %v3908_v39 }
 0x4df   : > { %v5470_v36 = vpop.f32.mrf.mxu0 }
 0x4e0   : > { %v4023_v30 = vadd.f32 %v5470_v36, %v8224_v50 }
 0x4e1   : > { %v4014_v40 = vpop.f32.mrf.mxu0 }
 0x4e2   : > { %v4015_v54 = vadd.f32 %v8224_v50, %v4014_v40 }
 0x4e3   : > { %v5471_v25 = vpop.f32.mrf.mxu0 }
 0x4e4   : > { %v4026_v47 = vadd.f32 %v5471_v25, %v8224_v50 }
 0x4e5   : > { %v4017_v0 = vpop.f32.mrf.mxu0 }
 0x4e6   : > { %v4770_v1 = vpack.c.bf16 %v4026_v47, %v4023_v30  ;;  %v4018_v42 = vadd.f32 %v8224_v50, %v4017_v0 }
 0x4e7   : > { %v5474_v17 = vpop.f32.mrf.mxu0 }
 0x4e8   : > { %4842 = vst [vmem:[%s8231_s15 + $0x8] sm:$0xff] %v4770_v1   ;;  %v4765_v43 = vpack.c.bf16 %v4018_v42, %v4015_v54  ;;  %v4039_v18 = vadd.f32 %v5474_v17, %v8224_v50 }
 0x4e9   : > { %v4030_v23 = vpop.f32.mrf.mxu0 }
 0x4ea   : > { %4766 = vst [vmem:[%s8231_s15] sm:$0xff] %v4765_v43   ;;  %v4031_v20 = vadd.f32 %v8224_v50, %v4030_v23 }
 0x4eb   : > { %v5475_v34 = vpop.f32.mrf.mxu0 }
 0x4ec   : > { %v4042_v52 = vadd.f32 %v5475_v34, %v8224_v50 }
 0x4ed   : > { %v4033_v56 = vpop.f32.mrf.mxu0 }
 0x4ee   : > { %v4780_v32 = vpack.c.bf16 %v4042_v52, %v4039_v18  ;;  %v4034_v9 = vadd.f32 %v8224_v50, %v4033_v56 }
 0x4ef   : > { %v5478_v2 = vpop.f32.mrf.mxu0 }
 0x4f0   : > { %4844 = vst [vmem:[%s8231_s15 + $0x18] sm:$0xff] %v4780_v32   ;;  %v4775_v12 = vpack.c.bf16 %v4034_v9, %v4031_v20  ;;  %v4055_v27 = vadd.f32 %v5478_v2, %v8224_v50 }
 0x4f1   : > { %v4046_v63 = vpop.f32.mrf.mxu0 }
 0x4f2   : > { %4843 = vst [vmem:[%s8231_s15 + $0x10] sm:$0xff] %v4775_v12   ;;  %v4047_v61 = vadd.f32 %v8224_v50, %v4046_v63 }
 0x4f3   : > { %v5479_v60 = vpop.f32.mrf.mxu0 }
 0x4f4   : > { %v4058_v45 = vadd.f32 %v5479_v60, %v8224_v50 }
 0x4f5   : > { %v4049_v10 = vpop.f32.mrf.mxu0 }
 0x4f6   : > { %v4790_v37 = vpack.c.bf16 %v4058_v45, %v4055_v27  ;;  %v4050_v49 = vadd.f32 %v8224_v50, %v4049_v10 }
 0x4f7   : > { %v5482_v4 = vpop.f32.mrf.mxu0 }
 0x4f8   : > { %4846 = vst [vmem:[%s8231_s15 + $0x28] sm:$0xff] %v4790_v37   ;;  %v4785_v21 = vpack.c.bf16 %v4050_v49, %v4047_v61  ;;  %v4071_v28 = vadd.f32 %v5482_v4, %v8224_v50 }
 0x4f9   : > { %v4062_v35 = vpop.f32.mrf.mxu0 }
 0x4fa   : > { %4845 = vst [vmem:[%s8231_s15 + $0x20] sm:$0xff] %v4785_v21   ;;  %v4063_v58 = vadd.f32 %v8224_v50, %v4062_v35 }
 0x4fb   : > { %v5483_v22 = vpop.f32.mrf.mxu0 }
 0x4fc   : > { %v4074_v13 = vadd.f32 %v5483_v22, %v8224_v50 }
 0x4fd   : > { %v4065_v19 = vpop.f32.mrf.mxu0 }
 0x4fe   : > { %v4800_v29 = vpack.c.bf16 %v4074_v13, %v4071_v28  ;;  %v4066_v3 = vadd.f32 %v8224_v50, %v4065_v19 }
 0x4ff   : > { %v5486_v31 = vpop.f32.mrf.mxu0 }
 0x500   : > { %4848 = vst [vmem:[%s8231_s15 + $0x38] sm:$0xff] %v4800_v29   ;;  %v4795_v7 = vpack.c.bf16 %v4066_v3, %v4063_v58  ;;  %v4087_v5 = vadd.f32 %v5486_v31, %v8224_v50 }
 0x501   : > { %v4078_v48 = vpop.f32.mrf.mxu0 }
 0x502   : > { %4847 = vst [vmem:[%s8231_s15 + $0x30] sm:$0xff] %v4795_v7   ;;  %v4079_v57 = vadd.f32 %v8224_v50, %v4078_v48 }
 0x503   : > { %v5487_v24 = vpop.f32.mrf.mxu0 }
 0x504   : > { %v4090_v41 = vadd.f32 %v5487_v24, %v8224_v50 }
 0x505   : > { %v4081_v33 = vpop.f32.mrf.mxu0 }
 0x506   : > { %v4810_v6 = vpack.c.bf16 %v4090_v41, %v4087_v5  ;;  %v4082_v38 = vadd.f32 %v8224_v50, %v4081_v33 }
 0x507   : > { %v5490_v14 = vpop.f32.mrf.mxu0 }
 0x508   : > { %4850 = vst [vmem:[%s8231_s15 + $0x48] sm:$0xff] %v4810_v6   ;;  %v4805_v15 = vpack.c.bf16 %v4082_v38, %v4079_v57  ;;  %v4103_v62 = vadd.f32 %v5490_v14, %v8224_v50 }
 0x509   : > { %v4094_v8 = vpop.f32.mrf.mxu0 }
 0x50a   : > { %4849 = vst [vmem:[%s8231_s15 + $0x40] sm:$0xff] %v4805_v15   ;;  %v4095_v51 = vadd.f32 %v8224_v50, %v4094_v8 }
 0x50b   : > { %v5491_v26 = vpop.f32.mrf.mxu0 }
 0x50c   : > { %v4106_v16 = vadd.f32 %v5491_v26, %v8224_v50 }
 0x50d   : > { %v4097_v11 = vpop.f32.mrf.mxu0 }
 0x50e   : > { %v4820_v44 = vpack.c.bf16 %v4106_v16, %v4103_v62  ;;  %v4098_v55 = vadd.f32 %v8224_v50, %v4097_v11 }
 0x50f   : > { %v5494_v59 = vpop.f32.mrf.mxu0 }
 0x510   : > { %4852 = vst [vmem:[%s8231_s15 + $0x58] sm:$0xff] %v4820_v44   ;;  %v4815_v53 = vpack.c.bf16 %v4098_v55, %v4095_v51  ;;  %v4119_v36 = vadd.f32 %v5494_v59, %v8224_v50 }
 0x511   : > { %v4110_v46 = vpop.f32.mrf.mxu0 }
 0x512   : > { %4851 = vst [vmem:[%s8231_s15 + $0x50] sm:$0xff] %v4815_v53   ;;  %v4111_v30 = vadd.f32 %v8224_v50, %v4110_v46 }
 0x513   : > { %v5495_v39 = vpop.f32.mrf.mxu0 }
 0x514   : > { %v4122_v40 = vadd.f32 %v5495_v39, %v8224_v50 }
 0x515   : > { %v4113_v25 = vpop.f32.mrf.mxu0 }
 0x516   : > { %v4830_v47 = vpack.c.bf16 %v4122_v40, %v4119_v36  ;;  %v4114_v0 = vadd.f32 %v8224_v50, %v4113_v25 }
 0x518   : > { %4854 = vst [vmem:[%s8231_s15 + $0x68] sm:$0xff] %v4830_v47   ;;  %v4825_v54 = vpack.c.bf16 %v4114_v0, %v4111_v30 }
 0x519   : > { %v5498_v1 = vpop.f32.mrf.mxu0 }
 0x51a   : > { %4853 = vst [vmem:[%s8231_s15 + $0x60] sm:$0xff] %v4825_v54   ;;  %v4135_v43 = vadd.f32 %v5498_v1, %v8224_v50 }
 0x51b   : > { %v4126_v42 = vpop.f32.mrf.mxu0 }
 0x51c   : > { %v4127_v18 = vadd.f32 %v8224_v50, %v4126_v42 }
 0x51d   : > { %v5499_v17 = vpop.f32.mrf.mxu0 }
 0x51e   : > { %v4138_v23 = vadd.f32 %v5499_v17, %v8224_v50 }
 0x51f   : > { %v4129_v34 = vpop.f32.mrf.mxu0 }
 0x520   : > { %v4840_v52 = vpack.c.bf16 %v4138_v23, %v4135_v43  ;;  %v4130_v56 = vadd.f32 %v8224_v50, %v4129_v34  ;;  %4308 = sbr.rel (!%p8687_p13) target bundleno = 1344 (0x540), region = 80 }
 0x522   : > { %4856 = vst [vmem:[%s8231_s15 + $0x78] sm:$0xff] %v4840_v52   ;;  %v4835_v20 = vpack.c.bf16 %v4130_v56, %v4127_v18 }
 0x524   : > { %4855 = vst [vmem:[%s8231_s15 + $0x70] sm:$0xff] %v4835_v20  }
 0x525   : > { %s8697_s8 = smov (!%p4311_p10, %s4310_s8), 32 }
 0x526   : > { %s8281_s29 = sshll.u32 %s8697_s8, 6 }
 0x527   : > { %s4315_s10 = ssub.s32 2048, %s8281_s29 }
 0x528   : > { %4316 = vsyncadd %s4302_s18, %s4315_s10  ;;  %p4723_p0 = scmp.ne.s32.totalorder %s8281_s29, 0  ;;  %s4761_s13 = sshll.u32 %s6211_s28, 11 }
 0x529   : > { %s8291_s17 = scalar_lea.hbm %s8346_s7, %s4761_s13  ;;  %s4321_s19 = sshll.u32 %s8231_s15, 4  ;;  %s8294_s19 = int_to_ptr.vmem [resolvable:$true] %s4321_s19 }
 0x52a   : > { %s6055_s21 = scalar_lea.vmem %s8294_s19, %s8281_s29  ;;  %s6147_s23 = smov [#allocation14]  }
 0x52b   : > { %p6056_p2 = scmp.ne.s32.totalorder %s8294_s19, %s6055_s21  ;;  %s6059_s16 = sshll.u32 %s6147_s23, 4  ;;  %s6060_s16 = int_to_ptr.vmem [resolvable:$false] %s6059_s16 }
 0x52c   : > { %s6061_s28 = scalar_lea.vmem %s6060_s16, 4096  ;;  %p6062_p7 = scmp.lt.s32.totalorder %s8294_s19, %s6060_s16 }
 0x52d   : > { %p6057_p1 = pnand %p6056_p2, %p4723_p0  ;;  %p6063_p5 = scmp.lt.s32.totalorder %s6061_s28, %s6055_s21 }
 0x52f   : > { %p6058_p3 = pneg %p6057_p1  ;;  %p6064_p9 = por %p6063_p5, %p6062_p7 }
 0x531   : > { %p6065_p4 = pnand %p6064_p9, %p6058_p3 }
 0x533   : > { %6068 = shalt.err (!%p6065_p4)
}
 0x534   : > { %s6069_s9 = scalar_lea.hbm %s8291_s17, %s8281_s29  ;;  %s6073_s30 = scalar_lea.hbm %s8346_s7, 2432 }
 0x535   : > { %p6070_p6 = scmp.ne.s32.totalorder %s8291_s17, %s6069_s9  ;;  %p6074_p13 = scmp.lt.s32.totalorder %s8291_s17, %s8346_s7 }
 0x536   : > { %p6075_p10 = scmp.lt.s32.totalorder %s6073_s30, %s6069_s9 }
 0x537   : > { %p6071_p12 = pnand %p6070_p6, %p4723_p0 }
 0x538   : > { %p6076_p2 = por %p6075_p10, %p6074_p13 }
 0x539   : > { %p6072_p11 = pneg %p6071_p12 }
 0x53b   : > { %p6077_p1 = pnand %p6076_p2, %p6072_p11 }
 0x53d   : > { %6080 = shalt.err (!%p6077_p1)
}
 0x53e   : > { %s6148_s13 = smov 64   ;;  %s6149_s11 = smov 4  }
 0x53f   : > { %4327 = dma.vmem_to_hbm [thread:$0]  (%p4723_p0), %s8294_s19, %s8281_s29, %s8291_s17, %s4302_s18, %s6148_s13, %s6148_s13, %s6149_s11  }
 0x540 PF: > { %s4336_s20 = sand.u32 1, %s6119_s24   ;;  %p8688_p3 = scmp.ne.s32.totalorder %s8434_s14, 0 }
 0x541   : > { %s4337_s21 = scalar_lea.sflag [#allocation4], %s4336_s20 }
 0x542   : > { %p5581_p7 = pnand %p4459_p8, %p8688_p3 }
 0x544   : > { %p5582_p5 = pneg %p5581_p7 }
 0x546   : > { %6114 = dma.done.wait (%p5582_p5), %s4337_s21, 2048  }
 0x547   : > { %6116 = vsyncadd (%p5582_p5), %s4337_s21, 4294965248  ;;  %s8689_s27 = sld [smem:[#allocation20_spill]]  ;;  %s8691_s24 = smov %s6123_s25 }
 0x548   : > { %s8690_s23 = sld [smem:[#allocation21_spill]]  ;;  %s8692_s25 = smov %s6127_s26 }
 0x54d   : > { %p23_p9 = scmp.ge.s32.totalorder %s8689_s27, 4  }
 0x54e   : > { %s8693_s26 = smov %s8690_s23 }
 0x54f   :  { %25 = sbr.rel (!%p23_p9) target bundleno = 8 (0x8), region = 117 }
 0x554   :  { %4342 = vsyncpa [#allocation3], 1 }
 0x555   :  { %4344 = vsyncpa [#allocation3 + $0x1], 1 }
 0x556   :  { %4345 = vsyncpa [#allocation6], 1 }
 0x557   :  { %4346 = vsyncpa [#allocation9], 1 }
 0x558   :  { %4347 = vsyncpa [#allocation12], 1 }
 0x559   :  { %4348 = vsyncpa [#allocation4], 1 }
 0x55a   :  { %4350 = vsyncpa [#allocation4 + $0x1], 1 }

</bundles_post_ra>
